<compile_context>
chip_gen: v7x
topology: tpu7x:2x2x1
jax: 0.10.0
libtpu: 0.0.40
codegen_flags: <defaults>
</compile_context>

<pallas_src>
import math

import jax
import jax.numpy as jnp
from jax.experimental import pallas as pl
from jax.experimental.pallas import tpu as pltpu


def _time_sum_diff_kernel(x_ref, y_ref, o_ref):
    """Accumulate sum_t(x - y) into the resident (1, 1, TB, D_eff) output block."""

    @pl.when(pl.program_id(2) == 0)
    def _init():
        o_ref[...] = jnp.zeros_like(o_ref)

    # Two load->reduce chains; no materialized (TB, TT, D_eff) difference temp.
    xs = jnp.sum(x_ref[...].astype(jnp.float32), axis=1)      # (TB, D_eff)
    ys = jnp.sum(y_ref[...].astype(jnp.float32), axis=1)      # (TB, D_eff)
    o_ref[...] += (xs - ys)[None, None, :, :]


def _vmem_cap_bytes():
    """0.75 x physical VMEM (96 MiB on v5e/v6e, 48 MiB on v7x); safe fallback."""
    try:
        info = pltpu.get_tpu_info()
        cap = getattr(info, "vmem_capacity_bytes", None)
        if cap:
            return int(cap) * 3 // 4
    except Exception:
        pass
    return 64 * 1024 * 1024


def _pick_batch_tile(b, tb_target):
    """Largest divisor of b (<= tb_target) keeping >= 2 (ideally even) blocks."""
    best, best_key = 1, (-1, -1, -1)
    for tb in range(1, b + 1):
        if b % tb or tb > tb_target:
            continue
        gb = b // tb
        key = (1 if gb >= 2 else 0, 1 if gb % 2 == 0 else 0, tb)
        if key > best_key:
            best, best_key = tb, key
    return best


def _pick_time_tile(t_eff, tt_target, sub):
    """Return (TT, padded_T).  TT is a multiple of `sub` or the full extent."""
    tt_target = max(sub, (tt_target // sub) * sub)
    if t_eff <= tt_target:
        return t_eff, t_eff                       # single full-extent tile
    best = 0
    for tt in range(sub, tt_target + 1, sub):
        if t_eff % tt == 0:
            best = tt
    if best >= min(512, tt_target):               # good-enough divisor: no padding
        return best, t_eff
    tt = tt_target                                # zero-pad T up to a tile multiple
    return tt, ((t_eff + tt - 1) // tt) * tt


def proj_time_squeeze(x, y, *, tb_target=8, tile_mib=8.0, small_bytes=1 << 20):
    """MSE(x.mean(axis=1), y.mean(axis=1)) via a tiled streaming Pallas kernel."""
    assert x.shape == y.shape, "input/target must have identical shapes"
    assert x.ndim == 3, "expected (batch, time, feature) inputs"
    B, T, D = x.shape
    itemsize = jnp.dtype(x.dtype).itemsize

    # Tiny inputs: kernel launch/grid overhead dwarfs the DMA; plain XLA wins.
    if 2 * x.size * itemsize < small_bytes:
        xm = jnp.mean(x.astype(jnp.float32), axis=1)
        ym = jnp.mean(y.astype(jnp.float32), axis=1)
        return jnp.mean((xm - ym) ** 2)

    # ---- lane folding: (B, T, D) -> (B, T/fold, fold*D) with fold*D % 128 == 0.
    fold = 1
    if D % 128 != 0:
        cand = 128 // math.gcd(D, 128)             # lcm(D, 128) // D
        if cand > 1 and T % cand == 0 and D * cand <= 2048:
            fold = cand
    T_eff, D_eff = T // fold, D * fold
    if fold > 1:
        x = x.reshape(B, T_eff, D_eff)
        y = y.reshape(B, T_eff, D_eff)

    # ---- tiling & VMEM budget -----------------------------------------------
    sub = max(8, 32 // itemsize)          # sublane multiple: f32 8, bf16 16, int8 32
    vmem_cap = _vmem_cap_bytes()
    TB = _pick_batch_tile(B, tb_target)
    out_bytes = 2 * TB * D_eff * 4
    slack = 2 << 20
    # Per unit of TT: 2 inputs x 2 pipeline buffers (HBM dtype) + one full-tile
    # f32 temporary allowance for the in-kernel upcast/reduce.
    unit = TB * D_eff * (4 * itemsize + 4)
    tt_budget = max(sub, (vmem_cap - out_bytes - slack) // unit)
    tt_from_target = max(sub, int(tile_mib * (1 << 20)) // (TB * D_eff * itemsize))
    TT, T_pad = _pick_time_tile(T_eff, min(tt_budget, tt_from_target), sub)

    if T_pad != T_eff:                    # zero padding: sum(x - y) is unchanged
        pad = ((0, 0), (0, T_pad - T_eff), (0, 0))
        x = jnp.pad(x, pad)
        y = jnp.pad(y, pad)

    grid_b = B // TB
    t_blocks = T_pad // TT
    # No batch parallelism and a single time tile -> split it so the second
    # TensorCore (v7x) is not idle.
    if grid_b == 1 and t_blocks == 1 and TT % (2 * sub) == 0:
        TT //= 2
        t_blocks = 2
    grid_p = 2 if (grid_b == 1 and t_blocks >= 2 and t_blocks % 2 == 0) else 1
    grid_t = t_blocks // grid_p

    needed = TB * TT * D_eff * (4 * itemsize + 4) + out_bytes + slack
    vmem_limit = int(min(vmem_cap, max(needed, 16 << 20)))

    in_map = lambda p, b, t, gt=grid_t: (b, p * gt + t, 0)

    partials = pl.pallas_call(
        _time_sum_diff_kernel,
        out_shape=jax.ShapeDtypeStruct((grid_p, grid_b, TB, D_eff), jnp.float32),
        grid=(grid_p, grid_b, grid_t),
        in_specs=[
            pl.BlockSpec((TB, TT, D_eff), in_map),
            pl.BlockSpec((TB, TT, D_eff), in_map),
        ],
        out_specs=pl.BlockSpec((1, 1, TB, D_eff), lambda p, b, t: (p, b, 0, 0)),
        compiler_params=pltpu.CompilerParams(
            dimension_semantics=("parallel", "parallel", "arbitrary"),
            vmem_limit_bytes=vmem_limit,
        ),
    )(x, y)

    # ---- finish on ~B*D floats (plain XLA) ------------------------------------
    acc = jnp.sum(partials.reshape(grid_p, B, D_eff), axis=0)      # (B, D_eff)
    if fold > 1:
        acc = jnp.sum(acc.reshape(B, fold, D), axis=1)             # (B, D)
    mean_diff = acc * (1.0 / T)           # divide by T *before* squaring (conditioning)
    return jnp.mean(mean_diff * mean_diff)


def _reference(x, y):
    xm = jnp.mean(x.astype(jnp.float32), axis=1)
    ym = jnp.mean(y.astype(jnp.float32), axis=1)
    return jnp.mean((xm - ym) ** 2)


def _check(loss, ref, name):
    loss = jax.block_until_ready(loss)
    assert jnp.allclose(loss, ref, rtol=1e-3, atol=1e-6), (name, float(loss), float(ref))


if __name__ == "__main__":
    key = jax.random.PRNGKey(0)
    keys = jax.random.split(key, 12)

    # 1) Nominal module shape (batch=2, seq=8, hidden=32): small-input fast path.
    x = jax.random.normal(keys[0], (2, 8, 32), dtype=jnp.float32)
    t = jax.random.normal(keys[1], (2, 8, 32), dtype=jnp.float32)
    _check(proj_time_squeeze(x, t), _reference(x, t), "fast_path")

    # 2) f32, D already lane-dense: exercises grid_b >= 2 and the resident accumulator.
    x = jax.random.normal(keys[2], (4, 2048, 128), dtype=jnp.float32)
    t = jax.random.normal(keys[3], (4, 2048, 128), dtype=jnp.float32)
    _check(proj_time_squeeze(x, t), _reference(x, t), "f32_dense")

    # 3) f32, D=96: exercises generalized (lcm-based) lane folding.
    x = jax.random.normal(keys[4], (2, 1024, 96), dtype=jnp.float32)
    t = jax.random.normal(keys[5], (2, 1024, 96), dtype=jnp.float32)
    _check(proj_time_squeeze(x, t), _reference(x, t), "fold_96")

    # 4) bf16 inputs streamed as bf16 (dtype-aware sublane tile, in-kernel upcast).
    x = jax.random.normal(keys[6], (4, 4096, 64), dtype=jnp.bfloat16)
    t = jax.random.normal(keys[7], (4, 4096, 64), dtype=jnp.bfloat16)
    _check(proj_time_squeeze(x, t), _reference(x, t), "bf16_fold")

    # 5) Awkward T (1003 = 17*59) with forced-small tiles: zero-padding path + T grid.
    x = jax.random.normal(keys[8], (2, 1003, 128), dtype=jnp.float32)
    t = jax.random.normal(keys[9], (2, 1003, 128), dtype=jnp.float32)
    _check(proj_time_squeeze(x, t, tile_mib=0.0625), _reference(x, t), "pad_T")

    # 6) B=1 with multiple time tiles: parallel split of the time axis (grid_p=2).
    x = jax.random.normal(keys[10], (1, 4096, 128), dtype=jnp.float32)
    t = jax.random.normal(keys[11], (1, 4096, 128), dtype=jnp.float32)
    _check(proj_time_squeeze(x, t, tile_mib=0.25), _reference(x, t), "b1_tsplit")

    print("KERNEL_OK")
</pallas_src>

<mosaic_0001>
module attributes {stable_mosaic.version = 11 : i64} {
  func.func @_time_sum_diff_kernel(%arg0: i32, %arg1: i32, %arg2: i32, %arg3: memref<2x2048x128xf32, #tpu.memory_space<vmem>>, %arg4: memref<2x2048x128xf32, #tpu.memory_space<vmem>>, %arg5: memref<1x1x2x128xf32, #tpu.memory_space<vmem>>) attributes {dimension_semantics = [#tpu.dimension_semantics<parallel>, #tpu.dimension_semantics<parallel>, #tpu.dimension_semantics<arbitrary>], iteration_bounds = array<i64: 1, 2, 1>, scalar_prefetch = 0 : i64, scratch_operands = 0 : i64, tpu.core_type = #tpu.core_type<tc>, window_params = [{transform_indices = @transform_0, window_bounds = array<i64: 2, 2048, 128>}, {transform_indices = @transform_1, window_bounds = array<i64: 2, 2048, 128>}, {transform_indices = @transform_2, window_bounds = array<i64: 1, 1, 2, 128>}]} {
    %c0_i32 = arith.constant 0 : i32
    %0 = arith.cmpi eq, %arg2, %c0_i32 : i32
    %1 = arith.extui %0 : i1 to i32
    %c0_i32_0 = arith.constant 0 : i32
    %2 = arith.cmpi ne, %1, %c0_i32_0 : i32
    scf.if %2 {
      %cst_15 = arith.constant 0.000000e+00 : f32
      %12 = vector.broadcast %cst_15 : f32 to vector<1x1x2x128xf32>
      %c0_16 = arith.constant 0 : index
      %c0_17 = arith.constant 0 : index
      %c0_18 = arith.constant 0 : index
      %c0_19 = arith.constant 0 : index
      %13 = vector.load %arg5[%c0_16, %c0_17, %c0_18, %c0_19] : memref<1x1x2x128xf32, #tpu.memory_space<vmem>>, vector<1x1x2x128xf32>
      tpu.vector_store %arg5[%c0_16, %c0_17, %c0_18, %c0_19], %12 {strides = array<i32>} : memref<1x1x2x128xf32, #tpu.memory_space<vmem>>, vector<1x1x2x128xf32>,
    } else {
    }
    %c0 = arith.constant 0 : index
    %c0_1 = arith.constant 0 : index
    %c0_2 = arith.constant 0 : index
    %3 = vector.load %arg3[%c0, %c0_1, %c0_2] : memref<2x2048x128xf32, #tpu.memory_space<vmem>>, vector<2x2048x128xf32>
    %cst = arith.constant dense<0.000000e+00> : vector<2x128xf32>
    %4 = vector.multi_reduction <add>, %3, %cst [1] : vector<2x2048x128xf32> to vector<2x128xf32>
    %c0_3 = arith.constant 0 : index
    %c0_4 = arith.constant 0 : index
    %c0_5 = arith.constant 0 : index
    %5 = vector.load %arg4[%c0_3, %c0_4, %c0_5] : memref<2x2048x128xf32, #tpu.memory_space<vmem>>, vector<2x2048x128xf32>
    %cst_6 = arith.constant dense<0.000000e+00> : vector<2x128xf32>
    %6 = vector.multi_reduction <add>, %5, %cst_6 [1] : vector<2x2048x128xf32> to vector<2x128xf32>
    %c0_7 = arith.constant 0 : index
    %c0_8 = arith.constant 0 : index
    %c0_9 = arith.constant 0 : index
    %c0_10 = arith.constant 0 : index
    %7 = vector.load %arg5[%c0_7, %c0_8, %c0_9, %c0_10] : memref<1x1x2x128xf32, #tpu.memory_space<vmem>>, vector<1x1x2x128xf32>
    %8 = arith.subf %4, %6 : vector<2x128xf32>
    %9 = vector.shape_cast %8 : vector<2x128xf32> to vector<1x1x2x128xf32>
    %10 = arith.addf %7, %9 : vector<1x1x2x128xf32>
    %c0_11 = arith.constant 0 : index
    %c0_12 = arith.constant 0 : index
    %c0_13 = arith.constant 0 : index
    %c0_14 = arith.constant 0 : index
    %11 = vector.load %arg5[%c0_11, %c0_12, %c0_13, %c0_14] : memref<1x1x2x128xf32, #tpu.memory_space<vmem>>, vector<1x1x2x128xf32>
    tpu.vector_store %arg5[%c0_11, %c0_12, %c0_13, %c0_14], %10 {strides = array<i32>} : memref<1x1x2x128xf32, #tpu.memory_space<vmem>>, vector<1x1x2x128xf32>,
    return
  }
  func.func @transform_0(%arg0: i32, %arg1: i32, %arg2: i32) -> (i32, i32, i32) {
    %c1_i32 = arith.constant 1 : i32
    %0 = arith.muli %arg0, %c1_i32 : i32
    %1 = arith.addi %0, %arg2 : i32
    %c0_i32 = arith.constant 0 : i32
    %c0_i32_0 = arith.constant 0 : i32
    return %arg1, %1, %c0_i32 : i32, i32, i32
  }
  func.func @transform_1(%arg0: i32, %arg1: i32, %arg2: i32) -> (i32, i32, i32) {
    %c1_i32 = arith.constant 1 : i32
    %0 = arith.muli %arg0, %c1_i32 : i32
    %1 = arith.addi %0, %arg2 : i32
    %c0_i32 = arith.constant 0 : i32
    %c0_i32_0 = arith.constant 0 : i32
    return %arg1, %1, %c0_i32 : i32, i32, i32
  }
  func.func @transform_2(%arg0: i32, %arg1: i32, %arg2: i32) -> (i32, i32, i32, i32) {
    %c0_i32 = arith.constant 0 : i32
    %c0_i32_0 = arith.constant 0 : i32
    %c0_i32_1 = arith.constant 0 : i32
    return %arg0, %arg1, %c0_i32, %c0_i32_0 : i32, i32, i32, i32
  }
}

</mosaic_0001>

<bundles_post_ra>
// kernel: tpu_custom_call.1
= control target key start
LH: loop header
LB: loop body
LE: loop exit
PB: predicated region body
PF: predicated region fallthrough
CT: control target
= control target key end

     0   :  { %7 = vsyncpa [#allocation3], 0  ;;  %s3990_s0 = inlined_call_operand.hbm [shape: f32[4,2048,128], index: 0, kind: input, shape index: {}]   ;;  %s3991_s1 = inlined_call_operand.hbm [shape: f32[4,2048,128], index: 1, kind: input, shape index: {}]   ;;  %s3992_s2 = inlined_call_operand.hbm [shape: f32[1,2,2,128], index: 2, kind: output, shape index: {}]  }
   0x1   :  { %9 = vsyncpa [#allocation3 + $0x1], 0 }
   0x2   :  { %10 = vsyncpa [#allocation6], 0 }
   0x3   :  { %12 = vsyncpa [#allocation6 + $0x1], 0 }
   0x4   :  { %13 = vsyncpa [#allocation4], 0 }
   0x5   :  { %15 = vsyncpa [#allocation4 + $0x1], 0  ;;  %s2721_s9 = smov 0   ;;  %s2723_s10 = smov 0  }
   0x6   :  { %s2725_s11 = smov 0   ;;  %s2727_s12 = smov 0  }
   0x7   :  { %s2729_s13 = smov 0   ;;  %s2731_s14 = smov 0  }
   0x8 LB: > { %s2458_s15 = sadd.s32 4294967295, %s2698_s14   ;;  %s2459_s16 = sadd.s32 4294967294, %s2698_s14   ;;  %s2698_s14 = sphi %s2731_s14, %s21_s14   ;;  %s2694_s13 = sphi %s2729_s13, %s4010_s13   ;;  %s2690_s12 = sphi %s2727_s12, %s4009_s12   ;;  %s2686_s11 = sphi %s2725_s11, %s4008_s11   ;;  %s2682_s10 = sphi %s2723_s10, %s4007_s10   ;;  %s2678_s9 = sphi %s2721_s9, %s4006_s9  }
   0x9   : > { %s36_s17 = sadd.s32 1, %s2694_s13  ;;  %s51_s18 = sadd.s32 1, %s2686_s11 }
   0xa   : > { %p38_p0 = scmp.ge.s32.totalorder %s36_s17, 2  ;;  %p58_p1 = scmp.ne.s32.totalorder %s2686_s11, %s2682_s10 }
   0xb   : > { %p59_p2 = scmp.eq.s32.totalorder %s2698_s14, 0  ;;  %p64_p3 = scmp.ne.s32.totalorder %s2682_s10, %s2678_s9 }
   0xc   : > { %s4012_s17 = smov (%p38_p0, %s36_s17), 0  ;;  %p65_p5 = scmp.eq.s32.totalorder %s2458_s15, 0 }
   0xd   : > { %p2762_p4 = por %p59_p2, %p58_p1  ;;  %s46_s20 = ssub.s32 %s2694_s13, %s4012_s17 }
   0xe   : > { %p120_p6 = scmp.eq.s32.totalorder %s2458_s15, 1  ;;  %p49_p7 = scmp.eq.s32.totalorder %s46_s20, 0 }
   0xf   : > { %p2768_p8 = por %p65_p5, %p64_p3  ;;  %p126_p10 = scmp.eq.s32.totalorder %s2459_s16, 1 }
  0x10   : > { %p2772_p9 = por %p120_p6, %p58_p1  ;;  %p2499_p13 = scmp.lt.s32.totalorder %s2698_s14, 2 }
  0x11   : > { %s3996_s21 = scalar_select %p2768_p8, 1, 0 }
  0x12   : > { %s3997_s22 = scalar_select %p2772_p9, 1, 0 }
  0x13   : > { %s2777_s23 = scalar_select %p49_p7, %s2686_s11, %s51_s18  }
  0x14   : > { %p2779_p11 = por %p126_p10, %p64_p3  ;;  %s2786_s25 = sand.u32 1, %s2686_s11  }
  0x15   : > { %s2462_s26 = sshll.u32 %s2786_s25, 12  ;;  %s2479_s27 = sshll.u32 %s2694_s13, 16 }
  0x16   : > { %s3998_s24 = scalar_select %p2779_p11, 1, 0 }
  0x17   : > { %s2795_s30 = scalar_lea.hbm %s3990_s0, %s2479_s27  ;;  %s150_s3 = scalar_lea.vmem [#allocation2], %s2462_s26 }
  0x18   : > { %s161_s4 = sshll.u32 %s150_s3, 4  ;;  %p2803_p0 = pnand %p2499_p13, %p2762_p4  ;;  %s2799_s4 = int_to_ptr.vmem [resolvable:$true] %s161_s4 }
  0x19   : > { %s147_s6 = scalar_lea.sflag [#allocation3], %s2786_s25  ;;  %s2552_s7 = scalar_lea.hbm %s2795_s30, 65536 }
  0x1a   : > { %p2553_p2 = scmp.ne.s32.totalorder %s2795_s30, %s2552_s7  ;;  %p2554_p3 = pneg %p2803_p0 }
  0x1b   : > { %s2557_s16 = scalar_lea.hbm %s3990_s0, 131072  ;;  %p2558_p4 = scmp.lt.u32.totalorder %s2795_s30, %s3990_s0 }
  0x1c   : > { %p2555_p5 = pnand %p2554_p3, %p2553_p2  ;;  %p2559_p7 = scmp.lt.u32.totalorder %s2557_s16, %s2552_s7 }
  0x1d   : > { %p2561_p13 = scmp.lt.u32.totalorder %s2552_s7, %s2795_s30 }
  0x1e   : > { %p2556_p6 = pneg %p2555_p5  ;;  %p2560_p10 = por %p2559_p7, %p2558_p4 }
  0x20   : > { %p2562_p12 = por %p2561_p13, %p2560_p10 }
  0x22   : > { %p2563_p1 = pnand %p2562_p12, %p2556_p6 }
  0x24   : > { %2566 = shalt.err (!%p2563_p1)
}
  0x25   : > { %s2567_s20 = scalar_lea.vmem %s2799_s4, 65536  ;;  %s2700_s28 = smov [#allocation2]  }
  0x26   : > { %p2568_p2 = scmp.ne.s32.totalorder %s2799_s4, %s2567_s20  ;;  %s2572_s29 = sshll.u32 %s2700_s28, 4  ;;  %s2573_s29 = int_to_ptr.vmem [resolvable:$false] %s2572_s29 }
  0x27   : > { %s2574_s3 = scalar_lea.vmem %s2573_s29, 131072  ;;  %p2575_p9 = scmp.lt.s32.totalorder %s2799_s4, %s2573_s29 }
  0x28   : > { %p2570_p5 = pnand %p2568_p2, %p2554_p3  ;;  %p2576_p4 = scmp.lt.s32.totalorder %s2574_s3, %s2567_s20 }
  0x2a   : > { %p2571_p11 = pneg %p2570_p5  ;;  %p2577_p7 = por %p2576_p4, %p2575_p9 }
  0x2c   : > { %p2578_p10 = pnand %p2577_p7, %p2571_p11 }
  0x2e   : > { %2581 = shalt.err (!%p2578_p10)
}
  0x2f   : > { %s2701_s7 = smov 128   ;;  %s2702_s8 = smov 8  }
  0x30   : > { %2491 = dma.hbm_to_vmem [thread:$0]  (!%p2803_p0), %s2795_s30, 65536, %s2799_s4, %s147_s6, %s2701_s7, %s2701_s7, %s2702_s8  }
  0x31   : > { %p194_p9 = scmp.lt.s32.totalorder %s2698_s14, 3  ;;  %s2845_s18 = scalar_lea.hbm %s3991_s1, %s2479_s27 }
  0x32   : > { %p4000_p11 = scmp.ge.s32.totalorder %s2698_s14, 1  ;;  %s175_s20 = scalar_lea.vmem [#allocation5], %s2462_s26 }
  0x33   : > { %s186_s28 = sshll.u32 %s175_s20, 4  ;;  %s172_s30 = scalar_lea.sflag [#allocation6], %s2786_s25  ;;  %s2855_s28 = int_to_ptr.vmem [resolvable:$true] %s186_s28 }
  0x34   : > { %p2849_p12 = pnand %p4000_p11, %p194_p9  ;;  %s2582_s4 = scalar_lea.hbm %s2845_s18, 65536 }
  0x35   : > { %p2583_p1 = scmp.ne.s32.totalorder %s2845_s18, %s2582_s4  ;;  %s2587_s29 = scalar_lea.hbm %s3991_s1, 131072 }
  0x36   : > { %p2588_p2 = scmp.lt.u32.totalorder %s2845_s18, %s3991_s1  ;;  %p2589_p5 = scmp.lt.u32.totalorder %s2587_s29, %s2582_s4 }
  0x37   : > { %p2585_p6 = pnand %p2583_p1, %p2554_p3  ;;  %p2591_p7 = scmp.lt.u32.totalorder %s2582_s4, %s2845_s18 }
  0x38   : > { %p2590_p4 = por %p2589_p5, %p2588_p2 }
  0x39   : > { %p2586_p13 = pneg %p2585_p6 }
  0x3a   : > { %p2592_p10 = por %p2591_p7, %p2590_p4 }
  0x3c   : > { %p2593_p9 = pnand %p2592_p10, %p2586_p13 }
  0x3e   : > { %2596 = shalt.err (!%p2593_p9)
}
  0x3f   : > { %s2597_s26 = scalar_lea.vmem %s2855_s28, 65536  ;;  %s2703_s16 = smov [#allocation5]  }
  0x40   : > { %p2598_p11 = scmp.ne.s32.totalorder %s2855_s28, %s2597_s26  ;;  %s2602_s20 = sshll.u32 %s2703_s16, 4  ;;  %s2603_s20 = int_to_ptr.vmem [resolvable:$false] %s2602_s20 }
  0x41   : > { %s2604_s27 = scalar_lea.vmem %s2603_s20, 131072  ;;  %p2605_p8 = scmp.lt.s32.totalorder %s2855_s28, %s2603_s20 }
  0x42   : > { %p2600_p1 = pnand %p2598_p11, %p2554_p3  ;;  %p2606_p2 = scmp.lt.s32.totalorder %s2604_s27, %s2597_s26 }
  0x44   : > { %p2601_p6 = pneg %p2600_p1  ;;  %p2607_p5 = por %p2606_p2, %p2605_p8 }
  0x46   : > { %p2608_p4 = pnand %p2607_p5, %p2601_p6 }
  0x48   : > { %2611 = shalt.err (!%p2608_p4)
}
  0x49   : > { %2494 = dma.hbm_to_vmem [thread:$0]  (!%p2803_p0), %s2845_s18, 65536, %s2855_s28, %s172_s30, %s2701_s7, %s2701_s7, %s2702_s8  }
  0x4a   : > { %198 = sbr.rel (%p2849_p12) target bundleno = 810 (0x32a), region = 28  ;;  %s2889_s4 = sand.u32 (!%p2849_p12), 1, %s2682_s10  }
  0x4b   : > { %s2471_s6 = sshll.u32 (!%p2849_p12), %s2889_s4, 12  ;;  %s201_s29 = scalar_lea.sflag (!%p2849_p12), [#allocation3], %s2889_s4 }
  0x4c   : > { %s2893_s5 = scalar_lea.vmem (!%p2849_p12), [#allocation2], %s2471_s6  ;;  %p4002_p8 = scmp.ne.s32.totalorder (!%p2849_p12), %s3996_s21, 0 }
  0x51   : > { %2665 = dma.done.wait (%p4002_p8), %s201_s29, 65536  }
  0x52   : > { %2667 = vsyncadd (%p4002_p8), %s201_s29, 4294901760  ;;  %s210_s25 = scalar_lea.sflag [#allocation6], %s2889_s4  ;;  %s2900_s7 = scalar_lea.vmem [#allocation5], %s2471_s6 }
  0x53   : > { %2669 = dma.done.wait (%p4002_p8), %s210_s25, 65536  }
  0x54   : > { %2671 = vsyncadd (%p4002_p8), %s210_s25, 4294901760  ;;  %s2473_s8 = sshll.u32 %s2889_s4, 1  ;;  %v2704_v0 = vmov 0.0   ;;  %v250_v1 = vld [vmem:[%s2893_s5] sm:$0xff]  ;;  %v251_v2 = vld [vmem:[%s2893_s5 + $0x8] sm:$0xff]  ;;  %vm2323_vm0 = vcmask 1041409  }
  0x55   : > { %s2907_s18 = scalar_lea.vmem [#allocation7], %s2473_s8  ;;  %v252_v3 = vld [vmem:[%s2893_s5 + $0x10] sm:$0xff]  ;;  %v762_v4 = vadd.f32 %v251_v2, %v250_v1  ;;  %v253_v5 = vld [vmem:[%s2893_s5 + $0x18] sm:$0xff]  ;;  %v254_v7 = vld [vmem:[%s2893_s5 + $0x20] sm:$0xff]  ;;  %s2475_s21 = sshll.u32 %s2690_s12, 5 }
  0x56   : > { %249 = vst [vmem:[%s2907_s18] sm:$0x3] %v2704_v0  ;;  %v255_v9 = vld [vmem:[%s2893_s5 + $0x28] sm:$0xff]  ;;  %v256_v11 = vld [vmem:[%s2893_s5 + $0x30] sm:$0xff]  ;;  %v257_v13 = vld [vmem:[%s2893_s5 + $0x38] sm:$0xff]  ;;  %s2344_s19 = sshll.u32 %s2907_s18, 4  ;;  %s3940_s3 = scalar_lea.hbm %s3992_s2, %s2475_s21  ;;  %s3942_s19 = int_to_ptr.vmem [resolvable:$true] %s2344_s19 }
  0x57   : > { %v763_v6 = vadd.f32 %v762_v4, %v252_v3  ;;  %v258_v15 = vld [vmem:[%s2893_s5 + $0x40] sm:$0xff]  ;;  %v259_v17 = vld [vmem:[%s2893_s5 + $0x48] sm:$0xff]  ;;  %v260_v19 = vld [vmem:[%s2893_s5 + $0x50] sm:$0xff]  ;;  %s2329_s15 = scalar_lea.sflag [#allocation4], %s2889_s4  ;;  %s2612_s26 = scalar_lea.vmem %s3942_s19, 32 }
  0x58   : > { %v261_v21 = vld [vmem:[%s2893_s5 + $0x58] sm:$0xff]  ;;  %v262_v23 = vld [vmem:[%s2893_s5 + $0x60] sm:$0xff]  ;;  %v263_v25 = vld [vmem:[%s2893_s5 + $0x68] sm:$0xff]  ;;  %p2613_p0 = scmp.ne.s32.totalorder %s3942_s19, %s2612_s26  ;;  %p4003_p3 = scmp.ne.s32.totalorder %s3997_s22, 0 }
  0x59   : > { %v764_v8 = vadd.f32 %v763_v6, %v253_v5  ;;  %v264_v27 = vld [vmem:[%s2893_s5 + $0x70] sm:$0xff]  ;;  %v265_v29 = vld [vmem:[%s2893_s5 + $0x78] sm:$0xff]  ;;  %v266_v31 = vld [vmem:[%s2893_s5 + $0x80] sm:$0xff]  ;;  %s2705_s12 = smov [#allocation7]  }
  0x5a   : > { %v267_v33 = vld [vmem:[%s2893_s5 + $0x88] sm:$0xff]  ;;  %v268_v35 = vld [vmem:[%s2893_s5 + $0x90] sm:$0xff]  ;;  %v269_v37 = vld [vmem:[%s2893_s5 + $0x98] sm:$0xff]  ;;  %p2614_p12 = pnand %p2613_p0, %p4003_p3  ;;  %s2616_s16 = sshll.u32 %s2705_s12, 4  ;;  %s2617_s16 = int_to_ptr.vmem [resolvable:$false] %s2616_s16 }
  0x5b   : > { %v765_v10 = vadd.f32 %v764_v8, %v254_v7  ;;  %v270_v39 = vld [vmem:[%s2893_s5 + $0xa0] sm:$0xff]  ;;  %v271_v41 = vld [vmem:[%s2893_s5 + $0xa8] sm:$0xff]  ;;  %v272_v43 = vld [vmem:[%s2893_s5 + $0xb0] sm:$0xff]  ;;  %s2618_s20 = scalar_lea.vmem %s2617_s16, 64  ;;  %p2619_p7 = scmp.lt.s32.totalorder %s3942_s19, %s2617_s16 }
  0x5c   : > { %v273_v45 = vld [vmem:[%s2893_s5 + $0xb8] sm:$0xff]  ;;  %v274_v47 = vld [vmem:[%s2893_s5 + $0xc0] sm:$0xff]  ;;  %v275_v49 = vld [vmem:[%s2893_s5 + $0xc8] sm:$0xff]  ;;  %p2615_p13 = pneg %p2614_p12  ;;  %p2620_p10 = scmp.lt.s32.totalorder %s2618_s20, %s2612_s26 }
  0x5d   : > { %v766_v12 = vadd.f32 %v765_v10, %v255_v9  ;;  %v276_v51 = vld [vmem:[%s2893_s5 + $0xd0] sm:$0xff]  ;;  %v277_v53 = vld [vmem:[%s2893_s5 + $0xd8] sm:$0xff]  ;;  %v278_v55 = vld [vmem:[%s2893_s5 + $0xe0] sm:$0xff] }
  0x5e   : > { %v279_v57 = vld [vmem:[%s2893_s5 + $0xe8] sm:$0xff]  ;;  %v280_v59 = vld [vmem:[%s2893_s5 + $0xf0] sm:$0xff]  ;;  %v281_v61 = vld [vmem:[%s2893_s5 + $0xf8] sm:$0xff]  ;;  %p2621_p9 = por %p2620_p10, %p2619_p7 }
  0x5f   : > { %v767_v14 = vadd.f32 %v766_v12, %v256_v11  ;;  %v282_v63 = vld [vmem:[%s2893_s5 + $0x100] sm:$0xff]  ;;  %v283_v1 = vld [vmem:[%s2893_s5 + $0x108] sm:$0xff]  ;;  %v284_v3 = vld [vmem:[%s2893_s5 + $0x110] sm:$0xff] }
  0x60   : > { %v285_v5 = vld [vmem:[%s2893_s5 + $0x118] sm:$0xff]  ;;  %v286_v7 = vld [vmem:[%s2893_s5 + $0x120] sm:$0xff]  ;;  %v287_v9 = vld [vmem:[%s2893_s5 + $0x128] sm:$0xff]  ;;  %p2622_p11 = pnand %p2621_p9, %p2615_p13 }
  0x61   : > { %v768_v16 = vadd.f32 %v767_v14, %v257_v13  ;;  %v288_v11 = vld [vmem:[%s2893_s5 + $0x130] sm:$0xff]  ;;  %v289_v13 = vld [vmem:[%s2893_s5 + $0x138] sm:$0xff] }
  0x63   : > { %v769_v18 = vadd.f32 %v768_v16, %v258_v15  ;;  %v290_v15 = vld [vmem:[%s2893_s5 + $0x140] sm:$0xff] }
  0x65   : > { %v770_v20 = vadd.f32 %v769_v18, %v259_v17  ;;  %v291_v17 = vld [vmem:[%s2893_s5 + $0x148] sm:$0xff] }
  0x67   : > { %v771_v22 = vadd.f32 %v770_v20, %v260_v19  ;;  %v292_v19 = vld [vmem:[%s2893_s5 + $0x150] sm:$0xff] }
  0x69   : > { %v772_v24 = vadd.f32 %v771_v22, %v261_v21  ;;  %v293_v21 = vld [vmem:[%s2893_s5 + $0x158] sm:$0xff] }
  0x6b   : > { %v773_v26 = vadd.f32 %v772_v24, %v262_v23  ;;  %v294_v23 = vld [vmem:[%s2893_s5 + $0x160] sm:$0xff] }
  0x6c   : > { %v506_v24 = vld [vmem:[%s2893_s5 + $0x800] sm:$0xff] }
  0x6d   : > { %v774_v28 = vadd.f32 %v773_v26, %v263_v25  ;;  %v507_v25 = vld [vmem:[%s2893_s5 + $0x808] sm:$0xff] }
  0x6f   : > { %v775_v30 = vadd.f32 %v774_v28, %v264_v27  ;;  %v295_v27 = vld [vmem:[%s2893_s5 + $0x168] sm:$0xff]  ;;  %v508_v28 = vld [vmem:[%s2893_s5 + $0x810] sm:$0xff] }
  0x71   : > { %v776_v32 = vadd.f32 %v775_v30, %v265_v29  ;;  %v1023_v29 = vadd.f32 %v507_v25, %v506_v24  ;;  %v509_v30 = vld [vmem:[%s2893_s5 + $0x818] sm:$0xff]  ;;  %v310_v24 = vld [vmem:[%s2893_s5 + $0x1e0] sm:$0xff] }
  0x73   : > { %v777_v34 = vadd.f32 %v776_v32, %v266_v31  ;;  %v296_v32 = vld [vmem:[%s2893_s5 + $0x170] sm:$0xff] }
  0x75   : > { %v778_v36 = vadd.f32 %v777_v34, %v267_v33  ;;  %v1024_v33 = vadd.f32 %v1023_v29, %v508_v28  ;;  %v510_v34 = vld [vmem:[%s2893_s5 + $0x820] sm:$0xff]  ;;  %v311_v28 = vld [vmem:[%s2893_s5 + $0x1e8] sm:$0xff] }
  0x77   : > { %v779_v38 = vadd.f32 %v778_v36, %v268_v35  ;;  %v297_v36 = vld [vmem:[%s2893_s5 + $0x178] sm:$0xff] }
  0x79   : > { %v780_v40 = vadd.f32 %v779_v38, %v269_v37  ;;  %v1025_v37 = vadd.f32 %v1024_v33, %v509_v30  ;;  %v511_v38 = vld [vmem:[%s2893_s5 + $0x828] sm:$0xff]  ;;  %v525_v30 = vld [vmem:[%s2893_s5 + $0x898] sm:$0xff] }
  0x7b   : > { %v781_v42 = vadd.f32 %v780_v40, %v270_v39  ;;  %v298_v40 = vld [vmem:[%s2893_s5 + $0x180] sm:$0xff] }
  0x7d   : > { %v782_v44 = vadd.f32 %v781_v42, %v271_v41  ;;  %v1026_v41 = vadd.f32 %v1025_v37, %v510_v34  ;;  %v512_v42 = vld [vmem:[%s2893_s5 + $0x830] sm:$0xff]  ;;  %v526_v34 = vld [vmem:[%s2893_s5 + $0x8a0] sm:$0xff] }
  0x7f   : > { %v783_v46 = vadd.f32 %v782_v44, %v272_v43  ;;  %v299_v44 = vld [vmem:[%s2893_s5 + $0x188] sm:$0xff] }
  0x81   : > { %v784_v48 = vadd.f32 %v783_v46, %v273_v45  ;;  %v1027_v45 = vadd.f32 %v1026_v41, %v511_v38  ;;  %v513_v46 = vld [vmem:[%s2893_s5 + $0x838] sm:$0xff]  ;;  %v527_v38 = vld [vmem:[%s2893_s5 + $0x8a8] sm:$0xff] }
  0x83   : > { %v785_v50 = vadd.f32 %v784_v48, %v274_v47  ;;  %v300_v48 = vld [vmem:[%s2893_s5 + $0x190] sm:$0xff] }
  0x85   : > { %v786_v52 = vadd.f32 %v785_v50, %v275_v49  ;;  %v1028_v49 = vadd.f32 %v1027_v45, %v512_v42  ;;  %v514_v50 = vld [vmem:[%s2893_s5 + $0x840] sm:$0xff]  ;;  %v528_v42 = vld [vmem:[%s2893_s5 + $0x8b0] sm:$0xff] }
  0x87   : > { %v787_v54 = vadd.f32 %v786_v52, %v276_v51  ;;  %v301_v52 = vld [vmem:[%s2893_s5 + $0x198] sm:$0xff] }
  0x89   : > { %v788_v56 = vadd.f32 %v787_v54, %v277_v53  ;;  %v1029_v53 = vadd.f32 %v1028_v49, %v513_v46  ;;  %v515_v54 = vld [vmem:[%s2893_s5 + $0x848] sm:$0xff]  ;;  %v529_v46 = vld [vmem:[%s2893_s5 + $0x8b8] sm:$0xff] }
  0x8b   : > { %v789_v58 = vadd.f32 %v788_v56, %v278_v55  ;;  %v302_v56 = vld [vmem:[%s2893_s5 + $0x1a0] sm:$0xff] }
  0x8d   : > { %v790_v60 = vadd.f32 %v789_v58, %v279_v57  ;;  %v1030_v57 = vadd.f32 %v1029_v53, %v514_v50  ;;  %v516_v58 = vld [vmem:[%s2893_s5 + $0x850] sm:$0xff]  ;;  %v530_v50 = vld [vmem:[%s2893_s5 + $0x8c0] sm:$0xff] }
  0x8f   : > { %v791_v62 = vadd.f32 %v790_v60, %v280_v59  ;;  %v303_v60 = vld [vmem:[%s2893_s5 + $0x1a8] sm:$0xff] }
  0x91   : > { %v792_v0 = vadd.f32 %v791_v62, %v281_v61  ;;  %v1031_v61 = vadd.f32 %v1030_v57, %v515_v54  ;;  %v517_v62 = vld [vmem:[%s2893_s5 + $0x858] sm:$0xff]  ;;  %v531_v54 = vld [vmem:[%s2893_s5 + $0x8c8] sm:$0xff] }
  0x93   : > { %v793_v2 = vadd.f32 %v792_v0, %v282_v63  ;;  %v304_v0 = vld [vmem:[%s2893_s5 + $0x1b0] sm:$0xff] }
  0x95   : > { %v794_v4 = vadd.f32 %v793_v2, %v283_v1  ;;  %v1032_v1 = vadd.f32 %v1031_v61, %v516_v58  ;;  %v518_v2 = vld [vmem:[%s2893_s5 + $0x860] sm:$0xff]  ;;  %v532_v58 = vld [vmem:[%s2893_s5 + $0x8d0] sm:$0xff] }
  0x97   : > { %v795_v6 = vadd.f32 %v794_v4, %v284_v3  ;;  %v305_v4 = vld [vmem:[%s2893_s5 + $0x1b8] sm:$0xff] }
  0x99   : > { %v796_v8 = vadd.f32 %v795_v6, %v285_v5  ;;  %v1033_v5 = vadd.f32 %v1032_v1, %v517_v62  ;;  %v519_v6 = vld [vmem:[%s2893_s5 + $0x868] sm:$0xff]  ;;  %v533_v62 = vld [vmem:[%s2893_s5 + $0x8d8] sm:$0xff] }
  0x9b   : > { %v797_v10 = vadd.f32 %v796_v8, %v286_v7  ;;  %v306_v8 = vld [vmem:[%s2893_s5 + $0x1c0] sm:$0xff] }
  0x9d   : > { %v798_v12 = vadd.f32 %v797_v10, %v287_v9  ;;  %v1034_v9 = vadd.f32 %v1033_v5, %v518_v2  ;;  %v520_v10 = vld [vmem:[%s2893_s5 + $0x870] sm:$0xff]  ;;  %v534_v2 = vld [vmem:[%s2893_s5 + $0x8e0] sm:$0xff] }
  0x9f   : > { %v799_v14 = vadd.f32 %v798_v12, %v288_v11  ;;  %v307_v12 = vld [vmem:[%s2893_s5 + $0x1c8] sm:$0xff] }
  0xa1   : > { %v800_v16 = vadd.f32 %v799_v14, %v289_v13  ;;  %v1035_v13 = vadd.f32 %v1034_v9, %v519_v6  ;;  %v521_v14 = vld [vmem:[%s2893_s5 + $0x878] sm:$0xff]  ;;  %v535_v6 = vld [vmem:[%s2893_s5 + $0x8e8] sm:$0xff] }
  0xa3   : > { %v801_v18 = vadd.f32 %v800_v16, %v290_v15  ;;  %v308_v16 = vld [vmem:[%s2893_s5 + $0x1d0] sm:$0xff] }
  0xa5   : > { %v802_v20 = vadd.f32 %v801_v18, %v291_v17  ;;  %v1036_v17 = vadd.f32 %v1035_v13, %v520_v10  ;;  %v522_v18 = vld [vmem:[%s2893_s5 + $0x880] sm:$0xff]  ;;  %v536_v10 = vld [vmem:[%s2893_s5 + $0x8f0] sm:$0xff] }
  0xa7   : > { %v803_v22 = vadd.f32 %v802_v20, %v292_v19  ;;  %v309_v20 = vld [vmem:[%s2893_s5 + $0x1d8] sm:$0xff] }
  0xa9   : > { %v804_v26 = vadd.f32 %v803_v22, %v293_v21  ;;  %v1037_v21 = vadd.f32 %v1036_v17, %v521_v14  ;;  %v523_v22 = vld [vmem:[%s2893_s5 + $0x888] sm:$0xff]  ;;  %v537_v14 = vld [vmem:[%s2893_s5 + $0x8f8] sm:$0xff] }
  0xab   : > { %v805_v31 = vadd.f32 %v804_v26, %v294_v23  ;;  %v1038_v25 = vadd.f32 %v1037_v21, %v522_v18  ;;  %v524_v26 = vld [vmem:[%s2893_s5 + $0x890] sm:$0xff]  ;;  %v538_v18 = vld [vmem:[%s2893_s5 + $0x900] sm:$0xff] }
  0xad   : > { %v806_v35 = vadd.f32 %v805_v31, %v295_v27  ;;  %v1039_v29 = vadd.f32 %v1038_v25, %v523_v22  ;;  %v539_v22 = vld [vmem:[%s2893_s5 + $0x908] sm:$0xff] }
  0xaf   : > { %v807_v39 = vadd.f32 %v806_v35, %v296_v32  ;;  %v312_v32 = vld [vmem:[%s2893_s5 + $0x1f0] sm:$0xff]  ;;  %v1040_v33 = vadd.f32 %v1039_v29, %v524_v26 }
  0xb0   : > { %v540_v26 = vld [vmem:[%s2893_s5 + $0x910] sm:$0xff] }
  0xb1   : > { %v808_v43 = vadd.f32 %v807_v39, %v297_v36  ;;  %v313_v36 = vld [vmem:[%s2893_s5 + $0x1f8] sm:$0xff]  ;;  %v1041_v37 = vadd.f32 %v1040_v33, %v525_v30 }
  0xb2   : > { %v541_v30 = vld [vmem:[%s2893_s5 + $0x918] sm:$0xff] }
  0xb3   : > { %v809_v47 = vadd.f32 %v808_v43, %v298_v40  ;;  %v314_v40 = vld [vmem:[%s2893_s5 + $0x200] sm:$0xff]  ;;  %v1042_v41 = vadd.f32 %v1041_v37, %v526_v34 }
  0xb4   : > { %v542_v34 = vld [vmem:[%s2893_s5 + $0x920] sm:$0xff] }
  0xb5   : > { %v810_v51 = vadd.f32 %v809_v47, %v299_v44  ;;  %v315_v44 = vld [vmem:[%s2893_s5 + $0x208] sm:$0xff]  ;;  %v1043_v45 = vadd.f32 %v1042_v41, %v527_v38 }
  0xb6   : > { %v543_v38 = vld [vmem:[%s2893_s5 + $0x928] sm:$0xff] }
  0xb7   : > { %v811_v55 = vadd.f32 %v810_v51, %v300_v48  ;;  %v316_v48 = vld [vmem:[%s2893_s5 + $0x210] sm:$0xff]  ;;  %v1044_v49 = vadd.f32 %v1043_v45, %v528_v42 }
  0xb8   : > { %v544_v42 = vld [vmem:[%s2893_s5 + $0x930] sm:$0xff] }
  0xb9   : > { %v812_v59 = vadd.f32 %v811_v55, %v301_v52  ;;  %v317_v52 = vld [vmem:[%s2893_s5 + $0x218] sm:$0xff]  ;;  %v1045_v53 = vadd.f32 %v1044_v49, %v529_v46 }
  0xba   : > { %v545_v46 = vld [vmem:[%s2893_s5 + $0x938] sm:$0xff] }
  0xbb   : > { %v813_v63 = vadd.f32 %v812_v59, %v302_v56  ;;  %v318_v56 = vld [vmem:[%s2893_s5 + $0x220] sm:$0xff]  ;;  %v1046_v57 = vadd.f32 %v1045_v53, %v530_v50 }
  0xbc   : > { %v546_v50 = vld [vmem:[%s2893_s5 + $0x940] sm:$0xff] }
  0xbd   : > { %v814_v3 = vadd.f32 %v813_v63, %v303_v60  ;;  %v319_v60 = vld [vmem:[%s2893_s5 + $0x228] sm:$0xff]  ;;  %v1047_v61 = vadd.f32 %v1046_v57, %v531_v54 }
  0xbe   : > { %v547_v54 = vld [vmem:[%s2893_s5 + $0x948] sm:$0xff] }
  0xbf   : > { %v815_v7 = vadd.f32 %v814_v3, %v304_v0  ;;  %v320_v0 = vld [vmem:[%s2893_s5 + $0x230] sm:$0xff]  ;;  %v1048_v1 = vadd.f32 %v1047_v61, %v532_v58 }
  0xc0   : > { %v548_v58 = vld [vmem:[%s2893_s5 + $0x950] sm:$0xff] }
  0xc1   : > { %v816_v11 = vadd.f32 %v815_v7, %v305_v4  ;;  %v321_v4 = vld [vmem:[%s2893_s5 + $0x238] sm:$0xff]  ;;  %v1049_v5 = vadd.f32 %v1048_v1, %v533_v62 }
  0xc2   : > { %v549_v62 = vld [vmem:[%s2893_s5 + $0x958] sm:$0xff] }
  0xc3   : > { %v817_v15 = vadd.f32 %v816_v11, %v306_v8  ;;  %v322_v8 = vld [vmem:[%s2893_s5 + $0x240] sm:$0xff]  ;;  %v1050_v9 = vadd.f32 %v1049_v5, %v534_v2 }
  0xc4   : > { %v550_v2 = vld [vmem:[%s2893_s5 + $0x960] sm:$0xff] }
  0xc5   : > { %v818_v19 = vadd.f32 %v817_v15, %v307_v12  ;;  %v323_v12 = vld [vmem:[%s2893_s5 + $0x248] sm:$0xff]  ;;  %v1051_v13 = vadd.f32 %v1050_v9, %v535_v6  ;;  %v1284_v6 = vld [vmem:[%s2900_s7] sm:$0xff] }
  0xc6   : > { %v1285_v9 = vld [vmem:[%s2900_s7 + $0x8] sm:$0xff] }
  0xc7   : > { %v819_v23 = vadd.f32 %v818_v19, %v308_v16  ;;  %v324_v16 = vld [vmem:[%s2893_s5 + $0x250] sm:$0xff]  ;;  %v1052_v17 = vadd.f32 %v1051_v13, %v536_v10  ;;  %v1796_v13 = vadd.f32 %v1285_v9, %v1284_v6  ;;  %v1296_v6 = vld [vmem:[%s2900_s7 + $0x60] sm:$0xff] }
  0xc8   : > { %v1286_v10 = vld [vmem:[%s2900_s7 + $0x10] sm:$0xff] }
  0xc9   : > { %v820_v27 = vadd.f32 %v819_v23, %v309_v20  ;;  %v325_v20 = vld [vmem:[%s2893_s5 + $0x258] sm:$0xff]  ;;  %v1053_v21 = vadd.f32 %v1052_v17, %v537_v14  ;;  %v552_v14 = vld [vmem:[%s2893_s5 + $0x970] sm:$0xff]  ;;  %v339_v17 = vld [vmem:[%s2893_s5 + $0x2c8] sm:$0xff] }
  0xcb   : > { %v821_v31 = vadd.f32 %v820_v27, %v310_v24  ;;  %v326_v24 = vld [vmem:[%s2893_s5 + $0x260] sm:$0xff]  ;;  %v1054_v25 = vadd.f32 %v1053_v21, %v538_v18 }
  0xcd   : > { %v822_v35 = vadd.f32 %v821_v31, %v311_v28  ;;  %v327_v28 = vld [vmem:[%s2893_s5 + $0x268] sm:$0xff]  ;;  %v1055_v29 = vadd.f32 %v1054_v25, %v539_v22  ;;  %v1288_v22 = vld [vmem:[%s2900_s7 + $0x20] sm:$0xff] }
  0xcf   : > { %v823_v39 = vadd.f32 %v822_v35, %v312_v32  ;;  %v328_v32 = vld [vmem:[%s2893_s5 + $0x270] sm:$0xff]  ;;  %v1056_v33 = vadd.f32 %v1055_v29, %v540_v26  ;;  %v554_v26 = vld [vmem:[%s2893_s5 + $0x980] sm:$0xff]  ;;  %v341_v29 = vld [vmem:[%s2893_s5 + $0x2d8] sm:$0xff] }
  0xd1   : > { %v824_v43 = vadd.f32 %v823_v39, %v313_v36  ;;  %v329_v36 = vld [vmem:[%s2893_s5 + $0x278] sm:$0xff]  ;;  %v1057_v37 = vadd.f32 %v1056_v33, %v541_v30 }
  0xd3   : > { %v825_v47 = vadd.f32 %v824_v43, %v314_v40  ;;  %v330_v40 = vld [vmem:[%s2893_s5 + $0x280] sm:$0xff]  ;;  %v1058_v41 = vadd.f32 %v1057_v37, %v542_v34  ;;  %v1290_v34 = vld [vmem:[%s2900_s7 + $0x30] sm:$0xff] }
  0xd5   : > { %v826_v51 = vadd.f32 %v825_v47, %v315_v44  ;;  %v331_v44 = vld [vmem:[%s2893_s5 + $0x288] sm:$0xff]  ;;  %v1059_v45 = vadd.f32 %v1058_v41, %v543_v38  ;;  %v556_v38 = vld [vmem:[%s2893_s5 + $0x990] sm:$0xff] }
  0xd6   : > { %v343_v41 = vld [vmem:[%s2893_s5 + $0x2e8] sm:$0xff] }
  0xd7   : > { %v827_v55 = vadd.f32 %v826_v51, %v316_v48  ;;  %v332_v48 = vld [vmem:[%s2893_s5 + $0x290] sm:$0xff]  ;;  %v1060_v49 = vadd.f32 %v1059_v45, %v544_v42 }
  0xd9   : > { %v828_v59 = vadd.f32 %v827_v55, %v317_v52  ;;  %v333_v52 = vld [vmem:[%s2893_s5 + $0x298] sm:$0xff]  ;;  %v1061_v53 = vadd.f32 %v1060_v49, %v545_v46  ;;  %v1292_v46 = vld [vmem:[%s2900_s7 + $0x40] sm:$0xff] }
  0xdb   : > { %v829_v63 = vadd.f32 %v828_v59, %v318_v56  ;;  %v334_v56 = vld [vmem:[%s2893_s5 + $0x2a0] sm:$0xff]  ;;  %v1062_v57 = vadd.f32 %v1061_v53, %v546_v50  ;;  %v345_v53 = vld [vmem:[%s2893_s5 + $0x2f8] sm:$0xff] }
  0xdc   : > { %v558_v50 = vld [vmem:[%s2893_s5 + $0x9a0] sm:$0xff] }
  0xdd   : > { %v830_v3 = vadd.f32 %v829_v63, %v319_v60  ;;  %v335_v60 = vld [vmem:[%s2893_s5 + $0x2a8] sm:$0xff]  ;;  %v1063_v61 = vadd.f32 %v1062_v57, %v547_v54 }
  0xdf   : > { %v831_v7 = vadd.f32 %v830_v3, %v320_v0  ;;  %v336_v0 = vld [vmem:[%s2893_s5 + $0x2b0] sm:$0xff]  ;;  %v1064_v1 = vadd.f32 %v1063_v61, %v548_v58 }
  0xe0   : > { %v1294_v58 = vld [vmem:[%s2900_s7 + $0x50] sm:$0xff] }
  0xe1   : > { %v832_v11 = vadd.f32 %v831_v7, %v321_v4  ;;  %v337_v4 = vld [vmem:[%s2893_s5 + $0x2b8] sm:$0xff]  ;;  %v1065_v5 = vadd.f32 %v1064_v1, %v549_v62  ;;  %v551_v7 = vld [vmem:[%s2893_s5 + $0x968] sm:$0xff]  ;;  %v560_v62 = vld [vmem:[%s2893_s5 + $0x9b0] sm:$0xff] }
  0xe2   : > { %v347_v1 = vld [vmem:[%s2893_s5 + $0x308] sm:$0xff] }
  0xe3   : > { %v833_v15 = vadd.f32 %v832_v11, %v322_v8  ;;  %v338_v11 = vld [vmem:[%s2893_s5 + $0x2c0] sm:$0xff] }
  0xe5   : > { %v834_v19 = vadd.f32 %v833_v15, %v323_v12  ;;  %v1066_v12 = vadd.f32 %v1065_v5, %v550_v2 }
  0xe7   : > { %v835_v23 = vadd.f32 %v834_v19, %v324_v16  ;;  %v1287_v16 = vld [vmem:[%s2900_s7 + $0x18] sm:$0xff]  ;;  %v1067_v18 = vadd.f32 %v1066_v12, %v551_v7  ;;  %v1797_v19 = vadd.f32 %v1796_v13, %v1286_v10  ;;  %v348_v7 = vld [vmem:[%s2893_s5 + $0x310] sm:$0xff]  ;;  %v562_v10 = vld [vmem:[%s2893_s5 + $0x9c0] sm:$0xff] }
  0xe8   : > { %v1297_v12 = vld [vmem:[%s2900_s7 + $0x68] sm:$0xff]  ;;  %v349_v13 = vld [vmem:[%s2893_s5 + $0x318] sm:$0xff] }
  0xe9   : > { %v836_v27 = vadd.f32 %v835_v23, %v325_v20  ;;  %v553_v20 = vld [vmem:[%s2893_s5 + $0x978] sm:$0xff]  ;;  %v340_v23 = vld [vmem:[%s2893_s5 + $0x2d0] sm:$0xff]  ;;  %v1798_v25 = vadd.f32 %v1797_v19, %v1287_v16  ;;  %v563_v16 = vld [vmem:[%s2893_s5 + $0x9c8] sm:$0xff] }
  0xea   : > { %v350_v19 = vld [vmem:[%s2893_s5 + $0x320] sm:$0xff] }
  0xeb   : > { %v837_v31 = vadd.f32 %v836_v27, %v326_v24  ;;  %v1068_v24 = vadd.f32 %v1067_v18, %v552_v14  ;;  %v1298_v18 = vld [vmem:[%s2900_s7 + $0x70] sm:$0xff] }
  0xed   : > { %v838_v35 = vadd.f32 %v837_v31, %v327_v28  ;;  %v1289_v28 = vld [vmem:[%s2900_s7 + $0x28] sm:$0xff]  ;;  %v1069_v30 = vadd.f32 %v1068_v24, %v553_v20  ;;  %v1799_v31 = vadd.f32 %v1798_v25, %v1288_v22  ;;  %v564_v20 = vld [vmem:[%s2893_s5 + $0x9d0] sm:$0xff]  ;;  %v1540_v22 = vld [vmem:[%s2900_s7 + $0x800] sm:$0xff] }
  0xee   : > { %v1299_v25 = vld [vmem:[%s2900_s7 + $0x78] sm:$0xff] }
  0xef   : > { %v839_v39 = vadd.f32 %v838_v35, %v328_v32  ;;  %v555_v32 = vld [vmem:[%s2893_s5 + $0x988] sm:$0xff]  ;;  %v342_v35 = vld [vmem:[%s2893_s5 + $0x2e0] sm:$0xff]  ;;  %v1800_v37 = vadd.f32 %v1799_v31, %v1289_v28 }
  0xf0   : > { %v351_v28 = vld [vmem:[%s2893_s5 + $0x328] sm:$0xff] }
  0xf1   : > { %v840_v43 = vadd.f32 %v839_v39, %v329_v36  ;;  %v1070_v36 = vadd.f32 %v1069_v30, %v554_v26  ;;  %v1541_v26 = vld [vmem:[%s2900_s7 + $0x808] sm:$0xff] }
  0xf2   : > { %v2057_v31 = vadd.f32 %v1541_v26, %v1540_v22  ;;  %v1307_v26 = vld [vmem:[%s2900_s7 + $0xb8] sm:$0xff] }
  0xf3   : > { %v841_v47 = vadd.f32 %v840_v43, %v330_v40  ;;  %v1291_v40 = vld [vmem:[%s2900_s7 + $0x38] sm:$0xff]  ;;  %v1071_v42 = vadd.f32 %v1070_v36, %v555_v32  ;;  %v1801_v43 = vadd.f32 %v1800_v37, %v1290_v34  ;;  %v1300_v34 = vld [vmem:[%s2900_s7 + $0x80] sm:$0xff]  ;;  %v352_v36 = vld [vmem:[%s2893_s5 + $0x330] sm:$0xff] }
  0xf4   : > { %v565_v32 = vld [vmem:[%s2893_s5 + $0x9d8] sm:$0xff] }
  0xf5   : > { %v842_v51 = vadd.f32 %v841_v47, %v331_v44  ;;  %v557_v44 = vld [vmem:[%s2893_s5 + $0x998] sm:$0xff]  ;;  %v344_v47 = vld [vmem:[%s2893_s5 + $0x2f0] sm:$0xff]  ;;  %v1802_v49 = vadd.f32 %v1801_v43, %v1291_v40  ;;  %v566_v40 = vld [vmem:[%s2893_s5 + $0x9e0] sm:$0xff] }
  0xf6   : > { %v1544_v43 = vld [vmem:[%s2900_s7 + $0x820] sm:$0xff] }
  0xf7   : > { %v843_v55 = vadd.f32 %v842_v51, %v332_v48  ;;  %v1072_v48 = vadd.f32 %v1071_v42, %v556_v38  ;;  %v1301_v42 = vld [vmem:[%s2900_s7 + $0x88] sm:$0xff] }
  0xf9   : > { %v844_v59 = vadd.f32 %v843_v55, %v333_v52  ;;  %v1293_v52 = vld [vmem:[%s2900_s7 + $0x48] sm:$0xff]  ;;  %v1073_v54 = vadd.f32 %v1072_v48, %v557_v44  ;;  %v1803_v55 = vadd.f32 %v1802_v49, %v1292_v46  ;;  %v353_v44 = vld [vmem:[%s2893_s5 + $0x338] sm:$0xff] }
  0xfa   : > { %v567_v48 = vld [vmem:[%s2893_s5 + $0x9e8] sm:$0xff] }
  0xfb   : > { %v845_v63 = vadd.f32 %v844_v59, %v334_v56  ;;  %v559_v56 = vld [vmem:[%s2893_s5 + $0x9a8] sm:$0xff]  ;;  %v346_v59 = vld [vmem:[%s2893_s5 + $0x300] sm:$0xff]  ;;  %v1804_v61 = vadd.f32 %v1803_v55, %v1293_v52 }
  0xfc   : > { %v354_v52 = vld [vmem:[%s2893_s5 + $0x340] sm:$0xff] }
  0xfd   : > { %v846_v3 = vadd.f32 %v845_v63, %v335_v60  ;;  %v1074_v60 = vadd.f32 %v1073_v54, %v558_v50  ;;  %v1302_v50 = vld [vmem:[%s2900_s7 + $0x90] sm:$0xff] }
  0xff   : > { %v847_v8 = vadd.f32 %v846_v3, %v336_v0  ;;  %v1295_v0 = vld [vmem:[%s2900_s7 + $0x58] sm:$0xff]  ;;  %v1075_v2 = vadd.f32 %v1074_v60, %v559_v56  ;;  %v1805_v3 = vadd.f32 %v1804_v61, %v1294_v58  ;;  %v568_v56 = vld [vmem:[%s2893_s5 + $0x9f0] sm:$0xff]  ;;  %v355_v60 = vld [vmem:[%s2893_s5 + $0x348] sm:$0xff] }
 0x100   : > { %v1303_v58 = vld [vmem:[%s2900_s7 + $0x98] sm:$0xff] }
 0x101   : > { %v848_v15 = vadd.f32 %v847_v8, %v337_v4  ;;  %v561_v4 = vld [vmem:[%s2893_s5 + $0x9b8] sm:$0xff]  ;;  %v1076_v8 = vadd.f32 %v1075_v2, %v560_v62  ;;  %v1806_v9 = vadd.f32 %v1805_v3, %v1295_v0  ;;  %v1304_v2 = vld [vmem:[%s2900_s7 + $0xa0] sm:$0xff] }
 0x102   : > { %v569_v0 = vld [vmem:[%s2893_s5 + $0x9f8] sm:$0xff] }
 0x103   : > { %v849_v21 = vadd.f32 %v848_v15, %v338_v11  ;;  %v1077_v14 = vadd.f32 %v1076_v8, %v561_v4  ;;  %v1807_v15 = vadd.f32 %v1806_v9, %v1296_v6  ;;  %v1547_v3 = vld [vmem:[%s2900_s7 + $0x838] sm:$0xff]  ;;  %v356_v4 = vld [vmem:[%s2893_s5 + $0x350] sm:$0xff]  ;;  %v570_v8 = vld [vmem:[%s2893_s5 + $0xa00] sm:$0xff] }
 0x105   : > { %v850_v27 = vadd.f32 %v849_v21, %v339_v17  ;;  %v1078_v21 = vadd.f32 %v1077_v14, %v562_v10  ;;  %v1305_v10 = vld [vmem:[%s2900_s7 + $0xa8] sm:$0xff] }
 0x107   : > { %v851_v33 = vadd.f32 %v850_v27, %v340_v23  ;;  %v1808_v23 = vadd.f32 %v1807_v15, %v1297_v12  ;;  %v1542_v27 = vld [vmem:[%s2900_s7 + $0x810] sm:$0xff]  ;;  %v357_v12 = vld [vmem:[%s2893_s5 + $0x358] sm:$0xff] }
 0x109   : > { %v852_v39 = vadd.f32 %v851_v33, %v341_v29  ;;  %v1079_v29 = vadd.f32 %v1078_v21, %v563_v16  ;;  %v1809_v30 = vadd.f32 %v1808_v23, %v1298_v18  ;;  %v571_v16 = vld [vmem:[%s2893_s5 + $0xa08] sm:$0xff]  ;;  %v1306_v18 = vld [vmem:[%s2900_s7 + $0xb0] sm:$0xff] }
 0x10b   : > { %v853_v45 = vadd.f32 %v852_v39, %v342_v35  ;;  %v1543_v35 = vld [vmem:[%s2900_s7 + $0x818] sm:$0xff]  ;;  %v1080_v37 = vadd.f32 %v1079_v29, %v564_v20  ;;  %v1810_v38 = vadd.f32 %v1809_v30, %v1299_v25  ;;  %v2058_v39 = vadd.f32 %v2057_v31, %v1542_v27  ;;  %v358_v20 = vld [vmem:[%s2893_s5 + $0x360] sm:$0xff]  ;;  %v1550_v27 = vld [vmem:[%s2900_s7 + $0x850] sm:$0xff] }
 0x10d   : > { %v854_v51 = vadd.f32 %v853_v45, %v343_v41  ;;  %v1081_v45 = vadd.f32 %v1080_v37, %v565_v32  ;;  %v1811_v46 = vadd.f32 %v1810_v38, %v1300_v34  ;;  %v573_v32 = vld [vmem:[%s2893_s5 + $0xa18] sm:$0xff]  ;;  %v1308_v34 = vld [vmem:[%s2900_s7 + $0xc0] sm:$0xff] }
 0x10f   : > { %v855_v57 = vadd.f32 %v854_v51, %v344_v47  ;;  %v2059_v47 = vadd.f32 %v2058_v39, %v1543_v35  ;;  %v1545_v51 = vld [vmem:[%s2900_s7 + $0x828] sm:$0xff]  ;;  %v1812_v54 = vadd.f32 %v1811_v46, %v1301_v42  ;;  %v1551_v35 = vld [vmem:[%s2900_s7 + $0x858] sm:$0xff] }
 0x110   : > { %v1309_v42 = vld [vmem:[%s2900_s7 + $0xc8] sm:$0xff] }
 0x111   : > { %v856_v63 = vadd.f32 %v855_v57, %v345_v53  ;;  %v1082_v53 = vadd.f32 %v1081_v45, %v566_v40  ;;  %v2060_v55 = vadd.f32 %v2059_v47, %v1544_v43  ;;  %v1813_v62 = vadd.f32 %v1812_v54, %v1302_v50  ;;  %v574_v40 = vld [vmem:[%s2893_s5 + $0xa20] sm:$0xff]  ;;  %v1310_v50 = vld [vmem:[%s2900_s7 + $0xd0] sm:$0xff] }
 0x112   : > { %v1552_v43 = vld [vmem:[%s2900_s7 + $0x860] sm:$0xff] }
 0x113   : > { %v857_v5 = vadd.f32 %v856_v63, %v346_v59  ;;  %v1546_v59 = vld [vmem:[%s2900_s7 + $0x830] sm:$0xff]  ;;  %v1083_v61 = vadd.f32 %v1082_v53, %v567_v48  ;;  %v2061_v63 = vadd.f32 %v2060_v55, %v1545_v51  ;;  %v1814_v6 = vadd.f32 %v1813_v62, %v1303_v58  ;;  %v575_v48 = vld [vmem:[%s2893_s5 + $0xa28] sm:$0xff]  ;;  %v1311_v58 = vld [vmem:[%s2900_s7 + $0xd8] sm:$0xff] }
 0x114   : > { %v1553_v51 = vld [vmem:[%s2900_s7 + $0x868] sm:$0xff] }
 0x115   : > { %v858_v11 = vadd.f32 %v857_v5, %v347_v1  ;;  %v1084_v5 = vadd.f32 %v1083_v61, %v568_v56  ;;  %v1815_v14 = vadd.f32 %v1814_v6, %v1304_v2  ;;  %v576_v56 = vld [vmem:[%s2893_s5 + $0xa30] sm:$0xff]  ;;  %v1312_v2 = vld [vmem:[%s2900_s7 + $0xe0] sm:$0xff] }
 0x117   : > { %v859_v17 = vadd.f32 %v858_v11, %v348_v7  ;;  %v2062_v7 = vadd.f32 %v2061_v63, %v1546_v59  ;;  %v1548_v11 = vld [vmem:[%s2900_s7 + $0x840] sm:$0xff]  ;;  %v1816_v22 = vadd.f32 %v1815_v14, %v1305_v10  ;;  %v1554_v59 = vld [vmem:[%s2900_s7 + $0x870] sm:$0xff]  ;;  %v1313_v10 = vld [vmem:[%s2900_s7 + $0xe8] sm:$0xff] }
 0x119   : > { %v860_v24 = vadd.f32 %v859_v17, %v349_v13  ;;  %v1085_v13 = vadd.f32 %v1084_v5, %v569_v0  ;;  %v2063_v15 = vadd.f32 %v2062_v7, %v1547_v3  ;;  %v1817_v30 = vadd.f32 %v1816_v22, %v1306_v18  ;;  %v577_v0 = vld [vmem:[%s2893_s5 + $0xa38] sm:$0xff]  ;;  %v1314_v18 = vld [vmem:[%s2900_s7 + $0xf0] sm:$0xff] }
 0x11a   : > { %v1555_v3 = vld [vmem:[%s2900_s7 + $0x878] sm:$0xff] }
 0x11b   : > { %v861_v33 = vadd.f32 %v860_v24, %v350_v19  ;;  %v1549_v19 = vld [vmem:[%s2900_s7 + $0x848] sm:$0xff]  ;;  %v1086_v21 = vadd.f32 %v1085_v13, %v570_v8  ;;  %v2064_v23 = vadd.f32 %v2063_v15, %v1548_v11  ;;  %v572_v24 = vld [vmem:[%s2893_s5 + $0xa10] sm:$0xff]  ;;  %v1818_v38 = vadd.f32 %v1817_v30, %v1307_v26  ;;  %v578_v8 = vld [vmem:[%s2893_s5 + $0xa40] sm:$0xff] }
 0x11c   : > { %v1556_v11 = vld [vmem:[%s2900_s7 + $0x880] sm:$0xff]  ;;  %v1315_v26 = vld [vmem:[%s2900_s7 + $0xf8] sm:$0xff] }
 0x11d   : > { %v862_v41 = vadd.f32 %v861_v33, %v351_v28  ;;  %v359_v28 = vld [vmem:[%s2893_s5 + $0x368] sm:$0xff]  ;;  %v1087_v29 = vadd.f32 %v1086_v21, %v571_v16  ;;  %v2065_v31 = vadd.f32 %v2064_v23, %v1549_v19  ;;  %v1819_v46 = vadd.f32 %v1818_v38, %v1308_v34  ;;  %v1316_v34 = vld [vmem:[%s2900_s7 + $0x100] sm:$0xff] }
 0x11e   : > { %v579_v16 = vld [vmem:[%s2893_s5 + $0xa48] sm:$0xff] }
 0x11f   : > { %v863_v49 = vadd.f32 %v862_v41, %v352_v36  ;;  %v360_v36 = vld [vmem:[%s2893_s5 + $0x370] sm:$0xff]  ;;  %v1088_v37 = vadd.f32 %v1087_v29, %v572_v24  ;;  %v2066_v39 = vadd.f32 %v2065_v31, %v1550_v27  ;;  %v1820_v54 = vadd.f32 %v1819_v46, %v1309_v42  ;;  %v1557_v19 = vld [vmem:[%s2900_s7 + $0x888] sm:$0xff] }
 0x120   : > { %v580_v24 = vld [vmem:[%s2893_s5 + $0xa50] sm:$0xff]  ;;  %v1317_v42 = vld [vmem:[%s2900_s7 + $0x108] sm:$0xff] }
 0x121   : > { %v864_v57 = vadd.f32 %v863_v49, %v353_v44  ;;  %v361_v44 = vld [vmem:[%s2893_s5 + $0x378] sm:$0xff]  ;;  %v1089_v45 = vadd.f32 %v1088_v37, %v573_v32  ;;  %v2067_v47 = vadd.f32 %v2066_v39, %v1551_v35  ;;  %v1821_v62 = vadd.f32 %v1820_v54, %v1310_v50  ;;  %v1558_v27 = vld [vmem:[%s2900_s7 + $0x890] sm:$0xff] }
 0x122   : > { %v581_v32 = vld [vmem:[%s2893_s5 + $0xa58] sm:$0xff]  ;;  %v1318_v50 = vld [vmem:[%s2900_s7 + $0x110] sm:$0xff] }
 0x123   : > { %v865_v1 = vadd.f32 %v864_v57, %v354_v52  ;;  %v362_v52 = vld [vmem:[%s2893_s5 + $0x380] sm:$0xff]  ;;  %v1090_v53 = vadd.f32 %v1089_v45, %v574_v40  ;;  %v2068_v55 = vadd.f32 %v2067_v47, %v1552_v43  ;;  %v1822_v6 = vadd.f32 %v1821_v62, %v1311_v58  ;;  %v1559_v35 = vld [vmem:[%s2900_s7 + $0x898] sm:$0xff] }
 0x124   : > { %v582_v40 = vld [vmem:[%s2893_s5 + $0xa60] sm:$0xff]  ;;  %v1319_v58 = vld [vmem:[%s2900_s7 + $0x118] sm:$0xff] }
 0x125   : > { %v866_v9 = vadd.f32 %v865_v1, %v355_v60  ;;  %v363_v60 = vld [vmem:[%s2893_s5 + $0x388] sm:$0xff]  ;;  %v1091_v61 = vadd.f32 %v1090_v53, %v575_v48  ;;  %v2069_v63 = vadd.f32 %v2068_v55, %v1553_v51  ;;  %v1823_v14 = vadd.f32 %v1822_v6, %v1312_v2  ;;  %v1560_v43 = vld [vmem:[%s2900_s7 + $0x8a0] sm:$0xff] }
 0x126   : > { %v583_v48 = vld [vmem:[%s2893_s5 + $0xa68] sm:$0xff]  ;;  %v1320_v2 = vld [vmem:[%s2900_s7 + $0x120] sm:$0xff] }
 0x127   : > { %v867_v17 = vadd.f32 %v866_v9, %v356_v4  ;;  %v364_v4 = vld [vmem:[%s2893_s5 + $0x390] sm:$0xff]  ;;  %v1092_v5 = vadd.f32 %v1091_v61, %v576_v56  ;;  %v2070_v7 = vadd.f32 %v2069_v63, %v1554_v59  ;;  %v1824_v22 = vadd.f32 %v1823_v14, %v1313_v10  ;;  %v1561_v51 = vld [vmem:[%s2900_s7 + $0x8a8] sm:$0xff] }
 0x128   : > { %v584_v56 = vld [vmem:[%s2893_s5 + $0xa70] sm:$0xff]  ;;  %v1321_v10 = vld [vmem:[%s2900_s7 + $0x128] sm:$0xff] }
 0x129   : > { %v868_v25 = vadd.f32 %v867_v17, %v357_v12  ;;  %v365_v12 = vld [vmem:[%s2893_s5 + $0x398] sm:$0xff]  ;;  %v1093_v13 = vadd.f32 %v1092_v5, %v577_v0  ;;  %v2071_v15 = vadd.f32 %v2070_v7, %v1555_v3  ;;  %v1825_v30 = vadd.f32 %v1824_v22, %v1314_v18  ;;  %v1562_v59 = vld [vmem:[%s2900_s7 + $0x8b0] sm:$0xff] }
 0x12a   : > { %v585_v0 = vld [vmem:[%s2893_s5 + $0xa78] sm:$0xff]  ;;  %v1322_v18 = vld [vmem:[%s2900_s7 + $0x130] sm:$0xff] }
 0x12b   : > { %v869_v33 = vadd.f32 %v868_v25, %v358_v20  ;;  %v366_v20 = vld [vmem:[%s2893_s5 + $0x3a0] sm:$0xff]  ;;  %v1094_v21 = vadd.f32 %v1093_v13, %v578_v8  ;;  %v2072_v23 = vadd.f32 %v2071_v15, %v1556_v11  ;;  %v1826_v38 = vadd.f32 %v1825_v30, %v1315_v26  ;;  %v1563_v3 = vld [vmem:[%s2900_s7 + $0x8b8] sm:$0xff] }
 0x12c   : > { %v586_v8 = vld [vmem:[%s2893_s5 + $0xa80] sm:$0xff]  ;;  %v1323_v26 = vld [vmem:[%s2900_s7 + $0x138] sm:$0xff] }
 0x12d   : > { %v870_v41 = vadd.f32 %v869_v33, %v359_v28  ;;  %v367_v28 = vld [vmem:[%s2893_s5 + $0x3a8] sm:$0xff]  ;;  %v1095_v29 = vadd.f32 %v1094_v21, %v579_v16  ;;  %v2073_v31 = vadd.f32 %v2072_v23, %v1557_v19  ;;  %v1827_v46 = vadd.f32 %v1826_v38, %v1316_v34  ;;  %v1564_v11 = vld [vmem:[%s2900_s7 + $0x8c0] sm:$0xff] }
 0x12e   : > { %v587_v16 = vld [vmem:[%s2893_s5 + $0xa88] sm:$0xff]  ;;  %v1324_v34 = vld [vmem:[%s2900_s7 + $0x140] sm:$0xff] }
 0x12f   : > { %v871_v49 = vadd.f32 %v870_v41, %v360_v36  ;;  %v368_v36 = vld [vmem:[%s2893_s5 + $0x3b0] sm:$0xff]  ;;  %v1096_v37 = vadd.f32 %v1095_v29, %v580_v24  ;;  %v2074_v39 = vadd.f32 %v2073_v31, %v1558_v27  ;;  %v1828_v54 = vadd.f32 %v1827_v46, %v1317_v42  ;;  %v1565_v19 = vld [vmem:[%s2900_s7 + $0x8c8] sm:$0xff] }
 0x130   : > { %v588_v24 = vld [vmem:[%s2893_s5 + $0xa90] sm:$0xff]  ;;  %v1325_v42 = vld [vmem:[%s2900_s7 + $0x148] sm:$0xff] }
 0x131   : > { %v872_v57 = vadd.f32 %v871_v49, %v361_v44  ;;  %v369_v44 = vld [vmem:[%s2893_s5 + $0x3b8] sm:$0xff]  ;;  %v1097_v45 = vadd.f32 %v1096_v37, %v581_v32  ;;  %v2075_v47 = vadd.f32 %v2074_v39, %v1559_v35  ;;  %v1829_v62 = vadd.f32 %v1828_v54, %v1318_v50  ;;  %v1566_v27 = vld [vmem:[%s2900_s7 + $0x8d0] sm:$0xff] }
 0x132   : > { %v589_v32 = vld [vmem:[%s2893_s5 + $0xa98] sm:$0xff]  ;;  %v1326_v50 = vld [vmem:[%s2900_s7 + $0x150] sm:$0xff] }
 0x133   : > { %v873_v1 = vadd.f32 %v872_v57, %v362_v52  ;;  %v370_v52 = vld [vmem:[%s2893_s5 + $0x3c0] sm:$0xff]  ;;  %v1098_v53 = vadd.f32 %v1097_v45, %v582_v40  ;;  %v2076_v55 = vadd.f32 %v2075_v47, %v1560_v43  ;;  %v1830_v6 = vadd.f32 %v1829_v62, %v1319_v58  ;;  %v1567_v35 = vld [vmem:[%s2900_s7 + $0x8d8] sm:$0xff] }
 0x134   : > { %v590_v40 = vld [vmem:[%s2893_s5 + $0xaa0] sm:$0xff]  ;;  %v1327_v58 = vld [vmem:[%s2900_s7 + $0x158] sm:$0xff] }
 0x135   : > { %v874_v9 = vadd.f32 %v873_v1, %v363_v60  ;;  %v371_v60 = vld [vmem:[%s2893_s5 + $0x3c8] sm:$0xff]  ;;  %v1099_v61 = vadd.f32 %v1098_v53, %v583_v48  ;;  %v2077_v63 = vadd.f32 %v2076_v55, %v1561_v51  ;;  %v1831_v14 = vadd.f32 %v1830_v6, %v1320_v2  ;;  %v1568_v43 = vld [vmem:[%s2900_s7 + $0x8e0] sm:$0xff] }
 0x136   : > { %v591_v48 = vld [vmem:[%s2893_s5 + $0xaa8] sm:$0xff]  ;;  %v1328_v2 = vld [vmem:[%s2900_s7 + $0x160] sm:$0xff] }
 0x137   : > { %v875_v17 = vadd.f32 %v874_v9, %v364_v4  ;;  %v372_v4 = vld [vmem:[%s2893_s5 + $0x3d0] sm:$0xff]  ;;  %v1100_v5 = vadd.f32 %v1099_v61, %v584_v56  ;;  %v2078_v7 = vadd.f32 %v2077_v63, %v1562_v59  ;;  %v1832_v22 = vadd.f32 %v1831_v14, %v1321_v10  ;;  %v1569_v51 = vld [vmem:[%s2900_s7 + $0x8e8] sm:$0xff] }
 0x138   : > { %v592_v56 = vld [vmem:[%s2893_s5 + $0xab0] sm:$0xff]  ;;  %v1329_v10 = vld [vmem:[%s2900_s7 + $0x168] sm:$0xff] }
 0x139   : > { %v876_v25 = vadd.f32 %v875_v17, %v365_v12  ;;  %v373_v12 = vld [vmem:[%s2893_s5 + $0x3d8] sm:$0xff]  ;;  %v1101_v13 = vadd.f32 %v1100_v5, %v585_v0  ;;  %v2079_v15 = vadd.f32 %v2078_v7, %v1563_v3  ;;  %v1833_v30 = vadd.f32 %v1832_v22, %v1322_v18  ;;  %v1570_v59 = vld [vmem:[%s2900_s7 + $0x8f0] sm:$0xff] }
 0x13a   : > { %v593_v0 = vld [vmem:[%s2893_s5 + $0xab8] sm:$0xff]  ;;  %v1330_v18 = vld [vmem:[%s2900_s7 + $0x170] sm:$0xff] }
 0x13b   : > { %v877_v33 = vadd.f32 %v876_v25, %v366_v20  ;;  %v374_v20 = vld [vmem:[%s2893_s5 + $0x3e0] sm:$0xff]  ;;  %v1102_v21 = vadd.f32 %v1101_v13, %v586_v8  ;;  %v2080_v23 = vadd.f32 %v2079_v15, %v1564_v11  ;;  %v1834_v38 = vadd.f32 %v1833_v30, %v1323_v26  ;;  %v1571_v3 = vld [vmem:[%s2900_s7 + $0x8f8] sm:$0xff] }
 0x13c   : > { %v594_v8 = vld [vmem:[%s2893_s5 + $0xac0] sm:$0xff]  ;;  %v1331_v26 = vld [vmem:[%s2900_s7 + $0x178] sm:$0xff] }
 0x13d   : > { %v878_v41 = vadd.f32 %v877_v33, %v367_v28  ;;  %v375_v28 = vld [vmem:[%s2893_s5 + $0x3e8] sm:$0xff]  ;;  %v1103_v29 = vadd.f32 %v1102_v21, %v587_v16  ;;  %v2081_v31 = vadd.f32 %v2080_v23, %v1565_v19  ;;  %v1835_v46 = vadd.f32 %v1834_v38, %v1324_v34  ;;  %v1572_v11 = vld [vmem:[%s2900_s7 + $0x900] sm:$0xff] }
 0x13e   : > { %v595_v16 = vld [vmem:[%s2893_s5 + $0xac8] sm:$0xff]  ;;  %v1332_v34 = vld [vmem:[%s2900_s7 + $0x180] sm:$0xff] }
 0x13f   : > { %v879_v49 = vadd.f32 %v878_v41, %v368_v36  ;;  %v376_v36 = vld [vmem:[%s2893_s5 + $0x3f0] sm:$0xff]  ;;  %v1104_v37 = vadd.f32 %v1103_v29, %v588_v24  ;;  %v2082_v39 = vadd.f32 %v2081_v31, %v1566_v27  ;;  %v1836_v54 = vadd.f32 %v1835_v46, %v1325_v42  ;;  %v1573_v19 = vld [vmem:[%s2900_s7 + $0x908] sm:$0xff] }
 0x140   : > { %v596_v24 = vld [vmem:[%s2893_s5 + $0xad0] sm:$0xff]  ;;  %v1333_v42 = vld [vmem:[%s2900_s7 + $0x188] sm:$0xff] }
 0x141   : > { %v880_v57 = vadd.f32 %v879_v49, %v369_v44  ;;  %v377_v44 = vld [vmem:[%s2893_s5 + $0x3f8] sm:$0xff]  ;;  %v1105_v45 = vadd.f32 %v1104_v37, %v589_v32  ;;  %v2083_v47 = vadd.f32 %v2082_v39, %v1567_v35  ;;  %v1837_v62 = vadd.f32 %v1836_v54, %v1326_v50  ;;  %v1574_v27 = vld [vmem:[%s2900_s7 + $0x910] sm:$0xff] }
 0x142   : > { %v597_v32 = vld [vmem:[%s2893_s5 + $0xad8] sm:$0xff]  ;;  %v1334_v50 = vld [vmem:[%s2900_s7 + $0x190] sm:$0xff] }
 0x143   : > { %v881_v1 = vadd.f32 %v880_v57, %v370_v52  ;;  %v378_v52 = vld [vmem:[%s2893_s5 + $0x400] sm:$0xff]  ;;  %v1106_v53 = vadd.f32 %v1105_v45, %v590_v40  ;;  %v2084_v55 = vadd.f32 %v2083_v47, %v1568_v43  ;;  %v1838_v6 = vadd.f32 %v1837_v62, %v1327_v58  ;;  %v1575_v35 = vld [vmem:[%s2900_s7 + $0x918] sm:$0xff] }
 0x144   : > { %v598_v40 = vld [vmem:[%s2893_s5 + $0xae0] sm:$0xff]  ;;  %v1335_v58 = vld [vmem:[%s2900_s7 + $0x198] sm:$0xff] }
 0x145   : > { %v882_v9 = vadd.f32 %v881_v1, %v371_v60  ;;  %v379_v60 = vld [vmem:[%s2893_s5 + $0x408] sm:$0xff]  ;;  %v1107_v61 = vadd.f32 %v1106_v53, %v591_v48  ;;  %v2085_v63 = vadd.f32 %v2084_v55, %v1569_v51  ;;  %v1839_v14 = vadd.f32 %v1838_v6, %v1328_v2  ;;  %v1576_v43 = vld [vmem:[%s2900_s7 + $0x920] sm:$0xff] }
 0x146   : > { %v599_v48 = vld [vmem:[%s2893_s5 + $0xae8] sm:$0xff]  ;;  %v1336_v2 = vld [vmem:[%s2900_s7 + $0x1a0] sm:$0xff] }
 0x147   : > { %v883_v17 = vadd.f32 %v882_v9, %v372_v4  ;;  %v380_v4 = vld [vmem:[%s2893_s5 + $0x410] sm:$0xff]  ;;  %v1108_v5 = vadd.f32 %v1107_v61, %v592_v56  ;;  %v2086_v7 = vadd.f32 %v2085_v63, %v1570_v59  ;;  %v1840_v22 = vadd.f32 %v1839_v14, %v1329_v10  ;;  %v1577_v51 = vld [vmem:[%s2900_s7 + $0x928] sm:$0xff] }
 0x148   : > { %v600_v56 = vld [vmem:[%s2893_s5 + $0xaf0] sm:$0xff]  ;;  %v1337_v10 = vld [vmem:[%s2900_s7 + $0x1a8] sm:$0xff] }
 0x149   : > { %v884_v25 = vadd.f32 %v883_v17, %v373_v12  ;;  %v381_v12 = vld [vmem:[%s2893_s5 + $0x418] sm:$0xff]  ;;  %v1109_v13 = vadd.f32 %v1108_v5, %v593_v0  ;;  %v2087_v15 = vadd.f32 %v2086_v7, %v1571_v3  ;;  %v1841_v30 = vadd.f32 %v1840_v22, %v1330_v18  ;;  %v1578_v59 = vld [vmem:[%s2900_s7 + $0x930] sm:$0xff] }
 0x14a   : > { %v601_v0 = vld [vmem:[%s2893_s5 + $0xaf8] sm:$0xff]  ;;  %v1338_v18 = vld [vmem:[%s2900_s7 + $0x1b0] sm:$0xff] }
 0x14b   : > { %v885_v33 = vadd.f32 %v884_v25, %v374_v20  ;;  %v382_v20 = vld [vmem:[%s2893_s5 + $0x420] sm:$0xff]  ;;  %v1110_v21 = vadd.f32 %v1109_v13, %v594_v8  ;;  %v2088_v23 = vadd.f32 %v2087_v15, %v1572_v11  ;;  %v1842_v38 = vadd.f32 %v1841_v30, %v1331_v26  ;;  %v1579_v3 = vld [vmem:[%s2900_s7 + $0x938] sm:$0xff] }
 0x14c   : > { %v602_v8 = vld [vmem:[%s2893_s5 + $0xb00] sm:$0xff]  ;;  %v1339_v26 = vld [vmem:[%s2900_s7 + $0x1b8] sm:$0xff] }
 0x14d   : > { %v886_v41 = vadd.f32 %v885_v33, %v375_v28  ;;  %v383_v28 = vld [vmem:[%s2893_s5 + $0x428] sm:$0xff]  ;;  %v1111_v29 = vadd.f32 %v1110_v21, %v595_v16  ;;  %v2089_v31 = vadd.f32 %v2088_v23, %v1573_v19  ;;  %v1843_v46 = vadd.f32 %v1842_v38, %v1332_v34  ;;  %v1580_v11 = vld [vmem:[%s2900_s7 + $0x940] sm:$0xff] }
 0x14e   : > { %v603_v16 = vld [vmem:[%s2893_s5 + $0xb08] sm:$0xff]  ;;  %v1340_v34 = vld [vmem:[%s2900_s7 + $0x1c0] sm:$0xff] }
 0x14f   : > { %v887_v49 = vadd.f32 %v886_v41, %v376_v36  ;;  %v384_v36 = vld [vmem:[%s2893_s5 + $0x430] sm:$0xff]  ;;  %v1112_v37 = vadd.f32 %v1111_v29, %v596_v24  ;;  %v2090_v39 = vadd.f32 %v2089_v31, %v1574_v27  ;;  %v1844_v54 = vadd.f32 %v1843_v46, %v1333_v42  ;;  %v1581_v19 = vld [vmem:[%s2900_s7 + $0x948] sm:$0xff] }
 0x150   : > { %v604_v24 = vld [vmem:[%s2893_s5 + $0xb10] sm:$0xff]  ;;  %v1341_v42 = vld [vmem:[%s2900_s7 + $0x1c8] sm:$0xff] }
 0x151   : > { %v888_v57 = vadd.f32 %v887_v49, %v377_v44  ;;  %v385_v44 = vld [vmem:[%s2893_s5 + $0x438] sm:$0xff]  ;;  %v1113_v45 = vadd.f32 %v1112_v37, %v597_v32  ;;  %v2091_v47 = vadd.f32 %v2090_v39, %v1575_v35  ;;  %v1845_v62 = vadd.f32 %v1844_v54, %v1334_v50  ;;  %v1582_v27 = vld [vmem:[%s2900_s7 + $0x950] sm:$0xff] }
 0x152   : > { %v605_v32 = vld [vmem:[%s2893_s5 + $0xb18] sm:$0xff]  ;;  %v1342_v50 = vld [vmem:[%s2900_s7 + $0x1d0] sm:$0xff] }
 0x153   : > { %v889_v1 = vadd.f32 %v888_v57, %v378_v52  ;;  %v386_v52 = vld [vmem:[%s2893_s5 + $0x440] sm:$0xff]  ;;  %v1114_v53 = vadd.f32 %v1113_v45, %v598_v40  ;;  %v2092_v55 = vadd.f32 %v2091_v47, %v1576_v43  ;;  %v1846_v6 = vadd.f32 %v1845_v62, %v1335_v58  ;;  %v1583_v35 = vld [vmem:[%s2900_s7 + $0x958] sm:$0xff] }
 0x154   : > { %v606_v40 = vld [vmem:[%s2893_s5 + $0xb20] sm:$0xff]  ;;  %v1343_v58 = vld [vmem:[%s2900_s7 + $0x1d8] sm:$0xff] }
 0x155   : > { %v890_v9 = vadd.f32 %v889_v1, %v379_v60  ;;  %v387_v60 = vld [vmem:[%s2893_s5 + $0x448] sm:$0xff]  ;;  %v1115_v61 = vadd.f32 %v1114_v53, %v599_v48  ;;  %v2093_v63 = vadd.f32 %v2092_v55, %v1577_v51  ;;  %v1847_v14 = vadd.f32 %v1846_v6, %v1336_v2  ;;  %v1584_v43 = vld [vmem:[%s2900_s7 + $0x960] sm:$0xff] }
 0x156   : > { %v607_v48 = vld [vmem:[%s2893_s5 + $0xb28] sm:$0xff]  ;;  %v1344_v2 = vld [vmem:[%s2900_s7 + $0x1e0] sm:$0xff] }
 0x157   : > { %v891_v17 = vadd.f32 %v890_v9, %v380_v4  ;;  %v388_v4 = vld [vmem:[%s2893_s5 + $0x450] sm:$0xff]  ;;  %v1116_v5 = vadd.f32 %v1115_v61, %v600_v56  ;;  %v2094_v7 = vadd.f32 %v2093_v63, %v1578_v59  ;;  %v1848_v22 = vadd.f32 %v1847_v14, %v1337_v10  ;;  %v1585_v51 = vld [vmem:[%s2900_s7 + $0x968] sm:$0xff] }
 0x158   : > { %v608_v56 = vld [vmem:[%s2893_s5 + $0xb30] sm:$0xff]  ;;  %v1345_v10 = vld [vmem:[%s2900_s7 + $0x1e8] sm:$0xff] }
 0x159   : > { %v892_v25 = vadd.f32 %v891_v17, %v381_v12  ;;  %v389_v12 = vld [vmem:[%s2893_s5 + $0x458] sm:$0xff]  ;;  %v1117_v13 = vadd.f32 %v1116_v5, %v601_v0  ;;  %v2095_v15 = vadd.f32 %v2094_v7, %v1579_v3  ;;  %v1849_v30 = vadd.f32 %v1848_v22, %v1338_v18  ;;  %v1586_v59 = vld [vmem:[%s2900_s7 + $0x970] sm:$0xff] }
 0x15a   : > { %v609_v0 = vld [vmem:[%s2893_s5 + $0xb38] sm:$0xff]  ;;  %v1346_v18 = vld [vmem:[%s2900_s7 + $0x1f0] sm:$0xff] }
 0x15b   : > { %v893_v33 = vadd.f32 %v892_v25, %v382_v20  ;;  %v390_v20 = vld [vmem:[%s2893_s5 + $0x460] sm:$0xff]  ;;  %v1118_v21 = vadd.f32 %v1117_v13, %v602_v8  ;;  %v2096_v23 = vadd.f32 %v2095_v15, %v1580_v11  ;;  %v1850_v38 = vadd.f32 %v1849_v30, %v1339_v26  ;;  %v1587_v3 = vld [vmem:[%s2900_s7 + $0x978] sm:$0xff] }
 0x15c   : > { %v610_v8 = vld [vmem:[%s2893_s5 + $0xb40] sm:$0xff]  ;;  %v1347_v26 = vld [vmem:[%s2900_s7 + $0x1f8] sm:$0xff] }
 0x15d   : > { %v894_v41 = vadd.f32 %v893_v33, %v383_v28  ;;  %v391_v28 = vld [vmem:[%s2893_s5 + $0x468] sm:$0xff]  ;;  %v1119_v29 = vadd.f32 %v1118_v21, %v603_v16  ;;  %v2097_v31 = vadd.f32 %v2096_v23, %v1581_v19  ;;  %v1851_v46 = vadd.f32 %v1850_v38, %v1340_v34  ;;  %v1588_v11 = vld [vmem:[%s2900_s7 + $0x980] sm:$0xff] }
 0x15e   : > { %v611_v16 = vld [vmem:[%s2893_s5 + $0xb48] sm:$0xff]  ;;  %v1348_v34 = vld [vmem:[%s2900_s7 + $0x200] sm:$0xff] }
 0x15f   : > { %v895_v49 = vadd.f32 %v894_v41, %v384_v36  ;;  %v392_v36 = vld [vmem:[%s2893_s5 + $0x470] sm:$0xff]  ;;  %v1120_v37 = vadd.f32 %v1119_v29, %v604_v24  ;;  %v2098_v39 = vadd.f32 %v2097_v31, %v1582_v27  ;;  %v1852_v54 = vadd.f32 %v1851_v46, %v1341_v42  ;;  %v1589_v19 = vld [vmem:[%s2900_s7 + $0x988] sm:$0xff] }
 0x160   : > { %v612_v24 = vld [vmem:[%s2893_s5 + $0xb50] sm:$0xff]  ;;  %v1349_v42 = vld [vmem:[%s2900_s7 + $0x208] sm:$0xff] }
 0x161   : > { %v896_v57 = vadd.f32 %v895_v49, %v385_v44  ;;  %v393_v44 = vld [vmem:[%s2893_s5 + $0x478] sm:$0xff]  ;;  %v1121_v45 = vadd.f32 %v1120_v37, %v605_v32  ;;  %v2099_v47 = vadd.f32 %v2098_v39, %v1583_v35  ;;  %v1853_v62 = vadd.f32 %v1852_v54, %v1342_v50  ;;  %v1590_v27 = vld [vmem:[%s2900_s7 + $0x990] sm:$0xff] }
 0x162   : > { %v613_v32 = vld [vmem:[%s2893_s5 + $0xb58] sm:$0xff]  ;;  %v1350_v50 = vld [vmem:[%s2900_s7 + $0x210] sm:$0xff] }
 0x163   : > { %v897_v1 = vadd.f32 %v896_v57, %v386_v52  ;;  %v394_v52 = vld [vmem:[%s2893_s5 + $0x480] sm:$0xff]  ;;  %v1122_v53 = vadd.f32 %v1121_v45, %v606_v40  ;;  %v2100_v55 = vadd.f32 %v2099_v47, %v1584_v43  ;;  %v1854_v6 = vadd.f32 %v1853_v62, %v1343_v58  ;;  %v1591_v35 = vld [vmem:[%s2900_s7 + $0x998] sm:$0xff] }
 0x164   : > { %v614_v40 = vld [vmem:[%s2893_s5 + $0xb60] sm:$0xff]  ;;  %v1351_v58 = vld [vmem:[%s2900_s7 + $0x218] sm:$0xff] }
 0x165   : > { %v898_v9 = vadd.f32 %v897_v1, %v387_v60  ;;  %v395_v60 = vld [vmem:[%s2893_s5 + $0x488] sm:$0xff]  ;;  %v1123_v61 = vadd.f32 %v1122_v53, %v607_v48  ;;  %v2101_v63 = vadd.f32 %v2100_v55, %v1585_v51  ;;  %v1855_v14 = vadd.f32 %v1854_v6, %v1344_v2  ;;  %v1592_v43 = vld [vmem:[%s2900_s7 + $0x9a0] sm:$0xff] }
 0x166   : > { %v615_v48 = vld [vmem:[%s2893_s5 + $0xb68] sm:$0xff]  ;;  %v1352_v2 = vld [vmem:[%s2900_s7 + $0x220] sm:$0xff] }
 0x167   : > { %v899_v17 = vadd.f32 %v898_v9, %v388_v4  ;;  %v396_v4 = vld [vmem:[%s2893_s5 + $0x490] sm:$0xff]  ;;  %v1124_v5 = vadd.f32 %v1123_v61, %v608_v56  ;;  %v2102_v7 = vadd.f32 %v2101_v63, %v1586_v59  ;;  %v1856_v22 = vadd.f32 %v1855_v14, %v1345_v10  ;;  %v1593_v51 = vld [vmem:[%s2900_s7 + $0x9a8] sm:$0xff] }
 0x168   : > { %v616_v56 = vld [vmem:[%s2893_s5 + $0xb70] sm:$0xff]  ;;  %v1353_v10 = vld [vmem:[%s2900_s7 + $0x228] sm:$0xff] }
 0x169   : > { %v900_v25 = vadd.f32 %v899_v17, %v389_v12  ;;  %v397_v12 = vld [vmem:[%s2893_s5 + $0x498] sm:$0xff]  ;;  %v1125_v13 = vadd.f32 %v1124_v5, %v609_v0  ;;  %v2103_v15 = vadd.f32 %v2102_v7, %v1587_v3  ;;  %v1857_v30 = vadd.f32 %v1856_v22, %v1346_v18  ;;  %v1594_v59 = vld [vmem:[%s2900_s7 + $0x9b0] sm:$0xff] }
 0x16a   : > { %v617_v0 = vld [vmem:[%s2893_s5 + $0xb78] sm:$0xff]  ;;  %v1354_v18 = vld [vmem:[%s2900_s7 + $0x230] sm:$0xff] }
 0x16b   : > { %v901_v33 = vadd.f32 %v900_v25, %v390_v20  ;;  %v398_v20 = vld [vmem:[%s2893_s5 + $0x4a0] sm:$0xff]  ;;  %v1126_v21 = vadd.f32 %v1125_v13, %v610_v8  ;;  %v2104_v23 = vadd.f32 %v2103_v15, %v1588_v11  ;;  %v1858_v38 = vadd.f32 %v1857_v30, %v1347_v26  ;;  %v1595_v3 = vld [vmem:[%s2900_s7 + $0x9b8] sm:$0xff] }
 0x16c   : > { %v618_v8 = vld [vmem:[%s2893_s5 + $0xb80] sm:$0xff]  ;;  %v1355_v26 = vld [vmem:[%s2900_s7 + $0x238] sm:$0xff] }
 0x16d   : > { %v902_v41 = vadd.f32 %v901_v33, %v391_v28  ;;  %v399_v28 = vld [vmem:[%s2893_s5 + $0x4a8] sm:$0xff]  ;;  %v1127_v29 = vadd.f32 %v1126_v21, %v611_v16  ;;  %v2105_v31 = vadd.f32 %v2104_v23, %v1589_v19  ;;  %v1859_v46 = vadd.f32 %v1858_v38, %v1348_v34  ;;  %v1596_v11 = vld [vmem:[%s2900_s7 + $0x9c0] sm:$0xff] }
 0x16e   : > { %v619_v16 = vld [vmem:[%s2893_s5 + $0xb88] sm:$0xff]  ;;  %v1356_v34 = vld [vmem:[%s2900_s7 + $0x240] sm:$0xff] }
 0x16f   : > { %v903_v49 = vadd.f32 %v902_v41, %v392_v36  ;;  %v400_v36 = vld [vmem:[%s2893_s5 + $0x4b0] sm:$0xff]  ;;  %v1128_v37 = vadd.f32 %v1127_v29, %v612_v24  ;;  %v2106_v39 = vadd.f32 %v2105_v31, %v1590_v27  ;;  %v1860_v54 = vadd.f32 %v1859_v46, %v1349_v42  ;;  %v1597_v19 = vld [vmem:[%s2900_s7 + $0x9c8] sm:$0xff] }
 0x170   : > { %v620_v24 = vld [vmem:[%s2893_s5 + $0xb90] sm:$0xff]  ;;  %v1357_v42 = vld [vmem:[%s2900_s7 + $0x248] sm:$0xff] }
 0x171   : > { %v904_v57 = vadd.f32 %v903_v49, %v393_v44  ;;  %v401_v44 = vld [vmem:[%s2893_s5 + $0x4b8] sm:$0xff]  ;;  %v1129_v45 = vadd.f32 %v1128_v37, %v613_v32  ;;  %v2107_v47 = vadd.f32 %v2106_v39, %v1591_v35  ;;  %v1861_v62 = vadd.f32 %v1860_v54, %v1350_v50  ;;  %v1598_v27 = vld [vmem:[%s2900_s7 + $0x9d0] sm:$0xff] }
 0x172   : > { %v621_v32 = vld [vmem:[%s2893_s5 + $0xb98] sm:$0xff]  ;;  %v1358_v50 = vld [vmem:[%s2900_s7 + $0x250] sm:$0xff] }
 0x173   : > { %v905_v1 = vadd.f32 %v904_v57, %v394_v52  ;;  %v402_v52 = vld [vmem:[%s2893_s5 + $0x4c0] sm:$0xff]  ;;  %v1130_v53 = vadd.f32 %v1129_v45, %v614_v40  ;;  %v2108_v55 = vadd.f32 %v2107_v47, %v1592_v43  ;;  %v1862_v6 = vadd.f32 %v1861_v62, %v1351_v58  ;;  %v1599_v35 = vld [vmem:[%s2900_s7 + $0x9d8] sm:$0xff] }
 0x174   : > { %v622_v40 = vld [vmem:[%s2893_s5 + $0xba0] sm:$0xff]  ;;  %v1359_v58 = vld [vmem:[%s2900_s7 + $0x258] sm:$0xff] }
 0x175   : > { %v906_v9 = vadd.f32 %v905_v1, %v395_v60  ;;  %v403_v60 = vld [vmem:[%s2893_s5 + $0x4c8] sm:$0xff]  ;;  %v1131_v61 = vadd.f32 %v1130_v53, %v615_v48  ;;  %v2109_v63 = vadd.f32 %v2108_v55, %v1593_v51  ;;  %v1863_v14 = vadd.f32 %v1862_v6, %v1352_v2  ;;  %v1600_v43 = vld [vmem:[%s2900_s7 + $0x9e0] sm:$0xff] }
 0x176   : > { %v623_v48 = vld [vmem:[%s2893_s5 + $0xba8] sm:$0xff]  ;;  %v1360_v2 = vld [vmem:[%s2900_s7 + $0x260] sm:$0xff] }
 0x177   : > { %v907_v17 = vadd.f32 %v906_v9, %v396_v4  ;;  %v404_v4 = vld [vmem:[%s2893_s5 + $0x4d0] sm:$0xff]  ;;  %v1132_v5 = vadd.f32 %v1131_v61, %v616_v56  ;;  %v2110_v7 = vadd.f32 %v2109_v63, %v1594_v59  ;;  %v1864_v22 = vadd.f32 %v1863_v14, %v1353_v10  ;;  %v1601_v51 = vld [vmem:[%s2900_s7 + $0x9e8] sm:$0xff] }
 0x178   : > { %v624_v56 = vld [vmem:[%s2893_s5 + $0xbb0] sm:$0xff]  ;;  %v1361_v10 = vld [vmem:[%s2900_s7 + $0x268] sm:$0xff] }
 0x179   : > { %v908_v25 = vadd.f32 %v907_v17, %v397_v12  ;;  %v405_v12 = vld [vmem:[%s2893_s5 + $0x4d8] sm:$0xff]  ;;  %v1133_v13 = vadd.f32 %v1132_v5, %v617_v0  ;;  %v2111_v15 = vadd.f32 %v2110_v7, %v1595_v3  ;;  %v1865_v30 = vadd.f32 %v1864_v22, %v1354_v18  ;;  %v1602_v59 = vld [vmem:[%s2900_s7 + $0x9f0] sm:$0xff] }
 0x17a   : > { %v625_v0 = vld [vmem:[%s2893_s5 + $0xbb8] sm:$0xff]  ;;  %v1362_v18 = vld [vmem:[%s2900_s7 + $0x270] sm:$0xff] }
 0x17b   : > { %v909_v33 = vadd.f32 %v908_v25, %v398_v20  ;;  %v406_v20 = vld [vmem:[%s2893_s5 + $0x4e0] sm:$0xff]  ;;  %v1134_v21 = vadd.f32 %v1133_v13, %v618_v8  ;;  %v2112_v23 = vadd.f32 %v2111_v15, %v1596_v11  ;;  %v1866_v38 = vadd.f32 %v1865_v30, %v1355_v26  ;;  %v1603_v3 = vld [vmem:[%s2900_s7 + $0x9f8] sm:$0xff] }
 0x17c   : > { %v626_v8 = vld [vmem:[%s2893_s5 + $0xbc0] sm:$0xff]  ;;  %v1363_v26 = vld [vmem:[%s2900_s7 + $0x278] sm:$0xff] }
 0x17d   : > { %v910_v41 = vadd.f32 %v909_v33, %v399_v28  ;;  %v407_v28 = vld [vmem:[%s2893_s5 + $0x4e8] sm:$0xff]  ;;  %v1135_v29 = vadd.f32 %v1134_v21, %v619_v16  ;;  %v2113_v31 = vadd.f32 %v2112_v23, %v1597_v19  ;;  %v1867_v46 = vadd.f32 %v1866_v38, %v1356_v34  ;;  %v1604_v11 = vld [vmem:[%s2900_s7 + $0xa00] sm:$0xff] }
 0x17e   : > { %v627_v16 = vld [vmem:[%s2893_s5 + $0xbc8] sm:$0xff]  ;;  %v1364_v34 = vld [vmem:[%s2900_s7 + $0x280] sm:$0xff] }
 0x17f   : > { %v911_v49 = vadd.f32 %v910_v41, %v400_v36  ;;  %v408_v36 = vld [vmem:[%s2893_s5 + $0x4f0] sm:$0xff]  ;;  %v1136_v37 = vadd.f32 %v1135_v29, %v620_v24  ;;  %v2114_v39 = vadd.f32 %v2113_v31, %v1598_v27  ;;  %v1868_v54 = vadd.f32 %v1867_v46, %v1357_v42  ;;  %v1605_v19 = vld [vmem:[%s2900_s7 + $0xa08] sm:$0xff] }
 0x180   : > { %v628_v24 = vld [vmem:[%s2893_s5 + $0xbd0] sm:$0xff] }
 0x181   : > { %v912_v57 = vadd.f32 %v911_v49, %v401_v44  ;;  %v409_v44 = vld [vmem:[%s2893_s5 + $0x4f8] sm:$0xff]  ;;  %v1137_v45 = vadd.f32 %v1136_v37, %v621_v32  ;;  %v2115_v47 = vadd.f32 %v2114_v39, %v1599_v35  ;;  %v1869_v62 = vadd.f32 %v1868_v54, %v1358_v50  ;;  %v1606_v27 = vld [vmem:[%s2900_s7 + $0xa10] sm:$0xff]  ;;  %v630_v39 = vld [vmem:[%s2893_s5 + $0xbe0] sm:$0xff] }
 0x182   : > { %v629_v32 = vld [vmem:[%s2893_s5 + $0xbd8] sm:$0xff]  ;;  %v416_v42 = vld [vmem:[%s2893_s5 + $0x530] sm:$0xff] }
 0x183   : > { %v913_v1 = vadd.f32 %v912_v57, %v402_v52  ;;  %v410_v52 = vld [vmem:[%s2893_s5 + $0x500] sm:$0xff]  ;;  %v1138_v53 = vadd.f32 %v1137_v45, %v622_v40  ;;  %v2116_v55 = vadd.f32 %v2115_v47, %v1600_v43  ;;  %v1870_v6 = vadd.f32 %v1869_v62, %v1359_v58  ;;  %v1607_v35 = vld [vmem:[%s2900_s7 + $0xa18] sm:$0xff]  ;;  %v1365_v40 = vld [vmem:[%s2900_s7 + $0x288] sm:$0xff] }
 0x184   : > { %v631_v47 = vld [vmem:[%s2893_s5 + $0xbe8] sm:$0xff]  ;;  %v1367_v54 = vld [vmem:[%s2900_s7 + $0x298] sm:$0xff]  ;;  %v1368_v62 = vld [vmem:[%s2900_s7 + $0x2a0] sm:$0xff] }
 0x185   : > { %v914_v9 = vadd.f32 %v913_v1, %v403_v60  ;;  %v411_v60 = vld [vmem:[%s2893_s5 + $0x508] sm:$0xff]  ;;  %v1139_v61 = vadd.f32 %v1138_v53, %v623_v48  ;;  %v2117_v63 = vadd.f32 %v2116_v55, %v1601_v51  ;;  %v1871_v14 = vadd.f32 %v1870_v6, %v1360_v2  ;;  %v1366_v48 = vld [vmem:[%s2900_s7 + $0x290] sm:$0xff]  ;;  %v418_v6 = vld [vmem:[%s2893_s5 + $0x540] sm:$0xff] }
 0x186   : > { %v632_v53 = vld [vmem:[%s2893_s5 + $0xbf0] sm:$0xff] }
 0x187   : > { %v915_v17 = vadd.f32 %v914_v9, %v404_v4  ;;  %v412_v4 = vld [vmem:[%s2893_s5 + $0x510] sm:$0xff]  ;;  %v1140_v5 = vadd.f32 %v1139_v61, %v624_v56  ;;  %v2118_v7 = vadd.f32 %v2117_v63, %v1602_v59  ;;  %v1872_v22 = vadd.f32 %v1871_v14, %v1361_v10  ;;  %v417_v56 = vld [vmem:[%s2893_s5 + $0x538] sm:$0xff] }
 0x188   : > { %v1610_v55 = vld [vmem:[%s2900_s7 + $0xa30] sm:$0xff]  ;;  %v633_v61 = vld [vmem:[%s2893_s5 + $0xbf8] sm:$0xff] }
 0x189   : > { %v916_v25 = vadd.f32 %v915_v17, %v405_v12  ;;  %v413_v12 = vld [vmem:[%s2893_s5 + $0x518] sm:$0xff]  ;;  %v1141_v13 = vadd.f32 %v1140_v5, %v625_v0  ;;  %v2119_v15 = vadd.f32 %v2118_v7, %v1603_v3  ;;  %v1873_v30 = vadd.f32 %v1872_v22, %v1362_v18  ;;  %v634_v3 = vld [vmem:[%s2893_s5 + $0xc00] sm:$0xff] }
 0x18a   : > { %v1611_v63 = vld [vmem:[%s2900_s7 + $0xa38] sm:$0xff]  ;;  %v1612_v5 = vld [vmem:[%s2900_s7 + $0xa40] sm:$0xff] }
 0x18b   : > { %v917_v33 = vadd.f32 %v916_v25, %v406_v20  ;;  %v414_v20 = vld [vmem:[%s2893_s5 + $0x520] sm:$0xff]  ;;  %v1142_v21 = vadd.f32 %v1141_v13, %v626_v8  ;;  %v2120_v23 = vadd.f32 %v2119_v15, %v1604_v11  ;;  %v1874_v37 = vadd.f32 %v1873_v30, %v1363_v26  ;;  %v635_v11 = vld [vmem:[%s2893_s5 + $0xc08] sm:$0xff]  ;;  %v1371_v18 = vld [vmem:[%s2900_s7 + $0x2b8] sm:$0xff] }
 0x18c   : > { %v1613_v13 = vld [vmem:[%s2900_s7 + $0xa48] sm:$0xff]  ;;  %v1372_v26 = vld [vmem:[%s2900_s7 + $0x2c0] sm:$0xff] }
 0x18d   : > { %v918_v41 = vadd.f32 %v917_v33, %v407_v28  ;;  %v415_v28 = vld [vmem:[%s2893_s5 + $0x528] sm:$0xff]  ;;  %v1143_v29 = vadd.f32 %v1142_v21, %v627_v16  ;;  %v2121_v31 = vadd.f32 %v2120_v23, %v1605_v19  ;;  %v1875_v45 = vadd.f32 %v1874_v37, %v1364_v34  ;;  %v1614_v19 = vld [vmem:[%s2900_s7 + $0xa50] sm:$0xff] }
 0x18e   : > { %v420_v34 = vld [vmem:[%s2893_s5 + $0x550] sm:$0xff] }
 0x18f   : > { %v919_v49 = vadd.f32 %v918_v41, %v408_v36  ;;  %v1144_v36 = vadd.f32 %v1143_v29, %v628_v24  ;;  %v2122_v38 = vadd.f32 %v2121_v31, %v1606_v27  ;;  %v1608_v41 = vld [vmem:[%s2900_s7 + $0xa20] sm:$0xff]  ;;  %v1876_v51 = vadd.f32 %v1875_v45, %v1365_v40  ;;  %v1615_v27 = vld [vmem:[%s2900_s7 + $0xa58] sm:$0xff]  ;;  %v1374_v40 = vld [vmem:[%s2900_s7 + $0x2d0] sm:$0xff] }
 0x190   : > { %v638_v31 = vld [vmem:[%s2893_s5 + $0xc20] sm:$0xff]  ;;  %v640_v45 = vld [vmem:[%s2893_s5 + $0xc30] sm:$0xff] }
 0x191   : > { %v920_v57 = vadd.f32 %v919_v49, %v409_v44  ;;  %v1145_v44 = vadd.f32 %v1144_v36, %v629_v32  ;;  %v2123_v46 = vadd.f32 %v2122_v38, %v1607_v35  ;;  %v1609_v49 = vld [vmem:[%s2900_s7 + $0xa28] sm:$0xff]  ;;  %v1877_v59 = vadd.f32 %v1876_v51, %v1366_v48  ;;  %v421_v48 = vld [vmem:[%s2893_s5 + $0x558] sm:$0xff] }
 0x192   : > { %v1373_v32 = vld [vmem:[%s2900_s7 + $0x2c8] sm:$0xff] }
 0x193   : > { %v921_v1 = vadd.f32 %v920_v57, %v410_v52  ;;  %v1146_v50 = vadd.f32 %v1145_v44, %v630_v39  ;;  %v2124_v52 = vadd.f32 %v2123_v46, %v1608_v41  ;;  %v639_v39 = vld [vmem:[%s2893_s5 + $0xc28] sm:$0xff]  ;;  %v1375_v46 = vld [vmem:[%s2900_s7 + $0x2d8] sm:$0xff] }
 0x194   : > { %v1617_v41 = vld [vmem:[%s2900_s7 + $0xa68] sm:$0xff] }
 0x195   : > { %v922_v9 = vadd.f32 %v921_v1, %v411_v60  ;;  %v1147_v58 = vadd.f32 %v1146_v50, %v631_v47  ;;  %v2125_v60 = vadd.f32 %v2124_v52, %v1609_v49  ;;  %v1878_v1 = vadd.f32 %v1877_v59, %v1367_v54  ;;  %v1618_v47 = vld [vmem:[%s2900_s7 + $0xa70] sm:$0xff]  ;;  %v1376_v54 = vld [vmem:[%s2900_s7 + $0x2e0] sm:$0xff] }
 0x196   : > { %v642_v59 = vld [vmem:[%s2893_s5 + $0xc40] sm:$0xff] }
 0x197   : > { %v923_v17 = vadd.f32 %v922_v9, %v412_v4  ;;  %v1148_v0 = vadd.f32 %v1147_v58, %v632_v53  ;;  %v2126_v2 = vadd.f32 %v2125_v60, %v1610_v55  ;;  %v1369_v4 = vld [vmem:[%s2900_s7 + $0x2a8] sm:$0xff]  ;;  %v1879_v9 = vadd.f32 %v1878_v1, %v1368_v62  ;;  %v641_v53 = vld [vmem:[%s2893_s5 + $0xc38] sm:$0xff]  ;;  %v422_v62 = vld [vmem:[%s2893_s5 + $0x560] sm:$0xff] }
 0x198   : > { %v1619_v55 = vld [vmem:[%s2900_s7 + $0xa78] sm:$0xff]  ;;  %v1377_v60 = vld [vmem:[%s2900_s7 + $0x2e8] sm:$0xff] }
 0x199   : > { %v924_v25 = vadd.f32 %v923_v17, %v413_v12  ;;  %v1149_v8 = vadd.f32 %v1148_v0, %v633_v61  ;;  %v2127_v10 = vadd.f32 %v2126_v2, %v1611_v63  ;;  %v1370_v12 = vld [vmem:[%s2900_s7 + $0x2b0] sm:$0xff]  ;;  %v1880_v15 = vadd.f32 %v1879_v9, %v1369_v4  ;;  %v1620_v61 = vld [vmem:[%s2900_s7 + $0xa80] sm:$0xff] }
 0x19a   : > { %v636_v17 = vld [vmem:[%s2893_s5 + $0xc10] sm:$0xff] }
 0x19b   : > { %v925_v33 = vadd.f32 %v924_v25, %v414_v20  ;;  %v1150_v14 = vadd.f32 %v1149_v8, %v634_v3  ;;  %v2128_v16 = vadd.f32 %v2127_v10, %v1612_v5  ;;  %v419_v20 = vld [vmem:[%s2893_s5 + $0x548] sm:$0xff]  ;;  %v1881_v23 = vadd.f32 %v1880_v15, %v1370_v12  ;;  %v637_v25 = vld [vmem:[%s2893_s5 + $0xc18] sm:$0xff]  ;;  %v1378_v4 = vld [vmem:[%s2900_s7 + $0x2f0] sm:$0xff] }
 0x19c   : > { %v643_v3 = vld [vmem:[%s2893_s5 + $0xc48] sm:$0xff]  ;;  %v644_v9 = vld [vmem:[%s2893_s5 + $0xc50] sm:$0xff]  ;;  %v1379_v10 = vld [vmem:[%s2900_s7 + $0x2f8] sm:$0xff] }
 0x19d   : > { %v926_v43 = vadd.f32 %v925_v33, %v415_v28  ;;  %v1151_v22 = vadd.f32 %v1150_v14, %v635_v11  ;;  %v2129_v24 = vadd.f32 %v2128_v16, %v1613_v13  ;;  %v1882_v29 = vadd.f32 %v1881_v23, %v1371_v18  ;;  %v1616_v33 = vld [vmem:[%s2900_s7 + $0xa60] sm:$0xff]  ;;  %v1621_v5 = vld [vmem:[%s2900_s7 + $0xa88] sm:$0xff]  ;;  %v1622_v11 = vld [vmem:[%s2900_s7 + $0xa90] sm:$0xff] }
 0x19e   : > { %v423_v12 = vld [vmem:[%s2893_s5 + $0x568] sm:$0xff]  ;;  %v1380_v18 = vld [vmem:[%s2900_s7 + $0x300] sm:$0xff] }
 0x19f   : > { %v927_v57 = vadd.f32 %v926_v43, %v416_v42  ;;  %v1152_v28 = vadd.f32 %v1151_v22, %v636_v17  ;;  %v2130_v30 = vadd.f32 %v2129_v24, %v1614_v19  ;;  %v1883_v37 = vadd.f32 %v1882_v29, %v1372_v26  ;;  %v645_v17 = vld [vmem:[%s2893_s5 + $0xc58] sm:$0xff]  ;;  %v646_v23 = vld [vmem:[%s2893_s5 + $0xc60] sm:$0xff]  ;;  %v1381_v24 = vld [vmem:[%s2900_s7 + $0x308] sm:$0xff] }
 0x1a0   : > { %v1623_v19 = vld [vmem:[%s2900_s7 + $0xa98] sm:$0xff]  ;;  %v424_v26 = vld [vmem:[%s2893_s5 + $0x570] sm:$0xff] }
 0x1a1   : > { %v928_v7 = vadd.f32 %v927_v57, %v417_v56  ;;  %v1153_v36 = vadd.f32 %v1152_v28, %v637_v25  ;;  %v2131_v38 = vadd.f32 %v2130_v30, %v1615_v27  ;;  %v1884_v43 = vadd.f32 %v1883_v37, %v1373_v32  ;;  %v1624_v25 = vld [vmem:[%s2900_s7 + $0xaa0] sm:$0xff]  ;;  %v1382_v32 = vld [vmem:[%s2900_s7 + $0x310] sm:$0xff] }
 0x1a2   : > { %v648_v37 = vld [vmem:[%s2893_s5 + $0xc70] sm:$0xff] }
 0x1a3   : > { %v929_v21 = vadd.f32 %v928_v7, %v418_v6  ;;  %v1154_v42 = vadd.f32 %v1153_v36, %v638_v31  ;;  %v2132_v44 = vadd.f32 %v2131_v38, %v1616_v33  ;;  %v1885_v51 = vadd.f32 %v1884_v43, %v1374_v40  ;;  %v647_v31 = vld [vmem:[%s2893_s5 + $0xc68] sm:$0xff]  ;;  %v1383_v38 = vld [vmem:[%s2900_s7 + $0x318] sm:$0xff] }
 0x1a4   : > { %v1625_v33 = vld [vmem:[%s2900_s7 + $0xaa8] sm:$0xff]  ;;  %v425_v40 = vld [vmem:[%s2893_s5 + $0x578] sm:$0xff] }
 0x1a5   : > { %v930_v35 = vadd.f32 %v929_v21, %v419_v20  ;;  %v1155_v50 = vadd.f32 %v1154_v42, %v639_v39  ;;  %v2133_v52 = vadd.f32 %v2132_v44, %v1617_v41  ;;  %v1886_v57 = vadd.f32 %v1885_v51, %v1375_v46  ;;  %v1626_v39 = vld [vmem:[%s2900_s7 + $0xab0] sm:$0xff]  ;;  %v1384_v46 = vld [vmem:[%s2900_s7 + $0x320] sm:$0xff] }
 0x1a6   : > { %v650_v51 = vld [vmem:[%s2893_s5 + $0xc80] sm:$0xff] }
 0x1a7   : > { %v931_v49 = vadd.f32 %v930_v35, %v420_v34  ;;  %v1156_v56 = vadd.f32 %v1155_v50, %v640_v45  ;;  %v2134_v58 = vadd.f32 %v2133_v52, %v1618_v47  ;;  %v1887_v1 = vadd.f32 %v1886_v57, %v1376_v54  ;;  %v649_v45 = vld [vmem:[%s2893_s5 + $0xc78] sm:$0xff]  ;;  %v1385_v52 = vld [vmem:[%s2900_s7 + $0x328] sm:$0xff]  ;;  %v426_v54 = vld [vmem:[%s2893_s5 + $0x580] sm:$0xff] }
 0x1a8   : > { %v1627_v47 = vld [vmem:[%s2900_s7 + $0xab8] sm:$0xff] }
 0x1a9   : > { %v932_v63 = vadd.f32 %v931_v49, %v421_v48  ;;  %v1157_v0 = vadd.f32 %v1156_v56, %v641_v53  ;;  %v2135_v2 = vadd.f32 %v2134_v58, %v1619_v55  ;;  %v1888_v7 = vadd.f32 %v1887_v1, %v1377_v60  ;;  %v1628_v53 = vld [vmem:[%s2900_s7 + $0xac0] sm:$0xff]  ;;  %v1386_v60 = vld [vmem:[%s2900_s7 + $0x330] sm:$0xff] }
 0x1aa   : > { %v652_v1 = vld [vmem:[%s2893_s5 + $0xc90] sm:$0xff] }
 0x1ab   : > { %v1158_v6 = vadd.f32 %v1157_v0, %v642_v59  ;;  %v2136_v8 = vadd.f32 %v2135_v2, %v1620_v61  ;;  %v933_v13 = vadd.f32 %v932_v63, %v422_v62  ;;  %v1889_v15 = vadd.f32 %v1888_v7, %v1378_v4  ;;  %v651_v59 = vld [vmem:[%s2893_s5 + $0xc88] sm:$0xff]  ;;  %v1387_v2 = vld [vmem:[%s2900_s7 + $0x338] sm:$0xff] }
 0x1ac   : > { %v1629_v61 = vld [vmem:[%s2900_s7 + $0xac8] sm:$0xff] }
 0x1ad   : > { %v1159_v14 = vadd.f32 %v1158_v6, %v643_v3  ;;  %v2137_v16 = vadd.f32 %v2136_v8, %v1621_v5  ;;  %v1890_v21 = vadd.f32 %v1889_v15, %v1379_v10  ;;  %v934_v27 = vadd.f32 %v933_v13, %v423_v12  ;;  %v1630_v3 = vld [vmem:[%s2900_s7 + $0xad0] sm:$0xff]  ;;  %v427_v4 = vld [vmem:[%s2893_s5 + $0x588] sm:$0xff]  ;;  %v1388_v10 = vld [vmem:[%s2900_s7 + $0x340] sm:$0xff] }
 0x1ae   : > { %v654_v15 = vld [vmem:[%s2893_s5 + $0xca0] sm:$0xff] }
 0x1af   : > { %v1160_v20 = vadd.f32 %v1159_v14, %v644_v9  ;;  %v2138_v22 = vadd.f32 %v2137_v16, %v1622_v11  ;;  %v1891_v29 = vadd.f32 %v1890_v21, %v1380_v18  ;;  %v935_v41 = vadd.f32 %v934_v27, %v424_v26  ;;  %v653_v9 = vld [vmem:[%s2893_s5 + $0xc98] sm:$0xff]  ;;  %v1389_v16 = vld [vmem:[%s2900_s7 + $0x348] sm:$0xff]  ;;  %v428_v18 = vld [vmem:[%s2893_s5 + $0x590] sm:$0xff] }
 0x1b0   : > { %v1631_v11 = vld [vmem:[%s2900_s7 + $0xad8] sm:$0xff] }
 0x1b1   : > { %v1161_v28 = vadd.f32 %v1160_v20, %v645_v17  ;;  %v2139_v30 = vadd.f32 %v2138_v22, %v1623_v19  ;;  %v1892_v35 = vadd.f32 %v1891_v29, %v1381_v24  ;;  %v936_v55 = vadd.f32 %v935_v41, %v425_v40  ;;  %v1632_v17 = vld [vmem:[%s2900_s7 + $0xae0] sm:$0xff]  ;;  %v1390_v24 = vld [vmem:[%s2900_s7 + $0x350] sm:$0xff] }
 0x1b2   : > { %v656_v29 = vld [vmem:[%s2893_s5 + $0xcb0] sm:$0xff] }
 0x1b3   : > { %v1162_v34 = vadd.f32 %v1161_v28, %v646_v23  ;;  %v2140_v36 = vadd.f32 %v2139_v30, %v1624_v25  ;;  %v1893_v43 = vadd.f32 %v1892_v35, %v1382_v32  ;;  %v937_v5 = vadd.f32 %v936_v55, %v426_v54  ;;  %v655_v23 = vld [vmem:[%s2893_s5 + $0xca8] sm:$0xff]  ;;  %v1391_v30 = vld [vmem:[%s2900_s7 + $0x358] sm:$0xff] }
 0x1b4   : > { %v1633_v25 = vld [vmem:[%s2900_s7 + $0xae8] sm:$0xff]  ;;  %v429_v32 = vld [vmem:[%s2893_s5 + $0x598] sm:$0xff] }
 0x1b5   : > { %v1163_v42 = vadd.f32 %v1162_v34, %v647_v31  ;;  %v2141_v44 = vadd.f32 %v2140_v36, %v1625_v33  ;;  %v1894_v49 = vadd.f32 %v1893_v43, %v1383_v38  ;;  %v938_v19 = vadd.f32 %v937_v5, %v427_v4  ;;  %v1634_v31 = vld [vmem:[%s2900_s7 + $0xaf0] sm:$0xff]  ;;  %v1392_v38 = vld [vmem:[%s2900_s7 + $0x360] sm:$0xff] }
 0x1b6   : > { %v658_v43 = vld [vmem:[%s2893_s5 + $0xcc0] sm:$0xff] }
 0x1b7   : > { %v1164_v48 = vadd.f32 %v1163_v42, %v648_v37  ;;  %v2142_v50 = vadd.f32 %v2141_v44, %v1626_v39  ;;  %v1895_v57 = vadd.f32 %v1894_v49, %v1384_v46  ;;  %v939_v33 = vadd.f32 %v938_v19, %v428_v18  ;;  %v657_v37 = vld [vmem:[%s2893_s5 + $0xcb8] sm:$0xff]  ;;  %v1393_v44 = vld [vmem:[%s2900_s7 + $0x368] sm:$0xff]  ;;  %v430_v46 = vld [vmem:[%s2893_s5 + $0x5a0] sm:$0xff] }
 0x1b8   : > { %v1635_v39 = vld [vmem:[%s2900_s7 + $0xaf8] sm:$0xff] }
 0x1b9   : > { %v1165_v56 = vadd.f32 %v1164_v48, %v649_v45  ;;  %v2143_v58 = vadd.f32 %v2142_v50, %v1627_v47  ;;  %v1896_v63 = vadd.f32 %v1895_v57, %v1385_v52  ;;  %v1636_v45 = vld [vmem:[%s2900_s7 + $0xb00] sm:$0xff]  ;;  %v940_v47 = vadd.f32 %v939_v33, %v429_v32  ;;  %v1394_v52 = vld [vmem:[%s2900_s7 + $0x370] sm:$0xff] }
 0x1ba   : > { %v660_v57 = vld [vmem:[%s2893_s5 + $0xcd0] sm:$0xff] }
 0x1bb   : > { %v1166_v62 = vadd.f32 %v1165_v56, %v650_v51  ;;  %v2144_v0 = vadd.f32 %v2143_v58, %v1628_v53  ;;  %v1897_v7 = vadd.f32 %v1896_v63, %v1386_v60  ;;  %v659_v51 = vld [vmem:[%s2893_s5 + $0xcc8] sm:$0xff]  ;;  %v1395_v58 = vld [vmem:[%s2900_s7 + $0x378] sm:$0xff] }
 0x1bc   : > { %v1637_v53 = vld [vmem:[%s2900_s7 + $0xb08] sm:$0xff] }
 0x1bd   : > { %v1167_v6 = vadd.f32 %v1166_v62, %v651_v59  ;;  %v2145_v8 = vadd.f32 %v2144_v0, %v1629_v61  ;;  %v1898_v13 = vadd.f32 %v1897_v7, %v1387_v2  ;;  %v1638_v59 = vld [vmem:[%s2900_s7 + $0xb10] sm:$0xff]  ;;  %v431_v60 = vld [vmem:[%s2893_s5 + $0x5a8] sm:$0xff]  ;;  %v941_v61 = vadd.f32 %v940_v47, %v430_v46  ;;  %v1396_v2 = vld [vmem:[%s2900_s7 + $0x380] sm:$0xff] }
 0x1be   : > { %v662_v7 = vld [vmem:[%s2893_s5 + $0xce0] sm:$0xff] }
 0x1bf   : > { %v1168_v12 = vadd.f32 %v1167_v6, %v652_v1  ;;  %v2146_v14 = vadd.f32 %v2145_v8, %v1630_v3  ;;  %v1899_v21 = vadd.f32 %v1898_v13, %v1388_v10  ;;  %v661_v1 = vld [vmem:[%s2893_s5 + $0xcd8] sm:$0xff]  ;;  %v1397_v8 = vld [vmem:[%s2900_s7 + $0x388] sm:$0xff]  ;;  %v432_v10 = vld [vmem:[%s2893_s5 + $0x5b0] sm:$0xff] }
 0x1c0   : > { %v1639_v3 = vld [vmem:[%s2900_s7 + $0xb18] sm:$0xff] }
 0x1c1   : > { %v1169_v20 = vadd.f32 %v1168_v12, %v653_v9  ;;  %v2147_v22 = vadd.f32 %v2146_v14, %v1631_v11  ;;  %v1900_v27 = vadd.f32 %v1899_v21, %v1389_v16  ;;  %v1640_v9 = vld [vmem:[%s2900_s7 + $0xb20] sm:$0xff]  ;;  %v942_v11 = vadd.f32 %v941_v61, %v431_v60  ;;  %v1398_v16 = vld [vmem:[%s2900_s7 + $0x390] sm:$0xff] }
 0x1c2   : > { %v664_v21 = vld [vmem:[%s2893_s5 + $0xcf0] sm:$0xff] }
 0x1c3   : > { %v1170_v26 = vadd.f32 %v1169_v20, %v654_v15  ;;  %v2148_v28 = vadd.f32 %v2147_v22, %v1632_v17  ;;  %v1901_v35 = vadd.f32 %v1900_v27, %v1390_v24  ;;  %v663_v15 = vld [vmem:[%s2893_s5 + $0xce8] sm:$0xff]  ;;  %v1399_v22 = vld [vmem:[%s2900_s7 + $0x398] sm:$0xff] }
 0x1c4   : > { %v1641_v17 = vld [vmem:[%s2900_s7 + $0xb28] sm:$0xff]  ;;  %v433_v24 = vld [vmem:[%s2893_s5 + $0x5b8] sm:$0xff] }
 0x1c5   : > { %v1171_v34 = vadd.f32 %v1170_v26, %v655_v23  ;;  %v2149_v36 = vadd.f32 %v2148_v28, %v1633_v25  ;;  %v1902_v41 = vadd.f32 %v1901_v35, %v1391_v30  ;;  %v1642_v23 = vld [vmem:[%s2900_s7 + $0xb30] sm:$0xff]  ;;  %v943_v25 = vadd.f32 %v942_v11, %v432_v10  ;;  %v1400_v30 = vld [vmem:[%s2900_s7 + $0x3a0] sm:$0xff] }
 0x1c6   : > { %v666_v35 = vld [vmem:[%s2893_s5 + $0xd00] sm:$0xff] }
 0x1c7   : > { %v1172_v40 = vadd.f32 %v1171_v34, %v656_v29  ;;  %v2150_v42 = vadd.f32 %v2149_v36, %v1634_v31  ;;  %v1903_v49 = vadd.f32 %v1902_v41, %v1392_v38  ;;  %v665_v29 = vld [vmem:[%s2893_s5 + $0xcf8] sm:$0xff]  ;;  %v1401_v36 = vld [vmem:[%s2900_s7 + $0x3a8] sm:$0xff]  ;;  %v434_v38 = vld [vmem:[%s2893_s5 + $0x5c0] sm:$0xff] }
 0x1c8   : > { %v1643_v31 = vld [vmem:[%s2900_s7 + $0xb38] sm:$0xff] }
 0x1c9   : > { %v1173_v48 = vadd.f32 %v1172_v40, %v657_v37  ;;  %v2151_v50 = vadd.f32 %v2150_v42, %v1635_v39  ;;  %v1904_v55 = vadd.f32 %v1903_v49, %v1393_v44  ;;  %v1644_v37 = vld [vmem:[%s2900_s7 + $0xb40] sm:$0xff]  ;;  %v944_v39 = vadd.f32 %v943_v25, %v433_v24  ;;  %v1402_v44 = vld [vmem:[%s2900_s7 + $0x3b0] sm:$0xff] }
 0x1ca   : > { %v668_v49 = vld [vmem:[%s2893_s5 + $0xd10] sm:$0xff] }
 0x1cb   : > { %v1174_v54 = vadd.f32 %v1173_v48, %v658_v43  ;;  %v2152_v56 = vadd.f32 %v2151_v50, %v1636_v45  ;;  %v1905_v63 = vadd.f32 %v1904_v55, %v1394_v52  ;;  %v667_v43 = vld [vmem:[%s2893_s5 + $0xd08] sm:$0xff]  ;;  %v1403_v50 = vld [vmem:[%s2900_s7 + $0x3b8] sm:$0xff] }
 0x1cc   : > { %v1645_v45 = vld [vmem:[%s2900_s7 + $0xb48] sm:$0xff] }
 0x1cd   : > { %v1175_v62 = vadd.f32 %v1174_v54, %v659_v51  ;;  %v2153_v0 = vadd.f32 %v2152_v56, %v1637_v53  ;;  %v1906_v5 = vadd.f32 %v1905_v63, %v1395_v58  ;;  %v1646_v51 = vld [vmem:[%s2900_s7 + $0xb50] sm:$0xff]  ;;  %v435_v52 = vld [vmem:[%s2893_s5 + $0x5c8] sm:$0xff]  ;;  %v945_v53 = vadd.f32 %v944_v39, %v434_v38  ;;  %v1404_v58 = vld [vmem:[%s2900_s7 + $0x3c0] sm:$0xff] }
 0x1ce   : > { %v670_v63 = vld [vmem:[%s2893_s5 + $0xd20] sm:$0xff] }
 0x1cf   : > { %v1176_v4 = vadd.f32 %v1175_v62, %v660_v57  ;;  %v2154_v6 = vadd.f32 %v2153_v0, %v1638_v59  ;;  %v1907_v13 = vadd.f32 %v1906_v5, %v1396_v2  ;;  %v669_v57 = vld [vmem:[%s2893_s5 + $0xd18] sm:$0xff]  ;;  %v1405_v0 = vld [vmem:[%s2900_s7 + $0x3c8] sm:$0xff]  ;;  %v436_v2 = vld [vmem:[%s2893_s5 + $0x5d0] sm:$0xff] }
 0x1d0   : > { %v1647_v59 = vld [vmem:[%s2900_s7 + $0xb58] sm:$0xff] }
 0x1d1   : > { %v1177_v12 = vadd.f32 %v1176_v4, %v661_v1  ;;  %v2155_v14 = vadd.f32 %v2154_v6, %v1639_v3  ;;  %v1908_v19 = vadd.f32 %v1907_v13, %v1397_v8  ;;  %v1648_v1 = vld [vmem:[%s2900_s7 + $0xb60] sm:$0xff]  ;;  %v946_v3 = vadd.f32 %v945_v53, %v435_v52  ;;  %v1406_v8 = vld [vmem:[%s2900_s7 + $0x3d0] sm:$0xff] }
 0x1d2   : > { %v672_v13 = vld [vmem:[%s2893_s5 + $0xd30] sm:$0xff] }
 0x1d3   : > { %v1178_v18 = vadd.f32 %v1177_v12, %v662_v7  ;;  %v2156_v20 = vadd.f32 %v2155_v14, %v1640_v9  ;;  %v1909_v27 = vadd.f32 %v1908_v19, %v1398_v16  ;;  %v671_v7 = vld [vmem:[%s2893_s5 + $0xd28] sm:$0xff]  ;;  %v1407_v14 = vld [vmem:[%s2900_s7 + $0x3d8] sm:$0xff] }
 0x1d4   : > { %v1649_v9 = vld [vmem:[%s2900_s7 + $0xb68] sm:$0xff]  ;;  %v437_v16 = vld [vmem:[%s2893_s5 + $0x5d8] sm:$0xff] }
 0x1d5   : > { %v1179_v26 = vadd.f32 %v1178_v18, %v663_v15  ;;  %v2157_v28 = vadd.f32 %v2156_v20, %v1641_v17  ;;  %v1910_v33 = vadd.f32 %v1909_v27, %v1399_v22  ;;  %v1650_v15 = vld [vmem:[%s2900_s7 + $0xb70] sm:$0xff]  ;;  %v947_v17 = vadd.f32 %v946_v3, %v436_v2  ;;  %v1408_v22 = vld [vmem:[%s2900_s7 + $0x3e0] sm:$0xff] }
 0x1d6   : > { %v674_v27 = vld [vmem:[%s2893_s5 + $0xd40] sm:$0xff] }
 0x1d7   : > { %v1180_v32 = vadd.f32 %v1179_v26, %v664_v21  ;;  %v2158_v34 = vadd.f32 %v2157_v28, %v1642_v23  ;;  %v1911_v41 = vadd.f32 %v1910_v33, %v1400_v30  ;;  %v673_v21 = vld [vmem:[%s2893_s5 + $0xd38] sm:$0xff]  ;;  %v1409_v28 = vld [vmem:[%s2900_s7 + $0x3e8] sm:$0xff]  ;;  %v438_v30 = vld [vmem:[%s2893_s5 + $0x5e0] sm:$0xff] }
 0x1d8   : > { %v1651_v23 = vld [vmem:[%s2900_s7 + $0xb78] sm:$0xff] }
 0x1d9   : > { %v1181_v40 = vadd.f32 %v1180_v32, %v665_v29  ;;  %v2159_v42 = vadd.f32 %v2158_v34, %v1643_v31  ;;  %v1912_v47 = vadd.f32 %v1911_v41, %v1401_v36  ;;  %v1652_v29 = vld [vmem:[%s2900_s7 + $0xb80] sm:$0xff]  ;;  %v948_v31 = vadd.f32 %v947_v17, %v437_v16  ;;  %v1410_v36 = vld [vmem:[%s2900_s7 + $0x3f0] sm:$0xff] }
 0x1da   : > { %v676_v41 = vld [vmem:[%s2893_s5 + $0xd50] sm:$0xff] }
 0x1db   : > { %v1182_v46 = vadd.f32 %v1181_v40, %v666_v35  ;;  %v2160_v48 = vadd.f32 %v2159_v42, %v1644_v37  ;;  %v1913_v55 = vadd.f32 %v1912_v47, %v1402_v44  ;;  %v675_v35 = vld [vmem:[%s2893_s5 + $0xd48] sm:$0xff]  ;;  %v1411_v42 = vld [vmem:[%s2900_s7 + $0x3f8] sm:$0xff] }
 0x1dc   : > { %v1653_v37 = vld [vmem:[%s2900_s7 + $0xb88] sm:$0xff] }
 0x1dd   : > { %v1183_v54 = vadd.f32 %v1182_v46, %v667_v43  ;;  %v2161_v56 = vadd.f32 %v2160_v48, %v1645_v45  ;;  %v1914_v61 = vadd.f32 %v1913_v55, %v1403_v50  ;;  %v1654_v43 = vld [vmem:[%s2900_s7 + $0xb90] sm:$0xff]  ;;  %v439_v44 = vld [vmem:[%s2893_s5 + $0x5e8] sm:$0xff]  ;;  %v949_v45 = vadd.f32 %v948_v31, %v438_v30  ;;  %v1412_v50 = vld [vmem:[%s2900_s7 + $0x400] sm:$0xff] }
 0x1de   : > { %v678_v55 = vld [vmem:[%s2893_s5 + $0xd60] sm:$0xff] }
 0x1df   : > { %v1184_v60 = vadd.f32 %v1183_v54, %v668_v49  ;;  %v2162_v62 = vadd.f32 %v2161_v56, %v1646_v51  ;;  %v1915_v5 = vadd.f32 %v1914_v61, %v1404_v58  ;;  %v677_v49 = vld [vmem:[%s2893_s5 + $0xd58] sm:$0xff]  ;;  %v1413_v56 = vld [vmem:[%s2900_s7 + $0x408] sm:$0xff]  ;;  %v440_v58 = vld [vmem:[%s2893_s5 + $0x5f0] sm:$0xff] }
 0x1e0   : > { %v1655_v51 = vld [vmem:[%s2900_s7 + $0xb98] sm:$0xff] }
 0x1e1   : > { %v1185_v4 = vadd.f32 %v1184_v60, %v669_v57  ;;  %v2163_v6 = vadd.f32 %v2162_v62, %v1647_v59  ;;  %v1916_v11 = vadd.f32 %v1915_v5, %v1405_v0  ;;  %v1656_v57 = vld [vmem:[%s2900_s7 + $0xba0] sm:$0xff]  ;;  %v950_v59 = vadd.f32 %v949_v45, %v439_v44  ;;  %v1414_v0 = vld [vmem:[%s2900_s7 + $0x410] sm:$0xff] }
 0x1e2   : > { %v680_v5 = vld [vmem:[%s2893_s5 + $0xd70] sm:$0xff] }
 0x1e3   : > { %v1186_v10 = vadd.f32 %v1185_v4, %v670_v63  ;;  %v2164_v12 = vadd.f32 %v2163_v6, %v1648_v1  ;;  %v1917_v19 = vadd.f32 %v1916_v11, %v1406_v8  ;;  %v679_v63 = vld [vmem:[%s2893_s5 + $0xd68] sm:$0xff]  ;;  %v1415_v6 = vld [vmem:[%s2900_s7 + $0x418] sm:$0xff] }
 0x1e4   : > { %v1657_v1 = vld [vmem:[%s2900_s7 + $0xba8] sm:$0xff]  ;;  %v441_v8 = vld [vmem:[%s2893_s5 + $0x5f8] sm:$0xff] }
 0x1e5   : > { %v1187_v18 = vadd.f32 %v1186_v10, %v671_v7  ;;  %v2165_v20 = vadd.f32 %v2164_v12, %v1649_v9  ;;  %v1918_v25 = vadd.f32 %v1917_v19, %v1407_v14  ;;  %v1658_v7 = vld [vmem:[%s2900_s7 + $0xbb0] sm:$0xff]  ;;  %v951_v9 = vadd.f32 %v950_v59, %v440_v58  ;;  %v1416_v14 = vld [vmem:[%s2900_s7 + $0x420] sm:$0xff] }
 0x1e6   : > { %v682_v19 = vld [vmem:[%s2893_s5 + $0xd80] sm:$0xff] }
 0x1e7   : > { %v1188_v24 = vadd.f32 %v1187_v18, %v672_v13  ;;  %v2166_v26 = vadd.f32 %v2165_v20, %v1650_v15  ;;  %v1919_v33 = vadd.f32 %v1918_v25, %v1408_v22  ;;  %v681_v13 = vld [vmem:[%s2893_s5 + $0xd78] sm:$0xff]  ;;  %v1417_v20 = vld [vmem:[%s2900_s7 + $0x428] sm:$0xff]  ;;  %v442_v22 = vld [vmem:[%s2893_s5 + $0x600] sm:$0xff] }
 0x1e8   : > { %v1659_v15 = vld [vmem:[%s2900_s7 + $0xbb8] sm:$0xff] }
 0x1e9   : > { %v1189_v32 = vadd.f32 %v1188_v24, %v673_v21  ;;  %v2167_v34 = vadd.f32 %v2166_v26, %v1651_v23  ;;  %v1920_v39 = vadd.f32 %v1919_v33, %v1409_v28  ;;  %v1660_v21 = vld [vmem:[%s2900_s7 + $0xbc0] sm:$0xff]  ;;  %v952_v23 = vadd.f32 %v951_v9, %v441_v8  ;;  %v1418_v28 = vld [vmem:[%s2900_s7 + $0x430] sm:$0xff] }
 0x1ea   : > { %v684_v33 = vld [vmem:[%s2893_s5 + $0xd90] sm:$0xff] }
 0x1eb   : > { %v1190_v38 = vadd.f32 %v1189_v32, %v674_v27  ;;  %v2168_v40 = vadd.f32 %v2167_v34, %v1652_v29  ;;  %v1921_v47 = vadd.f32 %v1920_v39, %v1410_v36  ;;  %v683_v27 = vld [vmem:[%s2893_s5 + $0xd88] sm:$0xff]  ;;  %v1419_v34 = vld [vmem:[%s2900_s7 + $0x438] sm:$0xff] }
 0x1ec   : > { %v1661_v29 = vld [vmem:[%s2900_s7 + $0xbc8] sm:$0xff] }
 0x1ed   : > { %v1191_v46 = vadd.f32 %v1190_v38, %v675_v35  ;;  %v2169_v48 = vadd.f32 %v2168_v40, %v1653_v37  ;;  %v1922_v53 = vadd.f32 %v1921_v47, %v1411_v42  ;;  %v1662_v35 = vld [vmem:[%s2900_s7 + $0xbd0] sm:$0xff]  ;;  %v443_v36 = vld [vmem:[%s2893_s5 + $0x608] sm:$0xff]  ;;  %v953_v37 = vadd.f32 %v952_v23, %v442_v22  ;;  %v1420_v42 = vld [vmem:[%s2900_s7 + $0x440] sm:$0xff] }
 0x1ee   : > { %v686_v47 = vld [vmem:[%s2893_s5 + $0xda0] sm:$0xff] }
 0x1ef   : > { %v1192_v52 = vadd.f32 %v1191_v46, %v676_v41  ;;  %v2170_v54 = vadd.f32 %v2169_v48, %v1654_v43  ;;  %v1923_v61 = vadd.f32 %v1922_v53, %v1412_v50  ;;  %v685_v41 = vld [vmem:[%s2893_s5 + $0xd98] sm:$0xff]  ;;  %v1421_v48 = vld [vmem:[%s2900_s7 + $0x448] sm:$0xff]  ;;  %v444_v50 = vld [vmem:[%s2893_s5 + $0x610] sm:$0xff] }
 0x1f0   : > { %v1663_v43 = vld [vmem:[%s2900_s7 + $0xbd8] sm:$0xff] }
 0x1f1   : > { %v1193_v60 = vadd.f32 %v1192_v52, %v677_v49  ;;  %v2171_v62 = vadd.f32 %v2170_v54, %v1655_v51  ;;  %v1924_v3 = vadd.f32 %v1923_v61, %v1413_v56  ;;  %v1664_v49 = vld [vmem:[%s2900_s7 + $0xbe0] sm:$0xff]  ;;  %v954_v51 = vadd.f32 %v953_v37, %v443_v36  ;;  %v1422_v56 = vld [vmem:[%s2900_s7 + $0x450] sm:$0xff] }
 0x1f2   : > { %v688_v61 = vld [vmem:[%s2893_s5 + $0xdb0] sm:$0xff] }
 0x1f3   : > { %v1194_v2 = vadd.f32 %v1193_v60, %v678_v55  ;;  %v2172_v4 = vadd.f32 %v2171_v62, %v1656_v57  ;;  %v1925_v11 = vadd.f32 %v1924_v3, %v1414_v0  ;;  %v687_v55 = vld [vmem:[%s2893_s5 + $0xda8] sm:$0xff]  ;;  %v1423_v62 = vld [vmem:[%s2900_s7 + $0x458] sm:$0xff] }
 0x1f4   : > { %v1665_v57 = vld [vmem:[%s2900_s7 + $0xbe8] sm:$0xff]  ;;  %v445_v0 = vld [vmem:[%s2893_s5 + $0x618] sm:$0xff] }
 0x1f5   : > { %v1195_v10 = vadd.f32 %v1194_v2, %v679_v63  ;;  %v2173_v12 = vadd.f32 %v2172_v4, %v1657_v1  ;;  %v1926_v17 = vadd.f32 %v1925_v11, %v1415_v6  ;;  %v1666_v63 = vld [vmem:[%s2900_s7 + $0xbf0] sm:$0xff]  ;;  %v955_v1 = vadd.f32 %v954_v51, %v444_v50  ;;  %v1424_v6 = vld [vmem:[%s2900_s7 + $0x460] sm:$0xff] }
 0x1f6   : > { %v690_v11 = vld [vmem:[%s2893_s5 + $0xdc0] sm:$0xff] }
 0x1f7   : > { %v1196_v16 = vadd.f32 %v1195_v10, %v680_v5  ;;  %v2174_v18 = vadd.f32 %v2173_v12, %v1658_v7  ;;  %v1927_v25 = vadd.f32 %v1926_v17, %v1416_v14  ;;  %v689_v5 = vld [vmem:[%s2893_s5 + $0xdb8] sm:$0xff]  ;;  %v1425_v12 = vld [vmem:[%s2900_s7 + $0x468] sm:$0xff]  ;;  %v446_v14 = vld [vmem:[%s2893_s5 + $0x620] sm:$0xff] }
 0x1f8   : > { %v1667_v7 = vld [vmem:[%s2900_s7 + $0xbf8] sm:$0xff] }
 0x1f9   : > { %v1197_v24 = vadd.f32 %v1196_v16, %v681_v13  ;;  %v2175_v26 = vadd.f32 %v2174_v18, %v1659_v15  ;;  %v1928_v31 = vadd.f32 %v1927_v25, %v1417_v20  ;;  %v1668_v13 = vld [vmem:[%s2900_s7 + $0xc00] sm:$0xff]  ;;  %v956_v15 = vadd.f32 %v955_v1, %v445_v0  ;;  %v1426_v20 = vld [vmem:[%s2900_s7 + $0x470] sm:$0xff] }
 0x1fa   : > { %v692_v25 = vld [vmem:[%s2893_s5 + $0xdd0] sm:$0xff] }
 0x1fb   : > { %v1198_v30 = vadd.f32 %v1197_v24, %v682_v19  ;;  %v2176_v32 = vadd.f32 %v2175_v26, %v1660_v21  ;;  %v1929_v39 = vadd.f32 %v1928_v31, %v1418_v28  ;;  %v691_v19 = vld [vmem:[%s2893_s5 + $0xdc8] sm:$0xff]  ;;  %v1427_v26 = vld [vmem:[%s2900_s7 + $0x478] sm:$0xff] }
 0x1fc   : > { %v1669_v21 = vld [vmem:[%s2900_s7 + $0xc08] sm:$0xff] }
 0x1fd   : > { %v1199_v38 = vadd.f32 %v1198_v30, %v683_v27  ;;  %v2177_v40 = vadd.f32 %v2176_v32, %v1661_v29  ;;  %v1930_v45 = vadd.f32 %v1929_v39, %v1419_v34  ;;  %v1670_v27 = vld [vmem:[%s2900_s7 + $0xc10] sm:$0xff]  ;;  %v447_v28 = vld [vmem:[%s2893_s5 + $0x628] sm:$0xff]  ;;  %v957_v29 = vadd.f32 %v956_v15, %v446_v14  ;;  %v1428_v34 = vld [vmem:[%s2900_s7 + $0x480] sm:$0xff] }
 0x1fe   : > { %v694_v39 = vld [vmem:[%s2893_s5 + $0xde0] sm:$0xff] }
 0x1ff   : > { %v1200_v44 = vadd.f32 %v1199_v38, %v684_v33  ;;  %v2178_v46 = vadd.f32 %v2177_v40, %v1662_v35  ;;  %v1931_v53 = vadd.f32 %v1930_v45, %v1420_v42  ;;  %v693_v33 = vld [vmem:[%s2893_s5 + $0xdd8] sm:$0xff]  ;;  %v1429_v40 = vld [vmem:[%s2900_s7 + $0x488] sm:$0xff]  ;;  %v448_v42 = vld [vmem:[%s2893_s5 + $0x630] sm:$0xff] }
 0x200   : > { %v1671_v35 = vld [vmem:[%s2900_s7 + $0xc18] sm:$0xff] }
 0x201   : > { %v1201_v52 = vadd.f32 %v1200_v44, %v685_v41  ;;  %v2179_v54 = vadd.f32 %v2178_v46, %v1663_v43  ;;  %v1932_v59 = vadd.f32 %v1931_v53, %v1421_v48  ;;  %v1672_v41 = vld [vmem:[%s2900_s7 + $0xc20] sm:$0xff]  ;;  %v958_v43 = vadd.f32 %v957_v29, %v447_v28  ;;  %v1430_v48 = vld [vmem:[%s2900_s7 + $0x490] sm:$0xff] }
 0x202   : > { %v696_v53 = vld [vmem:[%s2893_s5 + $0xdf0] sm:$0xff] }
 0x203   : > { %v1202_v58 = vadd.f32 %v1201_v52, %v686_v47  ;;  %v2180_v60 = vadd.f32 %v2179_v54, %v1664_v49  ;;  %v1933_v3 = vadd.f32 %v1932_v59, %v1422_v56  ;;  %v695_v47 = vld [vmem:[%s2893_s5 + $0xde8] sm:$0xff]  ;;  %v1431_v54 = vld [vmem:[%s2900_s7 + $0x498] sm:$0xff] }
 0x204   : > { %v1673_v49 = vld [vmem:[%s2900_s7 + $0xc28] sm:$0xff]  ;;  %v449_v56 = vld [vmem:[%s2893_s5 + $0x638] sm:$0xff] }
 0x205   : > { %v1203_v2 = vadd.f32 %v1202_v58, %v687_v55  ;;  %v2181_v4 = vadd.f32 %v2180_v60, %v1665_v57  ;;  %v1934_v9 = vadd.f32 %v1933_v3, %v1423_v62  ;;  %v1674_v55 = vld [vmem:[%s2900_s7 + $0xc30] sm:$0xff]  ;;  %v959_v57 = vadd.f32 %v958_v43, %v448_v42  ;;  %v1432_v62 = vld [vmem:[%s2900_s7 + $0x4a0] sm:$0xff] }
 0x206   : > { %v698_v3 = vld [vmem:[%s2893_s5 + $0xe00] sm:$0xff] }
 0x207   : > { %v1204_v8 = vadd.f32 %v1203_v2, %v688_v61  ;;  %v2182_v10 = vadd.f32 %v2181_v4, %v1666_v63  ;;  %v1935_v17 = vadd.f32 %v1934_v9, %v1424_v6  ;;  %v697_v61 = vld [vmem:[%s2893_s5 + $0xdf8] sm:$0xff]  ;;  %v1433_v4 = vld [vmem:[%s2900_s7 + $0x4a8] sm:$0xff]  ;;  %v450_v6 = vld [vmem:[%s2893_s5 + $0x640] sm:$0xff] }
 0x208   : > { %v1675_v63 = vld [vmem:[%s2900_s7 + $0xc38] sm:$0xff] }
 0x209   : > { %v1205_v16 = vadd.f32 %v1204_v8, %v689_v5  ;;  %v2183_v18 = vadd.f32 %v2182_v10, %v1667_v7  ;;  %v1936_v23 = vadd.f32 %v1935_v17, %v1425_v12  ;;  %v1676_v5 = vld [vmem:[%s2900_s7 + $0xc40] sm:$0xff]  ;;  %v960_v7 = vadd.f32 %v959_v57, %v449_v56  ;;  %v1434_v12 = vld [vmem:[%s2900_s7 + $0x4b0] sm:$0xff] }
 0x20a   : > { %v700_v17 = vld [vmem:[%s2893_s5 + $0xe10] sm:$0xff] }
 0x20b   : > { %v1206_v22 = vadd.f32 %v1205_v16, %v690_v11  ;;  %v2184_v24 = vadd.f32 %v2183_v18, %v1668_v13  ;;  %v1937_v31 = vadd.f32 %v1936_v23, %v1426_v20  ;;  %v699_v11 = vld [vmem:[%s2893_s5 + $0xe08] sm:$0xff]  ;;  %v1435_v18 = vld [vmem:[%s2900_s7 + $0x4b8] sm:$0xff] }
 0x20c   : > { %v1677_v13 = vld [vmem:[%s2900_s7 + $0xc48] sm:$0xff] }
 0x20d   : > { %v1207_v30 = vadd.f32 %v1206_v22, %v691_v19  ;;  %v2185_v32 = vadd.f32 %v2184_v24, %v1669_v21  ;;  %v1938_v37 = vadd.f32 %v1937_v31, %v1427_v26  ;;  %v1678_v19 = vld [vmem:[%s2900_s7 + $0xc50] sm:$0xff]  ;;  %v451_v20 = vld [vmem:[%s2893_s5 + $0x648] sm:$0xff]  ;;  %v961_v21 = vadd.f32 %v960_v7, %v450_v6  ;;  %v1436_v26 = vld [vmem:[%s2900_s7 + $0x4c0] sm:$0xff] }
 0x20e   : > { %v702_v31 = vld [vmem:[%s2893_s5 + $0xe20] sm:$0xff] }
 0x20f   : > { %v1208_v36 = vadd.f32 %v1207_v30, %v692_v25  ;;  %v2186_v38 = vadd.f32 %v2185_v32, %v1670_v27  ;;  %v1939_v45 = vadd.f32 %v1938_v37, %v1428_v34  ;;  %v701_v25 = vld [vmem:[%s2893_s5 + $0xe18] sm:$0xff]  ;;  %v1437_v32 = vld [vmem:[%s2900_s7 + $0x4c8] sm:$0xff]  ;;  %v452_v34 = vld [vmem:[%s2893_s5 + $0x650] sm:$0xff] }
 0x210   : > { %v1679_v27 = vld [vmem:[%s2900_s7 + $0xc58] sm:$0xff] }
 0x211   : > { %v1209_v44 = vadd.f32 %v1208_v36, %v693_v33  ;;  %v2187_v46 = vadd.f32 %v2186_v38, %v1671_v35  ;;  %v1940_v51 = vadd.f32 %v1939_v45, %v1429_v40  ;;  %v1680_v33 = vld [vmem:[%s2900_s7 + $0xc60] sm:$0xff]  ;;  %v962_v35 = vadd.f32 %v961_v21, %v451_v20  ;;  %v1438_v40 = vld [vmem:[%s2900_s7 + $0x4d0] sm:$0xff] }
 0x212   : > { %v704_v45 = vld [vmem:[%s2893_s5 + $0xe30] sm:$0xff] }
 0x213   : > { %v1210_v50 = vadd.f32 %v1209_v44, %v694_v39  ;;  %v2188_v52 = vadd.f32 %v2187_v46, %v1672_v41  ;;  %v1941_v59 = vadd.f32 %v1940_v51, %v1430_v48  ;;  %v703_v39 = vld [vmem:[%s2893_s5 + $0xe28] sm:$0xff]  ;;  %v1439_v46 = vld [vmem:[%s2900_s7 + $0x4d8] sm:$0xff] }
 0x214   : > { %v1681_v41 = vld [vmem:[%s2900_s7 + $0xc68] sm:$0xff]  ;;  %v453_v48 = vld [vmem:[%s2893_s5 + $0x658] sm:$0xff] }
 0x215   : > { %v1211_v58 = vadd.f32 %v1210_v50, %v695_v47  ;;  %v2189_v60 = vadd.f32 %v2188_v52, %v1673_v49  ;;  %v1942_v1 = vadd.f32 %v1941_v59, %v1431_v54  ;;  %v1682_v47 = vld [vmem:[%s2900_s7 + $0xc70] sm:$0xff]  ;;  %v963_v49 = vadd.f32 %v962_v35, %v452_v34  ;;  %v1440_v54 = vld [vmem:[%s2900_s7 + $0x4e0] sm:$0xff] }
 0x216   : > { %v706_v59 = vld [vmem:[%s2893_s5 + $0xe40] sm:$0xff] }
 0x217   : > { %v1212_v0 = vadd.f32 %v1211_v58, %v696_v53  ;;  %v2190_v2 = vadd.f32 %v2189_v60, %v1674_v55  ;;  %v1943_v9 = vadd.f32 %v1942_v1, %v1432_v62  ;;  %v705_v53 = vld [vmem:[%s2893_s5 + $0xe38] sm:$0xff]  ;;  %v1441_v60 = vld [vmem:[%s2900_s7 + $0x4e8] sm:$0xff]  ;;  %v454_v62 = vld [vmem:[%s2893_s5 + $0x660] sm:$0xff] }
 0x218   : > { %v1683_v55 = vld [vmem:[%s2900_s7 + $0xc78] sm:$0xff] }
 0x219   : > { %v1213_v8 = vadd.f32 %v1212_v0, %v697_v61  ;;  %v2191_v10 = vadd.f32 %v2190_v2, %v1675_v63  ;;  %v1944_v15 = vadd.f32 %v1943_v9, %v1433_v4  ;;  %v1684_v61 = vld [vmem:[%s2900_s7 + $0xc80] sm:$0xff]  ;;  %v964_v63 = vadd.f32 %v963_v49, %v453_v48  ;;  %v1442_v4 = vld [vmem:[%s2900_s7 + $0x4f0] sm:$0xff] }
 0x21a   : > { %v708_v9 = vld [vmem:[%s2893_s5 + $0xe50] sm:$0xff] }
 0x21b   : > { %v1214_v14 = vadd.f32 %v1213_v8, %v698_v3  ;;  %v2192_v16 = vadd.f32 %v2191_v10, %v1676_v5  ;;  %v1945_v23 = vadd.f32 %v1944_v15, %v1434_v12  ;;  %v707_v3 = vld [vmem:[%s2893_s5 + $0xe48] sm:$0xff]  ;;  %v1443_v10 = vld [vmem:[%s2900_s7 + $0x4f8] sm:$0xff] }
 0x21c   : > { %v1685_v5 = vld [vmem:[%s2900_s7 + $0xc88] sm:$0xff] }
 0x21d   : > { %v1215_v22 = vadd.f32 %v1214_v14, %v699_v11  ;;  %v2193_v24 = vadd.f32 %v2192_v16, %v1677_v13  ;;  %v1946_v29 = vadd.f32 %v1945_v23, %v1435_v18  ;;  %v1686_v11 = vld [vmem:[%s2900_s7 + $0xc90] sm:$0xff]  ;;  %v455_v12 = vld [vmem:[%s2893_s5 + $0x668] sm:$0xff]  ;;  %v965_v13 = vadd.f32 %v964_v63, %v454_v62  ;;  %v1444_v18 = vld [vmem:[%s2900_s7 + $0x500] sm:$0xff] }
 0x21e   : > { %v710_v23 = vld [vmem:[%s2893_s5 + $0xe60] sm:$0xff]  ;;  %v1451_v63 = vld [vmem:[%s2900_s7 + $0x538] sm:$0xff] }
 0x21f   : > { %v1216_v28 = vadd.f32 %v1215_v22, %v700_v17  ;;  %v2194_v30 = vadd.f32 %v2193_v24, %v1678_v19  ;;  %v1947_v37 = vadd.f32 %v1946_v29, %v1436_v26  ;;  %v709_v17 = vld [vmem:[%s2893_s5 + $0xe58] sm:$0xff]  ;;  %v1445_v24 = vld [vmem:[%s2900_s7 + $0x508] sm:$0xff]  ;;  %v456_v26 = vld [vmem:[%s2893_s5 + $0x670] sm:$0xff] }
 0x220   : > { %v1687_v19 = vld [vmem:[%s2900_s7 + $0xc98] sm:$0xff]  ;;  %v714_v62 = vld [vmem:[%s2893_s5 + $0xe80] sm:$0xff] }
 0x221   : > { %v1217_v36 = vadd.f32 %v1216_v28, %v701_v25  ;;  %v2195_v38 = vadd.f32 %v2194_v30, %v1679_v27  ;;  %v1948_v43 = vadd.f32 %v1947_v37, %v1437_v32  ;;  %v1688_v25 = vld [vmem:[%s2900_s7 + $0xca0] sm:$0xff]  ;;  %v966_v27 = vadd.f32 %v965_v13, %v455_v12  ;;  %v1446_v32 = vld [vmem:[%s2900_s7 + $0x510] sm:$0xff] }
 0x222   : > { %v712_v37 = vld [vmem:[%s2893_s5 + $0xe70] sm:$0xff]  ;;  %v1696_v12 = vld [vmem:[%s2900_s7 + $0xce0] sm:$0xff] }
 0x223   : > { %v1218_v42 = vadd.f32 %v1217_v36, %v702_v31  ;;  %v2196_v44 = vadd.f32 %v2195_v38, %v1680_v33  ;;  %v1949_v51 = vadd.f32 %v1948_v43, %v1438_v40  ;;  %v711_v31 = vld [vmem:[%s2893_s5 + $0xe68] sm:$0xff]  ;;  %v1447_v38 = vld [vmem:[%s2900_s7 + $0x518] sm:$0xff]  ;;  %v967_v40 = vadd.f32 %v966_v27, %v456_v26 }
 0x224   : > { %v1689_v33 = vld [vmem:[%s2900_s7 + $0xca8] sm:$0xff] }
 0x225   : > { %v1219_v50 = vadd.f32 %v1218_v42, %v703_v39  ;;  %v2197_v52 = vadd.f32 %v2196_v44, %v1681_v41  ;;  %v1950_v57 = vadd.f32 %v1949_v51, %v1439_v46  ;;  %v1690_v39 = vld [vmem:[%s2900_s7 + $0xcb0] sm:$0xff]  ;;  %v457_v44 = vld [vmem:[%s2893_s5 + $0x678] sm:$0xff]  ;;  %v1449_v51 = vld [vmem:[%s2900_s7 + $0x528] sm:$0xff] }
 0x226   : > { %v1691_v46 = vld [vmem:[%s2900_s7 + $0xcb8] sm:$0xff] }
 0x227   : > { %v1220_v56 = vadd.f32 %v1219_v50, %v704_v45  ;;  %v2198_v58 = vadd.f32 %v2197_v52, %v1682_v47  ;;  %v1951_v1 = vadd.f32 %v1950_v57, %v1440_v54  ;;  %v1448_v45 = vld [vmem:[%s2900_s7 + $0x520] sm:$0xff]  ;;  %v713_v50 = vld [vmem:[%s2893_s5 + $0xe78] sm:$0xff]  ;;  %v1450_v57 = vld [vmem:[%s2900_s7 + $0x530] sm:$0xff] }
 0x228   : > { %v1692_v52 = vld [vmem:[%s2900_s7 + $0xcc0] sm:$0xff] }
 0x229   : > { %v1221_v0 = vadd.f32 %v1220_v56, %v705_v53  ;;  %v2199_v2 = vadd.f32 %v2198_v58, %v1683_v55  ;;  %v1952_v7 = vadd.f32 %v1951_v1, %v1441_v60  ;;  %v968_v53 = vadd.f32 %v967_v40, %v457_v44  ;;  %v458_v56 = vld [vmem:[%s2893_s5 + $0x680] sm:$0xff]  ;;  %v1693_v58 = vld [vmem:[%s2900_s7 + $0xcc8] sm:$0xff] }
 0x22a   : > { %v462_v40 = vld [vmem:[%s2893_s5 + $0x6a0] sm:$0xff] }
 0x22b   : > { %v1222_v6 = vadd.f32 %v1221_v0, %v706_v59  ;;  %v2200_v8 = vadd.f32 %v2199_v2, %v1684_v61  ;;  %v1953_v15 = vadd.f32 %v1952_v7, %v1442_v4  ;;  %v1694_v0 = vld [vmem:[%s2900_s7 + $0xcd0] sm:$0xff]  ;;  %v969_v1 = vadd.f32 %v968_v53, %v458_v56  ;;  %v459_v4 = vld [vmem:[%s2893_s5 + $0x688] sm:$0xff]  ;;  %v1460_v53 = vld [vmem:[%s2900_s7 + $0x580] sm:$0xff] }
 0x22d   : > { %v1223_v14 = vadd.f32 %v1222_v6, %v707_v3  ;;  %v2201_v16 = vadd.f32 %v2200_v8, %v1685_v5  ;;  %v1954_v21 = vadd.f32 %v1953_v15, %v1443_v10  ;;  %v1452_v5 = vld [vmem:[%s2900_s7 + $0x540] sm:$0xff]  ;;  %v1695_v6 = vld [vmem:[%s2900_s7 + $0xcd8] sm:$0xff]  ;;  %v715_v10 = vld [vmem:[%s2893_s5 + $0xe88] sm:$0xff]  ;;  %v970_v13 = vadd.f32 %v969_v1, %v459_v4 }
 0x22e   : > { %v1462_v1 = vld [vmem:[%s2900_s7 + $0x590] sm:$0xff] }
 0x22f   : > { %v1224_v20 = vadd.f32 %v1223_v14, %v708_v9  ;;  %v2202_v22 = vadd.f32 %v2201_v16, %v1686_v11  ;;  %v1955_v29 = vadd.f32 %v1954_v21, %v1444_v18  ;;  %v1453_v11 = vld [vmem:[%s2900_s7 + $0x548] sm:$0xff]  ;;  %v460_v16 = vld [vmem:[%s2893_s5 + $0x690] sm:$0xff] }
 0x230   : > { %v1697_v18 = vld [vmem:[%s2900_s7 + $0xce8] sm:$0xff] }
 0x231   : > { %v1225_v28 = vadd.f32 %v1224_v20, %v709_v17  ;;  %v2203_v30 = vadd.f32 %v2202_v22, %v1687_v19  ;;  %v1956_v35 = vadd.f32 %v1955_v29, %v1445_v24  ;;  %v1454_v17 = vld [vmem:[%s2900_s7 + $0x550] sm:$0xff]  ;;  %v1456_v29 = vld [vmem:[%s2900_s7 + $0x560] sm:$0xff] }
 0x232   : > { %v716_v22 = vld [vmem:[%s2893_s5 + $0xe90] sm:$0xff] }
 0x233   : > { %v1226_v34 = vadd.f32 %v1225_v28, %v710_v23  ;;  %v2204_v36 = vadd.f32 %v2203_v30, %v1688_v25  ;;  %v1957_v42 = vadd.f32 %v1956_v35, %v1446_v32  ;;  %v1455_v23 = vld [vmem:[%s2900_s7 + $0x558] sm:$0xff]  ;;  %v1698_v24 = vld [vmem:[%s2900_s7 + $0xcf0] sm:$0xff]  ;;  %v971_v25 = vadd.f32 %v970_v13, %v460_v16  ;;  %v1457_v35 = vld [vmem:[%s2900_s7 + $0x568] sm:$0xff] }
 0x234   : > { %v461_v28 = vld [vmem:[%s2893_s5 + $0x698] sm:$0xff]  ;;  %v1464_v13 = vld [vmem:[%s2900_s7 + $0x5a0] sm:$0xff] }
 0x235   : > { %v1227_v41 = vadd.f32 %v1226_v34, %v711_v31  ;;  %v2205_v43 = vadd.f32 %v2204_v36, %v1689_v33  ;;  %v1958_v48 = vadd.f32 %v1957_v42, %v1447_v38  ;;  %v1699_v30 = vld [vmem:[%s2900_s7 + $0xcf8] sm:$0xff]  ;;  %v1700_v36 = vld [vmem:[%s2900_s7 + $0xd00] sm:$0xff]  ;;  %v1701_v42 = vld [vmem:[%s2900_s7 + $0xd08] sm:$0xff] }
 0x236   : > { %v717_v34 = vld [vmem:[%s2893_s5 + $0xe98] sm:$0xff] }
 0x237   : > { %v1228_v47 = vadd.f32 %v1227_v41, %v712_v37  ;;  %v2206_v49 = vadd.f32 %v2205_v43, %v1690_v39  ;;  %v1959_v54 = vadd.f32 %v1958_v48, %v1448_v45  ;;  %v972_v37 = vadd.f32 %v971_v25, %v461_v28  ;;  %v1458_v41 = vld [vmem:[%s2900_s7 + $0x570] sm:$0xff] }
 0x238   : > { %v1702_v48 = vld [vmem:[%s2900_s7 + $0xd10] sm:$0xff] }
 0x239   : > { %v2207_v55 = vadd.f32 %v2206_v49, %v1691_v46  ;;  %v1229_v59 = vadd.f32 %v1228_v47, %v713_v50  ;;  %v1960_v60 = vadd.f32 %v1959_v54, %v1449_v51  ;;  %v718_v46 = vld [vmem:[%s2893_s5 + $0xea0] sm:$0xff]  ;;  %v1459_v47 = vld [vmem:[%s2900_s7 + $0x578] sm:$0xff]  ;;  %v973_v49 = vadd.f32 %v972_v37, %v462_v40  ;;  %v1466_v25 = vld [vmem:[%s2900_s7 + $0x5b0] sm:$0xff] }
 0x23a   : > { %v1703_v54 = vld [vmem:[%s2900_s7 + $0xd18] sm:$0xff]  ;;  %v1468_v37 = vld [vmem:[%s2900_s7 + $0x5c0] sm:$0xff] }
 0x23b   : > { %v2208_v61 = vadd.f32 %v2207_v55, %v1692_v52  ;;  %v1961_v2 = vadd.f32 %v1960_v60, %v1450_v57  ;;  %v1230_v7 = vadd.f32 %v1229_v59, %v714_v62  ;;  %v463_v52 = vld [vmem:[%s2893_s5 + $0x6a8] sm:$0xff]  ;;  %v1704_v60 = vld [vmem:[%s2900_s7 + $0xd20] sm:$0xff] }
 0x23c   : > { %v1461_v59 = vld [vmem:[%s2900_s7 + $0x588] sm:$0xff] }
 0x23d   : > { %v2209_v3 = vadd.f32 %v2208_v61, %v1693_v58  ;;  %v1962_v8 = vadd.f32 %v1961_v2, %v1451_v63  ;;  %v1231_v19 = vadd.f32 %v1230_v7, %v715_v10  ;;  %v719_v58 = vld [vmem:[%s2893_s5 + $0xea8] sm:$0xff]  ;;  %v974_v61 = vadd.f32 %v973_v49, %v463_v52  ;;  %v1463_v7 = vld [vmem:[%s2900_s7 + $0x598] sm:$0xff]  ;;  %v1470_v49 = vld [vmem:[%s2900_s7 + $0x5d0] sm:$0xff] }
 0x23e   : > { %v1705_v2 = vld [vmem:[%s2900_s7 + $0xd28] sm:$0xff] }
 0x23f   : > { %v2210_v9 = vadd.f32 %v2209_v3, %v1694_v0  ;;  %v1963_v14 = vadd.f32 %v1962_v8, %v1452_v5  ;;  %v1232_v31 = vadd.f32 %v1231_v19, %v716_v22  ;;  %v464_v0 = vld [vmem:[%s2893_s5 + $0x6b0] sm:$0xff]  ;;  %v1465_v19 = vld [vmem:[%s2900_s7 + $0x5a8] sm:$0xff] }
 0x240   : > { %v1706_v8 = vld [vmem:[%s2900_s7 + $0xd30] sm:$0xff] }
 0x241   : > { %v2211_v15 = vadd.f32 %v2210_v9, %v1695_v6  ;;  %v1964_v20 = vadd.f32 %v1963_v14, %v1453_v11  ;;  %v1233_v43 = vadd.f32 %v1232_v31, %v717_v34  ;;  %v720_v6 = vld [vmem:[%s2893_s5 + $0xeb0] sm:$0xff]  ;;  %v975_v9 = vadd.f32 %v974_v61, %v464_v0  ;;  %v1707_v14 = vld [vmem:[%s2900_s7 + $0xd38] sm:$0xff]  ;;  %v1472_v61 = vld [vmem:[%s2900_s7 + $0x5e0] sm:$0xff] }
 0x242   : > { %v1467_v31 = vld [vmem:[%s2900_s7 + $0x5b8] sm:$0xff] }
 0x243   : > { %v2212_v21 = vadd.f32 %v2211_v15, %v1696_v12  ;;  %v1965_v26 = vadd.f32 %v1964_v20, %v1454_v17  ;;  %v1234_v55 = vadd.f32 %v1233_v43, %v718_v46  ;;  %v465_v12 = vld [vmem:[%s2893_s5 + $0x6b8] sm:$0xff]  ;;  %v1708_v20 = vld [vmem:[%s2900_s7 + $0xd40] sm:$0xff]  ;;  %v1469_v43 = vld [vmem:[%s2900_s7 + $0x5c8] sm:$0xff] }
 0x245   : > { %v2213_v27 = vadd.f32 %v2212_v21, %v1697_v18  ;;  %v1966_v32 = vadd.f32 %v1965_v26, %v1455_v23  ;;  %v1235_v3 = vadd.f32 %v1234_v55, %v719_v58  ;;  %v721_v18 = vld [vmem:[%s2893_s5 + $0xeb8] sm:$0xff]  ;;  %v976_v21 = vadd.f32 %v975_v9, %v465_v12  ;;  %v1709_v26 = vld [vmem:[%s2900_s7 + $0xd48] sm:$0xff]  ;;  %v1474_v9 = vld [vmem:[%s2900_s7 + $0x5f0] sm:$0xff] }
 0x246   : > { %v1471_v55 = vld [vmem:[%s2900_s7 + $0x5d8] sm:$0xff] }
 0x247   : > { %v2214_v33 = vadd.f32 %v2213_v27, %v1698_v24  ;;  %v1967_v38 = vadd.f32 %v1966_v32, %v1456_v29  ;;  %v1236_v15 = vadd.f32 %v1235_v3, %v720_v6  ;;  %v466_v24 = vld [vmem:[%s2893_s5 + $0x6c0] sm:$0xff]  ;;  %v1710_v32 = vld [vmem:[%s2900_s7 + $0xd50] sm:$0xff]  ;;  %v1473_v3 = vld [vmem:[%s2900_s7 + $0x5e8] sm:$0xff] }
 0x249   : > { %v2215_v39 = vadd.f32 %v2214_v33, %v1699_v30  ;;  %v1968_v44 = vadd.f32 %v1967_v38, %v1457_v35  ;;  %v1237_v27 = vadd.f32 %v1236_v15, %v721_v18  ;;  %v722_v30 = vld [vmem:[%s2893_s5 + $0xec0] sm:$0xff]  ;;  %v977_v33 = vadd.f32 %v976_v21, %v466_v24  ;;  %v1711_v38 = vld [vmem:[%s2900_s7 + $0xd58] sm:$0xff] }
 0x24a   : > { %v1475_v15 = vld [vmem:[%s2900_s7 + $0x5f8] sm:$0xff]  ;;  %v1476_v21 = vld [vmem:[%s2900_s7 + $0x600] sm:$0xff] }
 0x24b   : > { %v2216_v45 = vadd.f32 %v2215_v39, %v1700_v36  ;;  %v1969_v50 = vadd.f32 %v1968_v44, %v1458_v41  ;;  %v467_v36 = vld [vmem:[%s2893_s5 + $0x6c8] sm:$0xff]  ;;  %v1238_v39 = vadd.f32 %v1237_v27, %v722_v30  ;;  %v1712_v44 = vld [vmem:[%s2900_s7 + $0xd60] sm:$0xff] }
 0x24c   : > { %v1477_v27 = vld [vmem:[%s2900_s7 + $0x608] sm:$0xff] }
 0x24d   : > { %v2217_v51 = vadd.f32 %v2216_v45, %v1701_v42  ;;  %v1970_v56 = vadd.f32 %v1969_v50, %v1459_v47  ;;  %v723_v42 = vld [vmem:[%s2893_s5 + $0xec8] sm:$0xff]  ;;  %v978_v45 = vadd.f32 %v977_v33, %v467_v36  ;;  %v1478_v33 = vld [vmem:[%s2900_s7 + $0x610] sm:$0xff] }
 0x24e   : > { %v1713_v50 = vld [vmem:[%s2900_s7 + $0xd68] sm:$0xff] }
 0x24f   : > { %v2218_v57 = vadd.f32 %v2217_v51, %v1702_v48  ;;  %v1971_v62 = vadd.f32 %v1970_v56, %v1460_v53  ;;  %v468_v48 = vld [vmem:[%s2893_s5 + $0x6d0] sm:$0xff]  ;;  %v1239_v51 = vadd.f32 %v1238_v39, %v723_v42  ;;  %v1479_v39 = vld [vmem:[%s2900_s7 + $0x618] sm:$0xff] }
 0x250   : > { %v1714_v56 = vld [vmem:[%s2900_s7 + $0xd70] sm:$0xff] }
 0x251   : > { %v2219_v63 = vadd.f32 %v2218_v57, %v1703_v54  ;;  %v1972_v4 = vadd.f32 %v1971_v62, %v1461_v59  ;;  %v724_v54 = vld [vmem:[%s2893_s5 + $0xed0] sm:$0xff]  ;;  %v979_v57 = vadd.f32 %v978_v45, %v468_v48  ;;  %v1715_v62 = vld [vmem:[%s2900_s7 + $0xd78] sm:$0xff]  ;;  %v1480_v45 = vld [vmem:[%s2900_s7 + $0x620] sm:$0xff] }
 0x253   : > { %v2220_v5 = vadd.f32 %v2219_v63, %v1704_v60  ;;  %v1973_v10 = vadd.f32 %v1972_v4, %v1462_v1  ;;  %v469_v60 = vld [vmem:[%s2893_s5 + $0x6d8] sm:$0xff]  ;;  %v1240_v63 = vadd.f32 %v1239_v51, %v724_v54  ;;  %v1716_v4 = vld [vmem:[%s2900_s7 + $0xd80] sm:$0xff]  ;;  %v1481_v51 = vld [vmem:[%s2900_s7 + $0x628] sm:$0xff] }
 0x255   : > { %v2221_v11 = vadd.f32 %v2220_v5, %v1705_v2  ;;  %v1974_v16 = vadd.f32 %v1973_v10, %v1463_v7  ;;  %v725_v2 = vld [vmem:[%s2893_s5 + $0xed8] sm:$0xff]  ;;  %v980_v5 = vadd.f32 %v979_v57, %v469_v60  ;;  %v1717_v10 = vld [vmem:[%s2900_s7 + $0xd88] sm:$0xff]  ;;  %v1482_v57 = vld [vmem:[%s2900_s7 + $0x630] sm:$0xff] }
 0x257   : > { %v2222_v17 = vadd.f32 %v2221_v11, %v1706_v8  ;;  %v1975_v22 = vadd.f32 %v1974_v16, %v1464_v13  ;;  %v470_v8 = vld [vmem:[%s2893_s5 + $0x6e0] sm:$0xff]  ;;  %v1241_v11 = vadd.f32 %v1240_v63, %v725_v2  ;;  %v1718_v16 = vld [vmem:[%s2900_s7 + $0xd90] sm:$0xff]  ;;  %v1483_v63 = vld [vmem:[%s2900_s7 + $0x638] sm:$0xff] }
 0x259   : > { %v2223_v23 = vadd.f32 %v2222_v17, %v1707_v14  ;;  %v1976_v28 = vadd.f32 %v1975_v22, %v1465_v19  ;;  %v726_v14 = vld [vmem:[%s2893_s5 + $0xee0] sm:$0xff]  ;;  %v981_v17 = vadd.f32 %v980_v5, %v470_v8  ;;  %v1719_v22 = vld [vmem:[%s2900_s7 + $0xd98] sm:$0xff] }
 0x25a   : > { %v1484_v5 = vld [vmem:[%s2900_s7 + $0x640] sm:$0xff] }
 0x25b   : > { %v2224_v29 = vadd.f32 %v2223_v23, %v1708_v20  ;;  %v1977_v34 = vadd.f32 %v1976_v28, %v1466_v25  ;;  %v471_v20 = vld [vmem:[%s2893_s5 + $0x6e8] sm:$0xff]  ;;  %v1242_v23 = vadd.f32 %v1241_v11, %v726_v14  ;;  %v1720_v28 = vld [vmem:[%s2900_s7 + $0xda0] sm:$0xff] }
 0x25c   : > { %v1485_v11 = vld [vmem:[%s2900_s7 + $0x648] sm:$0xff] }
 0x25d   : > { %v2225_v35 = vadd.f32 %v2224_v29, %v1709_v26  ;;  %v1978_v40 = vadd.f32 %v1977_v34, %v1467_v31  ;;  %v727_v26 = vld [vmem:[%s2893_s5 + $0xee8] sm:$0xff]  ;;  %v982_v29 = vadd.f32 %v981_v17, %v471_v20  ;;  %v1486_v17 = vld [vmem:[%s2900_s7 + $0x650] sm:$0xff] }
 0x25e   : > { %v1721_v34 = vld [vmem:[%s2900_s7 + $0xda8] sm:$0xff] }
 0x25f   : > { %v2226_v41 = vadd.f32 %v2225_v35, %v1710_v32  ;;  %v1979_v46 = vadd.f32 %v1978_v40, %v1468_v37  ;;  %v472_v32 = vld [vmem:[%s2893_s5 + $0x6f0] sm:$0xff]  ;;  %v1243_v35 = vadd.f32 %v1242_v23, %v727_v26  ;;  %v1487_v23 = vld [vmem:[%s2900_s7 + $0x658] sm:$0xff] }
 0x260   : > { %v1722_v40 = vld [vmem:[%s2900_s7 + $0xdb0] sm:$0xff] }
 0x261   : > { %v2227_v47 = vadd.f32 %v2226_v41, %v1711_v38  ;;  %v1980_v52 = vadd.f32 %v1979_v46, %v1469_v43  ;;  %v728_v38 = vld [vmem:[%s2893_s5 + $0xef0] sm:$0xff]  ;;  %v983_v41 = vadd.f32 %v982_v29, %v472_v32  ;;  %v1723_v46 = vld [vmem:[%s2900_s7 + $0xdb8] sm:$0xff]  ;;  %v1488_v29 = vld [vmem:[%s2900_s7 + $0x660] sm:$0xff] }
 0x263   : > { %v2228_v53 = vadd.f32 %v2227_v47, %v1712_v44  ;;  %v1981_v58 = vadd.f32 %v1980_v52, %v1470_v49  ;;  %v473_v44 = vld [vmem:[%s2893_s5 + $0x6f8] sm:$0xff]  ;;  %v1244_v47 = vadd.f32 %v1243_v35, %v728_v38  ;;  %v1724_v52 = vld [vmem:[%s2900_s7 + $0xdc0] sm:$0xff]  ;;  %v1489_v35 = vld [vmem:[%s2900_s7 + $0x668] sm:$0xff] }
 0x265   : > { %v2229_v59 = vadd.f32 %v2228_v53, %v1713_v50  ;;  %v1982_v0 = vadd.f32 %v1981_v58, %v1471_v55  ;;  %v729_v50 = vld [vmem:[%s2893_s5 + $0xef8] sm:$0xff]  ;;  %v984_v53 = vadd.f32 %v983_v41, %v473_v44  ;;  %v1725_v58 = vld [vmem:[%s2900_s7 + $0xdc8] sm:$0xff]  ;;  %v1490_v41 = vld [vmem:[%s2900_s7 + $0x670] sm:$0xff] }
 0x267   : > { %v2230_v1 = vadd.f32 %v2229_v59, %v1714_v56  ;;  %v1983_v6 = vadd.f32 %v1982_v0, %v1472_v61  ;;  %v474_v56 = vld [vmem:[%s2893_s5 + $0x700] sm:$0xff]  ;;  %v1245_v59 = vadd.f32 %v1244_v47, %v729_v50  ;;  %v1726_v0 = vld [vmem:[%s2900_s7 + $0xdd0] sm:$0xff]  ;;  %v1491_v47 = vld [vmem:[%s2900_s7 + $0x678] sm:$0xff] }
 0x269   : > { %v2231_v7 = vadd.f32 %v2230_v1, %v1715_v62  ;;  %v1984_v12 = vadd.f32 %v1983_v6, %v1473_v3  ;;  %v730_v62 = vld [vmem:[%s2893_s5 + $0xf00] sm:$0xff]  ;;  %v985_v1 = vadd.f32 %v984_v53, %v474_v56  ;;  %v1727_v6 = vld [vmem:[%s2900_s7 + $0xdd8] sm:$0xff] }
 0x26a   : > { %v1492_v53 = vld [vmem:[%s2900_s7 + $0x680] sm:$0xff] }
 0x26b   : > { %v2232_v13 = vadd.f32 %v2231_v7, %v1716_v4  ;;  %v1985_v18 = vadd.f32 %v1984_v12, %v1474_v9  ;;  %v475_v4 = vld [vmem:[%s2893_s5 + $0x708] sm:$0xff]  ;;  %v1246_v7 = vadd.f32 %v1245_v59, %v730_v62  ;;  %v1728_v12 = vld [vmem:[%s2900_s7 + $0xde0] sm:$0xff] }
 0x26c   : > { %v1493_v59 = vld [vmem:[%s2900_s7 + $0x688] sm:$0xff] }
 0x26d   : > { %v2233_v19 = vadd.f32 %v2232_v13, %v1717_v10  ;;  %v1986_v24 = vadd.f32 %v1985_v18, %v1475_v15  ;;  %v731_v10 = vld [vmem:[%s2893_s5 + $0xf08] sm:$0xff]  ;;  %v986_v13 = vadd.f32 %v985_v1, %v475_v4  ;;  %v1494_v1 = vld [vmem:[%s2900_s7 + $0x690] sm:$0xff] }
 0x26e   : > { %v1729_v18 = vld [vmem:[%s2900_s7 + $0xde8] sm:$0xff] }
 0x26f   : > { %v2234_v25 = vadd.f32 %v2233_v19, %v1718_v16  ;;  %v1987_v30 = vadd.f32 %v1986_v24, %v1476_v21  ;;  %v476_v16 = vld [vmem:[%s2893_s5 + $0x710] sm:$0xff]  ;;  %v1247_v19 = vadd.f32 %v1246_v7, %v731_v10  ;;  %v1495_v7 = vld [vmem:[%s2900_s7 + $0x698] sm:$0xff] }
 0x270   : > { %v1730_v24 = vld [vmem:[%s2900_s7 + $0xdf0] sm:$0xff] }
 0x271   : > { %v2235_v31 = vadd.f32 %v2234_v25, %v1719_v22  ;;  %v1988_v36 = vadd.f32 %v1987_v30, %v1477_v27  ;;  %v732_v22 = vld [vmem:[%s2893_s5 + $0xf10] sm:$0xff]  ;;  %v987_v25 = vadd.f32 %v986_v13, %v476_v16  ;;  %v1731_v30 = vld [vmem:[%s2900_s7 + $0xdf8] sm:$0xff]  ;;  %v1496_v13 = vld [vmem:[%s2900_s7 + $0x6a0] sm:$0xff] }
 0x273   : > { %v2236_v37 = vadd.f32 %v2235_v31, %v1720_v28  ;;  %v1989_v42 = vadd.f32 %v1988_v36, %v1478_v33  ;;  %v477_v28 = vld [vmem:[%s2893_s5 + $0x718] sm:$0xff]  ;;  %v1248_v31 = vadd.f32 %v1247_v19, %v732_v22  ;;  %v1732_v36 = vld [vmem:[%s2900_s7 + $0xe00] sm:$0xff]  ;;  %v1497_v19 = vld [vmem:[%s2900_s7 + $0x6a8] sm:$0xff] }
 0x275   : > { %v2237_v43 = vadd.f32 %v2236_v37, %v1721_v34  ;;  %v1990_v48 = vadd.f32 %v1989_v42, %v1479_v39  ;;  %v733_v34 = vld [vmem:[%s2893_s5 + $0xf18] sm:$0xff]  ;;  %v988_v37 = vadd.f32 %v987_v25, %v477_v28  ;;  %v1733_v42 = vld [vmem:[%s2900_s7 + $0xe08] sm:$0xff]  ;;  %v1498_v25 = vld [vmem:[%s2900_s7 + $0x6b0] sm:$0xff] }
 0x277   : > { %v2238_v49 = vadd.f32 %v2237_v43, %v1722_v40  ;;  %v1991_v54 = vadd.f32 %v1990_v48, %v1480_v45  ;;  %v478_v40 = vld [vmem:[%s2893_s5 + $0x720] sm:$0xff]  ;;  %v1249_v43 = vadd.f32 %v1248_v31, %v733_v34  ;;  %v1734_v48 = vld [vmem:[%s2900_s7 + $0xe10] sm:$0xff]  ;;  %v1499_v31 = vld [vmem:[%s2900_s7 + $0x6b8] sm:$0xff] }
 0x279   : > { %v2239_v55 = vadd.f32 %v2238_v49, %v1723_v46  ;;  %v1992_v60 = vadd.f32 %v1991_v54, %v1481_v51  ;;  %v734_v46 = vld [vmem:[%s2893_s5 + $0xf20] sm:$0xff]  ;;  %v989_v49 = vadd.f32 %v988_v37, %v478_v40  ;;  %v1735_v54 = vld [vmem:[%s2900_s7 + $0xe18] sm:$0xff] }
 0x27a   : > { %v1500_v37 = vld [vmem:[%s2900_s7 + $0x6c0] sm:$0xff] }
 0x27b   : > { %v2240_v61 = vadd.f32 %v2239_v55, %v1724_v52  ;;  %v1993_v2 = vadd.f32 %v1992_v60, %v1482_v57  ;;  %v479_v52 = vld [vmem:[%s2893_s5 + $0x728] sm:$0xff]  ;;  %v1250_v55 = vadd.f32 %v1249_v43, %v734_v46  ;;  %v1736_v60 = vld [vmem:[%s2900_s7 + $0xe20] sm:$0xff] }
 0x27c   : > { %v1501_v43 = vld [vmem:[%s2900_s7 + $0x6c8] sm:$0xff] }
 0x27d   : > { %v2241_v3 = vadd.f32 %v2240_v61, %v1725_v58  ;;  %v1994_v8 = vadd.f32 %v1993_v2, %v1483_v63  ;;  %v735_v58 = vld [vmem:[%s2893_s5 + $0xf28] sm:$0xff]  ;;  %v990_v61 = vadd.f32 %v989_v49, %v479_v52  ;;  %v1502_v49 = vld [vmem:[%s2900_s7 + $0x6d0] sm:$0xff] }
 0x27e   : > { %v1737_v2 = vld [vmem:[%s2900_s7 + $0xe28] sm:$0xff] }
 0x27f   : > { %v2242_v9 = vadd.f32 %v2241_v3, %v1726_v0  ;;  %v1995_v14 = vadd.f32 %v1994_v8, %v1484_v5  ;;  %v480_v0 = vld [vmem:[%s2893_s5 + $0x730] sm:$0xff]  ;;  %v1251_v3 = vadd.f32 %v1250_v55, %v735_v58  ;;  %v1503_v55 = vld [vmem:[%s2900_s7 + $0x6d8] sm:$0xff] }
 0x280   : > { %v1738_v8 = vld [vmem:[%s2900_s7 + $0xe30] sm:$0xff] }
 0x281   : > { %v2243_v15 = vadd.f32 %v2242_v9, %v1727_v6  ;;  %v1996_v20 = vadd.f32 %v1995_v14, %v1485_v11  ;;  %v736_v6 = vld [vmem:[%s2893_s5 + $0xf30] sm:$0xff]  ;;  %v991_v9 = vadd.f32 %v990_v61, %v480_v0  ;;  %v1739_v14 = vld [vmem:[%s2900_s7 + $0xe38] sm:$0xff]  ;;  %v1504_v61 = vld [vmem:[%s2900_s7 + $0x6e0] sm:$0xff] }
 0x283   : > { %v2244_v21 = vadd.f32 %v2243_v15, %v1728_v12  ;;  %v1997_v26 = vadd.f32 %v1996_v20, %v1486_v17  ;;  %v481_v12 = vld [vmem:[%s2893_s5 + $0x738] sm:$0xff]  ;;  %v1252_v15 = vadd.f32 %v1251_v3, %v736_v6  ;;  %v1740_v20 = vld [vmem:[%s2900_s7 + $0xe40] sm:$0xff]  ;;  %v1505_v3 = vld [vmem:[%s2900_s7 + $0x6e8] sm:$0xff] }
 0x285   : > { %v2245_v27 = vadd.f32 %v2244_v21, %v1729_v18  ;;  %v1998_v32 = vadd.f32 %v1997_v26, %v1487_v23  ;;  %v737_v18 = vld [vmem:[%s2893_s5 + $0xf38] sm:$0xff]  ;;  %v992_v21 = vadd.f32 %v991_v9, %v481_v12  ;;  %v1741_v26 = vld [vmem:[%s2900_s7 + $0xe48] sm:$0xff]  ;;  %v1506_v9 = vld [vmem:[%s2900_s7 + $0x6f0] sm:$0xff] }
 0x287   : > { %v2246_v33 = vadd.f32 %v2245_v27, %v1730_v24  ;;  %v1999_v38 = vadd.f32 %v1998_v32, %v1488_v29  ;;  %v482_v24 = vld [vmem:[%s2893_s5 + $0x740] sm:$0xff]  ;;  %v1253_v27 = vadd.f32 %v1252_v15, %v737_v18  ;;  %v1742_v32 = vld [vmem:[%s2900_s7 + $0xe50] sm:$0xff]  ;;  %v1507_v15 = vld [vmem:[%s2900_s7 + $0x6f8] sm:$0xff] }
 0x289   : > { %v2247_v39 = vadd.f32 %v2246_v33, %v1731_v30  ;;  %v2000_v44 = vadd.f32 %v1999_v38, %v1489_v35  ;;  %v738_v30 = vld [vmem:[%s2893_s5 + $0xf40] sm:$0xff]  ;;  %v993_v33 = vadd.f32 %v992_v21, %v482_v24  ;;  %v1743_v38 = vld [vmem:[%s2900_s7 + $0xe58] sm:$0xff] }
 0x28a   : > { %v1508_v21 = vld [vmem:[%s2900_s7 + $0x700] sm:$0xff] }
 0x28b   : > { %v2248_v45 = vadd.f32 %v2247_v39, %v1732_v36  ;;  %v2001_v50 = vadd.f32 %v2000_v44, %v1490_v41  ;;  %v483_v36 = vld [vmem:[%s2893_s5 + $0x748] sm:$0xff]  ;;  %v1254_v39 = vadd.f32 %v1253_v27, %v738_v30  ;;  %v1744_v44 = vld [vmem:[%s2900_s7 + $0xe60] sm:$0xff] }
 0x28c   : > { %v1509_v27 = vld [vmem:[%s2900_s7 + $0x708] sm:$0xff] }
 0x28d   : > { %v2249_v51 = vadd.f32 %v2248_v45, %v1733_v42  ;;  %v2002_v56 = vadd.f32 %v2001_v50, %v1491_v47  ;;  %v739_v42 = vld [vmem:[%s2893_s5 + $0xf48] sm:$0xff]  ;;  %v994_v45 = vadd.f32 %v993_v33, %v483_v36  ;;  %v1510_v33 = vld [vmem:[%s2900_s7 + $0x710] sm:$0xff] }
 0x28e   : > { %v1745_v50 = vld [vmem:[%s2900_s7 + $0xe68] sm:$0xff] }
 0x28f   : > { %v2250_v57 = vadd.f32 %v2249_v51, %v1734_v48  ;;  %v2003_v62 = vadd.f32 %v2002_v56, %v1492_v53  ;;  %v484_v48 = vld [vmem:[%s2893_s5 + $0x750] sm:$0xff]  ;;  %v1255_v51 = vadd.f32 %v1254_v39, %v739_v42  ;;  %v1511_v39 = vld [vmem:[%s2900_s7 + $0x718] sm:$0xff] }
 0x290   : > { %v1746_v56 = vld [vmem:[%s2900_s7 + $0xe70] sm:$0xff] }
 0x291   : > { %v2251_v63 = vadd.f32 %v2250_v57, %v1735_v54  ;;  %v2004_v4 = vadd.f32 %v2003_v62, %v1493_v59  ;;  %v740_v54 = vld [vmem:[%s2893_s5 + $0xf50] sm:$0xff]  ;;  %v995_v57 = vadd.f32 %v994_v45, %v484_v48  ;;  %v1747_v62 = vld [vmem:[%s2900_s7 + $0xe78] sm:$0xff]  ;;  %v1512_v45 = vld [vmem:[%s2900_s7 + $0x720] sm:$0xff] }
 0x293   : > { %v2252_v5 = vadd.f32 %v2251_v63, %v1736_v60  ;;  %v2005_v10 = vadd.f32 %v2004_v4, %v1494_v1  ;;  %v485_v60 = vld [vmem:[%s2893_s5 + $0x758] sm:$0xff]  ;;  %v1256_v63 = vadd.f32 %v1255_v51, %v740_v54  ;;  %v1748_v4 = vld [vmem:[%s2900_s7 + $0xe80] sm:$0xff]  ;;  %v1513_v51 = vld [vmem:[%s2900_s7 + $0x728] sm:$0xff] }
 0x295   : > { %v2253_v11 = vadd.f32 %v2252_v5, %v1737_v2  ;;  %v2006_v16 = vadd.f32 %v2005_v10, %v1495_v7  ;;  %v741_v2 = vld [vmem:[%s2893_s5 + $0xf58] sm:$0xff]  ;;  %v996_v5 = vadd.f32 %v995_v57, %v485_v60  ;;  %v1749_v10 = vld [vmem:[%s2900_s7 + $0xe88] sm:$0xff]  ;;  %v1514_v57 = vld [vmem:[%s2900_s7 + $0x730] sm:$0xff] }
 0x297   : > { %v2254_v17 = vadd.f32 %v2253_v11, %v1738_v8  ;;  %v2007_v22 = vadd.f32 %v2006_v16, %v1496_v13  ;;  %v486_v8 = vld [vmem:[%s2893_s5 + $0x760] sm:$0xff]  ;;  %v1257_v11 = vadd.f32 %v1256_v63, %v741_v2  ;;  %v1750_v16 = vld [vmem:[%s2900_s7 + $0xe90] sm:$0xff]  ;;  %v1515_v63 = vld [vmem:[%s2900_s7 + $0x738] sm:$0xff] }
 0x299   : > { %v2255_v23 = vadd.f32 %v2254_v17, %v1739_v14  ;;  %v2008_v28 = vadd.f32 %v2007_v22, %v1497_v19  ;;  %v742_v14 = vld [vmem:[%s2893_s5 + $0xf60] sm:$0xff]  ;;  %v997_v17 = vadd.f32 %v996_v5, %v486_v8  ;;  %v1751_v22 = vld [vmem:[%s2900_s7 + $0xe98] sm:$0xff] }
 0x29a   : > { %v1516_v5 = vld [vmem:[%s2900_s7 + $0x740] sm:$0xff] }
 0x29b   : > { %v2256_v29 = vadd.f32 %v2255_v23, %v1740_v20  ;;  %v2009_v34 = vadd.f32 %v2008_v28, %v1498_v25  ;;  %v487_v20 = vld [vmem:[%s2893_s5 + $0x768] sm:$0xff]  ;;  %v1258_v23 = vadd.f32 %v1257_v11, %v742_v14  ;;  %v1752_v28 = vld [vmem:[%s2900_s7 + $0xea0] sm:$0xff] }
 0x29c   : > { %v1517_v11 = vld [vmem:[%s2900_s7 + $0x748] sm:$0xff] }
 0x29d   : > { %v2257_v35 = vadd.f32 %v2256_v29, %v1741_v26  ;;  %v2010_v40 = vadd.f32 %v2009_v34, %v1499_v31  ;;  %v743_v26 = vld [vmem:[%s2893_s5 + $0xf68] sm:$0xff]  ;;  %v998_v29 = vadd.f32 %v997_v17, %v487_v20  ;;  %v1518_v17 = vld [vmem:[%s2900_s7 + $0x750] sm:$0xff] }
 0x29e   : > { %v1753_v34 = vld [vmem:[%s2900_s7 + $0xea8] sm:$0xff] }
 0x29f   : > { %v2258_v41 = vadd.f32 %v2257_v35, %v1742_v32  ;;  %v2011_v46 = vadd.f32 %v2010_v40, %v1500_v37  ;;  %v488_v32 = vld [vmem:[%s2893_s5 + $0x770] sm:$0xff]  ;;  %v1259_v35 = vadd.f32 %v1258_v23, %v743_v26  ;;  %v1519_v23 = vld [vmem:[%s2900_s7 + $0x758] sm:$0xff] }
 0x2a0   : > { %v1754_v40 = vld [vmem:[%s2900_s7 + $0xeb0] sm:$0xff] }
 0x2a1   : > { %v2259_v47 = vadd.f32 %v2258_v41, %v1743_v38  ;;  %v2012_v52 = vadd.f32 %v2011_v46, %v1501_v43  ;;  %v744_v38 = vld [vmem:[%s2893_s5 + $0xf70] sm:$0xff]  ;;  %v999_v41 = vadd.f32 %v998_v29, %v488_v32  ;;  %v1755_v46 = vld [vmem:[%s2900_s7 + $0xeb8] sm:$0xff]  ;;  %v1520_v29 = vld [vmem:[%s2900_s7 + $0x760] sm:$0xff] }
 0x2a3   : > { %v2260_v53 = vadd.f32 %v2259_v47, %v1744_v44  ;;  %v2013_v58 = vadd.f32 %v2012_v52, %v1502_v49  ;;  %v489_v44 = vld [vmem:[%s2893_s5 + $0x778] sm:$0xff]  ;;  %v1260_v47 = vadd.f32 %v1259_v35, %v744_v38  ;;  %v1756_v52 = vld [vmem:[%s2900_s7 + $0xec0] sm:$0xff]  ;;  %v1521_v35 = vld [vmem:[%s2900_s7 + $0x768] sm:$0xff] }
 0x2a5   : > { %v2261_v59 = vadd.f32 %v2260_v53, %v1745_v50  ;;  %v2014_v0 = vadd.f32 %v2013_v58, %v1503_v55  ;;  %v745_v50 = vld [vmem:[%s2893_s5 + $0xf78] sm:$0xff]  ;;  %v1000_v53 = vadd.f32 %v999_v41, %v489_v44  ;;  %v1757_v58 = vld [vmem:[%s2900_s7 + $0xec8] sm:$0xff]  ;;  %v1522_v41 = vld [vmem:[%s2900_s7 + $0x770] sm:$0xff] }
 0x2a7   : > { %v2262_v1 = vadd.f32 %v2261_v59, %v1746_v56  ;;  %v2015_v6 = vadd.f32 %v2014_v0, %v1504_v61  ;;  %v490_v56 = vld [vmem:[%s2893_s5 + $0x780] sm:$0xff]  ;;  %v1261_v59 = vadd.f32 %v1260_v47, %v745_v50  ;;  %v1758_v0 = vld [vmem:[%s2900_s7 + $0xed0] sm:$0xff]  ;;  %v1523_v47 = vld [vmem:[%s2900_s7 + $0x778] sm:$0xff] }
 0x2a9   : > { %v2263_v7 = vadd.f32 %v2262_v1, %v1747_v62  ;;  %v2016_v12 = vadd.f32 %v2015_v6, %v1505_v3  ;;  %v746_v62 = vld [vmem:[%s2893_s5 + $0xf80] sm:$0xff]  ;;  %v1001_v1 = vadd.f32 %v1000_v53, %v490_v56  ;;  %v1759_v6 = vld [vmem:[%s2900_s7 + $0xed8] sm:$0xff] }
 0x2aa   : > { %v1524_v53 = vld [vmem:[%s2900_s7 + $0x780] sm:$0xff] }
 0x2ab   : > { %v2264_v13 = vadd.f32 %v2263_v7, %v1748_v4  ;;  %v2017_v18 = vadd.f32 %v2016_v12, %v1506_v9  ;;  %v491_v4 = vld [vmem:[%s2893_s5 + $0x788] sm:$0xff]  ;;  %v1262_v7 = vadd.f32 %v1261_v59, %v746_v62  ;;  %v1760_v12 = vld [vmem:[%s2900_s7 + $0xee0] sm:$0xff] }
 0x2ac   : > { %v1525_v59 = vld [vmem:[%s2900_s7 + $0x788] sm:$0xff] }
 0x2ad   : > { %v2265_v19 = vadd.f32 %v2264_v13, %v1749_v10  ;;  %v2018_v24 = vadd.f32 %v2017_v18, %v1507_v15  ;;  %v747_v10 = vld [vmem:[%s2893_s5 + $0xf88] sm:$0xff]  ;;  %v1002_v13 = vadd.f32 %v1001_v1, %v491_v4  ;;  %v1526_v1 = vld [vmem:[%s2900_s7 + $0x790] sm:$0xff] }
 0x2ae   : > { %v1761_v18 = vld [vmem:[%s2900_s7 + $0xee8] sm:$0xff] }
 0x2af   : > { %v2266_v25 = vadd.f32 %v2265_v19, %v1750_v16  ;;  %v2019_v30 = vadd.f32 %v2018_v24, %v1508_v21  ;;  %v492_v16 = vld [vmem:[%s2893_s5 + $0x790] sm:$0xff]  ;;  %v1263_v19 = vadd.f32 %v1262_v7, %v747_v10  ;;  %v1527_v7 = vld [vmem:[%s2900_s7 + $0x798] sm:$0xff] }
 0x2b0   : > { %v1762_v24 = vld [vmem:[%s2900_s7 + $0xef0] sm:$0xff] }
 0x2b1   : > { %v2267_v31 = vadd.f32 %v2266_v25, %v1751_v22  ;;  %v2020_v36 = vadd.f32 %v2019_v30, %v1509_v27  ;;  %v748_v22 = vld [vmem:[%s2893_s5 + $0xf90] sm:$0xff]  ;;  %v1003_v25 = vadd.f32 %v1002_v13, %v492_v16  ;;  %v1763_v30 = vld [vmem:[%s2900_s7 + $0xef8] sm:$0xff]  ;;  %v1528_v13 = vld [vmem:[%s2900_s7 + $0x7a0] sm:$0xff] }
 0x2b3   : > { %v2268_v37 = vadd.f32 %v2267_v31, %v1752_v28  ;;  %v2021_v42 = vadd.f32 %v2020_v36, %v1510_v33  ;;  %v493_v28 = vld [vmem:[%s2893_s5 + $0x798] sm:$0xff]  ;;  %v1264_v31 = vadd.f32 %v1263_v19, %v748_v22  ;;  %v1764_v36 = vld [vmem:[%s2900_s7 + $0xf00] sm:$0xff]  ;;  %v1529_v19 = vld [vmem:[%s2900_s7 + $0x7a8] sm:$0xff] }
 0x2b5   : > { %v2269_v43 = vadd.f32 %v2268_v37, %v1753_v34  ;;  %v2022_v48 = vadd.f32 %v2021_v42, %v1511_v39  ;;  %v749_v34 = vld [vmem:[%s2893_s5 + $0xf98] sm:$0xff]  ;;  %v1004_v37 = vadd.f32 %v1003_v25, %v493_v28  ;;  %v1765_v42 = vld [vmem:[%s2900_s7 + $0xf08] sm:$0xff]  ;;  %v1530_v25 = vld [vmem:[%s2900_s7 + $0x7b0] sm:$0xff] }
 0x2b7   : > { %v2270_v49 = vadd.f32 %v2269_v43, %v1754_v40  ;;  %v2023_v54 = vadd.f32 %v2022_v48, %v1512_v45  ;;  %v494_v40 = vld [vmem:[%s2893_s5 + $0x7a0] sm:$0xff]  ;;  %v1265_v43 = vadd.f32 %v1264_v31, %v749_v34  ;;  %v1766_v48 = vld [vmem:[%s2900_s7 + $0xf10] sm:$0xff]  ;;  %v1531_v31 = vld [vmem:[%s2900_s7 + $0x7b8] sm:$0xff] }
 0x2b9   : > { %v2271_v55 = vadd.f32 %v2270_v49, %v1755_v46  ;;  %v2024_v60 = vadd.f32 %v2023_v54, %v1513_v51  ;;  %v750_v46 = vld [vmem:[%s2893_s5 + $0xfa0] sm:$0xff]  ;;  %v1005_v49 = vadd.f32 %v1004_v37, %v494_v40  ;;  %v1767_v54 = vld [vmem:[%s2900_s7 + $0xf18] sm:$0xff] }
 0x2ba   : > { %v1532_v37 = vld [vmem:[%s2900_s7 + $0x7c0] sm:$0xff] }
 0x2bb   : > { %v2272_v61 = vadd.f32 %v2271_v55, %v1756_v52  ;;  %v2025_v2 = vadd.f32 %v2024_v60, %v1514_v57  ;;  %v495_v52 = vld [vmem:[%s2893_s5 + $0x7a8] sm:$0xff]  ;;  %v1266_v55 = vadd.f32 %v1265_v43, %v750_v46  ;;  %v1768_v60 = vld [vmem:[%s2900_s7 + $0xf20] sm:$0xff] }
 0x2bc   : > { %v1533_v43 = vld [vmem:[%s2900_s7 + $0x7c8] sm:$0xff] }
 0x2bd   : > { %v2273_v3 = vadd.f32 %v2272_v61, %v1757_v58  ;;  %v2026_v8 = vadd.f32 %v2025_v2, %v1515_v63  ;;  %v751_v58 = vld [vmem:[%s2893_s5 + $0xfa8] sm:$0xff]  ;;  %v1006_v61 = vadd.f32 %v1005_v49, %v495_v52  ;;  %v1534_v49 = vld [vmem:[%s2900_s7 + $0x7d0] sm:$0xff] }
 0x2be   : > { %v1769_v2 = vld [vmem:[%s2900_s7 + $0xf28] sm:$0xff] }
 0x2bf   : > { %v2274_v9 = vadd.f32 %v2273_v3, %v1758_v0  ;;  %v2027_v14 = vadd.f32 %v2026_v8, %v1516_v5  ;;  %v496_v0 = vld [vmem:[%s2893_s5 + $0x7b0] sm:$0xff]  ;;  %v1267_v3 = vadd.f32 %v1266_v55, %v751_v58 }
 0x2c0   : > { %v1770_v8 = vld [vmem:[%s2900_s7 + $0xf30] sm:$0xff] }
 0x2c1   : > { %v2275_v15 = vadd.f32 %v2274_v9, %v1759_v6  ;;  %v2028_v20 = vadd.f32 %v2027_v14, %v1517_v11  ;;  %v752_v6 = vld [vmem:[%s2893_s5 + $0xfb0] sm:$0xff]  ;;  %v1007_v9 = vadd.f32 %v1006_v61, %v496_v0  ;;  %v1771_v14 = vld [vmem:[%s2900_s7 + $0xf38] sm:$0xff] }
 0x2c2   : > { %v1778_v55 = vld [vmem:[%s2900_s7 + $0xf70] sm:$0xff]  ;;  %v1779_v61 = vld [vmem:[%s2900_s7 + $0xf78] sm:$0xff] }
 0x2c3   : > { %v2276_v21 = vadd.f32 %v2275_v15, %v1760_v12  ;;  %v2029_v26 = vadd.f32 %v2028_v20, %v1518_v17  ;;  %v497_v12 = vld [vmem:[%s2893_s5 + $0x7b8] sm:$0xff]  ;;  %v1268_v15 = vadd.f32 %v1267_v3, %v752_v6  ;;  %v1772_v20 = vld [vmem:[%s2900_s7 + $0xf40] sm:$0xff] }
 0x2c4   : > { %v757_v0 = vld [vmem:[%s2893_s5 + $0xfd8] sm:$0xff]  ;;  %v1536_v6 = vld [vmem:[%s2900_s7 + $0x7e0] sm:$0xff] }
 0x2c5   : > { %v2277_v27 = vadd.f32 %v2276_v21, %v1761_v18  ;;  %v2030_v32 = vadd.f32 %v2029_v26, %v1519_v23  ;;  %v753_v18 = vld [vmem:[%s2893_s5 + $0xfb8] sm:$0xff]  ;;  %v1008_v21 = vadd.f32 %v1007_v9, %v497_v12  ;;  %v1773_v26 = vld [vmem:[%s2900_s7 + $0xf48] sm:$0xff] }
 0x2c7   : > { %v2278_v33 = vadd.f32 %v2277_v27, %v1762_v24  ;;  %v2031_v38 = vadd.f32 %v2030_v32, %v1520_v29  ;;  %v498_v24 = vld [vmem:[%s2893_s5 + $0x7c0] sm:$0xff]  ;;  %v1269_v27 = vadd.f32 %v1268_v15, %v753_v18  ;;  %v1774_v32 = vld [vmem:[%s2900_s7 + $0xf50] sm:$0xff]  ;;  %v503_v15 = vld [vmem:[%s2893_s5 + $0x7e8] sm:$0xff] }
 0x2c9   : > { %v2279_v39 = vadd.f32 %v2278_v33, %v1763_v30  ;;  %v2032_v44 = vadd.f32 %v2031_v38, %v1521_v35  ;;  %v754_v30 = vld [vmem:[%s2893_s5 + $0xfc0] sm:$0xff]  ;;  %v1009_v33 = vadd.f32 %v1008_v21, %v498_v24  ;;  %v1775_v38 = vld [vmem:[%s2900_s7 + $0xf58] sm:$0xff] }
 0x2ca   : > { %v1784_v21 = vld [vmem:[%s2900_s7 + $0xfa0] sm:$0xff] }
 0x2cb   : > { %v2280_v45 = vadd.f32 %v2279_v39, %v1764_v36  ;;  %v2033_v50 = vadd.f32 %v2032_v44, %v1522_v41  ;;  %v499_v36 = vld [vmem:[%s2893_s5 + $0x7c8] sm:$0xff]  ;;  %v1270_v39 = vadd.f32 %v1269_v27, %v754_v30  ;;  %v1776_v44 = vld [vmem:[%s2900_s7 + $0xf60] sm:$0xff]  ;;  %v760_v30 = vld [vmem:[%s2893_s5 + $0xff0] sm:$0xff] }
 0x2cc   : > { %v1785_v27 = vld [vmem:[%s2900_s7 + $0xfa8] sm:$0xff] }
 0x2cd   : > { %v2281_v51 = vadd.f32 %v2280_v45, %v1765_v42  ;;  %v2034_v56 = vadd.f32 %v2033_v50, %v1523_v47  ;;  %v755_v42 = vld [vmem:[%s2893_s5 + $0xfc8] sm:$0xff]  ;;  %v1010_v45 = vadd.f32 %v1009_v33, %v499_v36  ;;  %v1539_v36 = vld [vmem:[%s2900_s7 + $0x7f8] sm:$0xff] }
 0x2ce   : > { %v1777_v50 = vld [vmem:[%s2900_s7 + $0xf68] sm:$0xff] }
 0x2cf   : > { %v2282_v57 = vadd.f32 %v2281_v51, %v1766_v48  ;;  %v2035_v62 = vadd.f32 %v2034_v56, %v1524_v53  ;;  %v500_v48 = vld [vmem:[%s2893_s5 + $0x7d0] sm:$0xff]  ;;  %v1271_v51 = vadd.f32 %v1270_v39, %v755_v42 }
 0x2d0   : > { %v1011_v56 = vadd.f32 %v1010_v45, %v500_v48  ;;  %v1789_v45 = vld [vmem:[%s2900_s7 + $0xfc8] sm:$0xff]  ;;  %v1790_v48 = vld [vmem:[%s2900_s7 + $0xfd0] sm:$0xff] }
 0x2d1   : > { %v2283_v63 = vadd.f32 %v2282_v57, %v1767_v54  ;;  %v2036_v4 = vadd.f32 %v2035_v62, %v1525_v59  ;;  %v756_v54 = vld [vmem:[%s2893_s5 + $0xfd0] sm:$0xff]  ;;  %v501_v59 = vld [vmem:[%s2893_s5 + $0x7d8] sm:$0xff] }
 0x2d2   : > { %v1272_v62 = vadd.f32 %v1271_v51, %v756_v54 }
 0x2d3   : > { %v2284_v5 = vadd.f32 %v2283_v63, %v1768_v60  ;;  %v2037_v10 = vadd.f32 %v2036_v4, %v1526_v1  ;;  %v1535_v60 = vld [vmem:[%s2900_s7 + $0x7d8] sm:$0xff]  ;;  %v1780_v1 = vld [vmem:[%s2900_s7 + $0xf80] sm:$0xff] }
 0x2d5   : > { %v2285_v11 = vadd.f32 %v2284_v5, %v1769_v2  ;;  %v2038_v16 = vadd.f32 %v2037_v10, %v1527_v7  ;;  %v1012_v2 = vadd.f32 %v1011_v56, %v501_v59  ;;  %v502_v5 = vld [vmem:[%s2893_s5 + $0x7e0] sm:$0xff]  ;;  %v1781_v7 = vld [vmem:[%s2900_s7 + $0xf88] sm:$0xff] }
 0x2d6   : > { %v758_v10 = vld [vmem:[%s2893_s5 + $0xfe0] sm:$0xff]  ;;  %v1793_v59 = vld [vmem:[%s2900_s7 + $0xfe8] sm:$0xff] }
 0x2d7   : > { %v2286_v17 = vadd.f32 %v2285_v11, %v1770_v8  ;;  %v2039_v22 = vadd.f32 %v2038_v16, %v1528_v13  ;;  %v1273_v8 = vadd.f32 %v1272_v62, %v757_v0  ;;  %v1782_v11 = vld [vmem:[%s2900_s7 + $0xf90] sm:$0xff]  ;;  %v1013_v12 = vadd.f32 %v1012_v2, %v502_v5  ;;  %v1537_v16 = vld [vmem:[%s2900_s7 + $0x7e8] sm:$0xff]  ;;  %v1795_v2 = vld [vmem:[%s2900_s7 + $0xff8] sm:$0xff] }
 0x2d8   : > { %v1794_v62 = vld [vmem:[%s2900_s7 + $0xff0] sm:$0xff] }
 0x2d9   : > { %v2287_v23 = vadd.f32 %v2286_v17, %v1771_v14  ;;  %v2040_v28 = vadd.f32 %v2039_v22, %v1529_v19  ;;  %v1783_v17 = vld [vmem:[%s2900_s7 + $0xf98] sm:$0xff]  ;;  %v1274_v18 = vadd.f32 %v1273_v8, %v758_v10  ;;  %v1014_v22 = vadd.f32 %v1013_v12, %v503_v15 }
 0x2db   : > { %v2288_v29 = vadd.f32 %v2287_v23, %v1772_v20  ;;  %v2041_v34 = vadd.f32 %v2040_v28, %v1530_v25  ;;  %v759_v20 = vld [vmem:[%s2893_s5 + $0xfe8] sm:$0xff]  ;;  %v504_v25 = vld [vmem:[%s2893_s5 + $0x7f0] sm:$0xff] }
 0x2dc   : > { %v1275_v28 = vadd.f32 %v1274_v18, %v759_v20 }
 0x2dd   : > { %v2289_v35 = vadd.f32 %v2288_v29, %v1773_v26  ;;  %v2042_v40 = vadd.f32 %v2041_v34, %v1531_v31  ;;  %v1538_v26 = vld [vmem:[%s2900_s7 + $0x7f0] sm:$0xff] }
 0x2de   : > { %v1786_v31 = vld [vmem:[%s2900_s7 + $0xfb0] sm:$0xff] }
 0x2df   : > { %v2290_v41 = vadd.f32 %v2289_v35, %v1774_v32  ;;  %v2043_v46 = vadd.f32 %v2042_v40, %v1532_v37  ;;  %v1015_v32 = vadd.f32 %v1014_v22, %v504_v25  ;;  %v505_v35 = vld [vmem:[%s2893_s5 + $0x7f8] sm:$0xff]  ;;  %v2318_v22 = vld [vmem:[%s2907_s18] sm:$0x3] }
 0x2e0   : > { %v1787_v37 = vld [vmem:[%s2900_s7 + $0xfb8] sm:$0xff] }
 0x2e1   : > { %v2291_v47 = vadd.f32 %v2290_v41, %v1775_v38  ;;  %v2044_v52 = vadd.f32 %v2043_v46, %v1533_v43  ;;  %v1276_v38 = vadd.f32 %v1275_v28, %v760_v30  ;;  %v761_v40 = vld [vmem:[%s2893_s5 + $0xff8] sm:$0xff]  ;;  %v1788_v41 = vld [vmem:[%s2900_s7 + $0xfc0] sm:$0xff]  ;;  %v1016_v42 = vadd.f32 %v1015_v32, %v505_v35 }
 0x2e3   : > { %v2292_v53 = vadd.f32 %v2291_v47, %v1776_v44  ;;  %v2045_v57 = vadd.f32 %v2044_v52, %v1534_v49  ;;  %v1277_v46 = vadd.f32 %v1276_v38, %v761_v40  ;;  %v1017_v49 = vrot.slane %v1016_v42, 4  ;;  %v1791_v52 = vld [vmem:[%s2900_s7 + $0xfd8] sm:$0xff] }
 0x2e5   : > { %v2293_v58 = vadd.f32 %v2292_v53, %v1777_v50  ;;  %v2046_v3 = vadd.f32 %v2045_v57, %v1535_v60  ;;  %v1278_v53 = vrot.slane %v1277_v46, 4  ;;  %v1018_v56 = vadd.f32 %v1017_v49, %v1016_v42 }
 0x2e7   : > { %v2294_v63 = vadd.f32 %v2293_v58, %v1778_v55  ;;  %v2047_v13 = vadd.f32 %v2046_v3, %v1536_v6  ;;  %v1792_v55 = vld [vmem:[%s2900_s7 + $0xfe0] sm:$0xff]  ;;  %v1279_v60 = vadd.f32 %v1278_v53, %v1277_v46 }
 0x2e9   : > { %v2295_v4 = vadd.f32 %v2294_v63, %v1779_v61  ;;  %v2048_v23 = vadd.f32 %v2047_v13, %v1537_v16  ;;  %v1019_v63 = vrot.slane %v1018_v56, 2  ;;  %v1280_v3 = vrot.slane %v1279_v60, 2 }
 0x2eb   : > { %v2296_v9 = vadd.f32 %v2295_v4, %v1780_v1  ;;  %v2049_v33 = vadd.f32 %v2048_v23, %v1538_v26  ;;  %v1020_v5 = vadd.f32 %v1019_v63, %v1018_v56  ;;  %v1281_v8 = vadd.f32 %v1280_v3, %v1279_v60 }
 0x2ed   : > { %v2297_v14 = vadd.f32 %v2296_v9, %v1781_v7  ;;  %v2050_v43 = vadd.f32 %v2049_v33, %v1539_v36  ;;  %v1021_v10 = vrot.slane %v1020_v5, 1  ;;  %v1282_v13 = vrot.slane %v1281_v8, 1 }
 0x2ef   : > { %v2298_v19 = vadd.f32 %v2297_v14, %v1782_v11  ;;  %v2051_v50 = vrot.slane %v2050_v43, 4  ;;  %v1022_v15 = vadd.f32 %v1021_v10, %v1020_v5  ;;  %v1283_v18 = vadd.f32 %v1282_v13, %v1281_v8 }
 0x2f1   : > { %v2299_v24 = vadd.f32 %v2298_v19, %v1783_v17  ;;  %v2052_v57 = vadd.f32 %v2051_v50, %v2050_v43 }
 0x2f3   : > { %v2300_v29 = vadd.f32 %v2299_v24, %v1784_v21  ;;  %v2053_v0 = vrot.slane %v2052_v57, 2 }
 0x2f5   : > { %v2301_v34 = vadd.f32 %v2300_v29, %v1785_v27  ;;  %v2054_v6 = vadd.f32 %v2053_v0, %v2052_v57 }
 0x2f7   : > { %v2302_v39 = vadd.f32 %v2301_v34, %v1786_v31  ;;  %v2055_v11 = vrot.slane %v2054_v6, 1 }
 0x2f9   : > { %v2303_v44 = vadd.f32 %v2302_v39, %v1787_v37  ;;  %v2056_v16 = vadd.f32 %v2055_v11, %v2054_v6 }
 0x2fb   : > { %v2304_v47 = vadd.f32 %v2303_v44, %v1788_v41  ;;  %v2319_v21 = vsub.f32 %v1022_v15, %v2056_v16 }
 0x2fd   : > { %v2305_v51 = vadd.f32 %v2304_v47, %v1789_v45 }
 0x2ff   : > { %v2306_v54 = vadd.f32 %v2305_v51, %v1790_v48 }
 0x301   : > { %v2307_v58 = vadd.f32 %v2306_v54, %v1791_v52 }
 0x303   : > { %v2308_v61 = vadd.f32 %v2307_v58, %v1792_v55 }
 0x305   : > { %v2309_v1 = vadd.f32 %v2308_v61, %v1793_v59 }
 0x307   : > { %v2310_v4 = vadd.f32 %v2309_v1, %v1794_v62 }
 0x309   : > { %v2311_v7 = vadd.f32 %v2310_v4, %v1795_v2 }
 0x30b   : > { %v2312_v9 = vrot.slane %v2311_v7, 4 }
 0x30d   : > { %v2313_v12 = vadd.f32 %v2312_v9, %v2311_v7 }
 0x30f   : > { %v2314_v14 = vrot.slane %v2313_v12, 2 }
 0x311   : > { %v2315_v17 = vadd.f32 %v2314_v14, %v2313_v12 }
 0x313   : > { %v2316_v19 = vrot.slane %v2315_v17, 1 }
 0x315   : > { %v2317_v20 = vadd.f32 %v2316_v19, %v2315_v17 }
 0x317   : > { %v2320_v23 = vsub.f32 %v1283_v18, %v2317_v20 }
 0x319   : > { %v2324_v24 = vsel %vm2323_vm0, %v2320_v23, %v2319_v21 }
 0x31a   : > { %v2326_v25 = vadd.f32 %v2324_v24, %v2318_v22 }
 0x31c   : > { %2327 = vst [vmem:[%s2907_s18] sm:$0x3] %v2326_v25 }
 0x31d   : > { %2625 = shalt.err (!%p2622_p11)
}
 0x31e   : > { %s2626_s27 = scalar_lea.hbm %s3940_s3, 32  ;;  %s2630_s29 = scalar_lea.hbm %s3992_s2, 64 }
 0x31f   : > { %p2627_p1 = scmp.ne.s32.totalorder %s3940_s3, %s2626_s27  ;;  %p2631_p5 = scmp.lt.u32.totalorder %s3940_s3, %s3992_s2 }
 0x320   : > { %p2632_p4 = scmp.lt.u32.totalorder %s2630_s29, %s2626_s27  ;;  %p2634_p0 = scmp.lt.u32.totalorder %s2626_s27, %s3940_s3 }
 0x321   : > { %p2628_p6 = pnand %p2627_p1, %p4003_p3 }
 0x322   : > { %p2633_p8 = por %p2632_p4, %p2631_p5 }
 0x323   : > { %p2629_p2 = pneg %p2628_p6 }
 0x324   : > { %p2635_p12 = por %p2634_p0, %p2633_p8 }
 0x326   : > { %p2636_p13 = pnand %p2635_p12, %p2629_p2 }
 0x328   : > { %2639 = shalt.err (!%p2636_p13)
}
 0x329   : > { %2486 = dma.vmem_to_hbm [thread:$0]  (%p4003_p3), %s3942_s19, 32, %s3940_s3, %s2329_s15  }
 0x32a PF: > { %s2356_s7 = sand.u32 1, %s2678_s9   ;;  %p4004_p7 = scmp.ne.s32.totalorder %s3998_s24, 0 }
 0x32b   : > { %p4005_p10 = scmp.ge.s32.totalorder %s2698_s14, 2  ;;  %s2357_s8 = scalar_lea.sflag [#allocation4], %s2356_s7 }
 0x32d   : > { %p2496_p9 = pnand %p4005_p10, %p4004_p7 }
 0x32f   : > { %2673 = dma.done.wait (!%p2496_p9), %s2357_s8, 32  }
 0x330   : > { %2675 = vsyncadd (!%p2496_p9), %s2357_s8, 4294967264  ;;  %s21_s14 = sadd.s32 1, %s2698_s14   ;;  %s4006_s9 = smov %s2682_s10 }
 0x331   : > { %p18_p11 = scmp.ge.s32.totalorder %s21_s14, 4   ;;  %s4007_s10 = smov %s2686_s11 }
 0x332   : > { %s4008_s11 = smov %s2777_s23  ;;  %s4009_s12 = smov %s2694_s13 }
 0x333   : > { %s4010_s13 = smov %s4012_s17  ;;  %20 = sbr.rel (!%p18_p11) target bundleno = 8 (0x8), region = 90 }
 0x33a   :  { %2362 = vsyncpa [#allocation3], 1 }
 0x33b   :  { %2364 = vsyncpa [#allocation3 + $0x1], 1 }
 0x33c   :  { %2365 = vsyncpa [#allocation6], 1 }
 0x33d   :  { %2367 = vsyncpa [#allocation6 + $0x1], 1 }
 0x33e   :  { %2368 = vsyncpa [#allocation4], 1 }
 0x33f   :  { %2370 = vsyncpa [#allocation4 + $0x1], 1 }

</bundles_post_ra>
